<compile_context>
chip_gen: v7x
topology: tpu7x:2x2x1
jax: 0.10.0
libtpu: 0.0.40
codegen_flags: <defaults>
</compile_context>

<pallas_src>
import functools

import jax
import jax.numpy as jnp
from jax.experimental import pallas as pl
from jax.experimental.pallas import tpu as pltpu


def _sigmoid(x):
    # Explicit form (exp + div) keeps lowering on well-trodden EUP paths.
    return 1.0 / (1.0 + jnp.exp(-x))


# ----------------------------------------------------------------------------
# Kernel 1: fused bidirectional LSTM.
#   xc_ref  : (T*B, 2D)  time-major rows; row (t*B+b) = [x(t,b) | x(T-1-t,b)]
#   wih_ref : (2D, 8H)   block-diagonal, gate-interleaved columns
#   whh_ref : (2H, 8H)   block-diagonal, gate-interleaved columns
#   b_ref   : (1, 8H)    folded (b_ih + b_hh) per direction, interleaved
#   out_ref : (T, B, 2H) out[t,:, :H] = h_fwd(t), out[t,:,H:] = h_bwd(t)
# Gate column layout (8H): [i_f i_b | f_f f_b | g_f g_b | o_f o_b]
# (PyTorch gate order i, f, g, o).
# ----------------------------------------------------------------------------
def bilstm_kernel(xc_ref, wih_ref, whh_ref, b_ref, out_ref, *, T, B, H):
    # Hoisted input projection for both directions / both time orders
    # (one matmul, one bias broadcast -- not T of them).
    gx = (jnp.dot(xc_ref[...], wih_ref[...], preferred_element_type=jnp.float32)
          + b_ref[...])                                          # (T*B, 8H)
    whh = whh_ref[...]                                           # (2H, 8H), hoisted load

    h = jnp.zeros((B, 2 * H), jnp.float32)                       # [:, :H]=fwd, [:, H:]=bwd
    c = jnp.zeros((B, 2 * H), jnp.float32)

    # Fully unrolled time loop: only the h @ W_hh matmul sits on the serial
    # dependence chain; all indices are static.
    for t in range(T):
        g = (jnp.dot(h, whh, preferred_element_type=jnp.float32)
             + gx[t * B:(t + 1) * B, :])                         # (B, 8H)
        i_g = _sigmoid(g[:, 0:2 * H])
        f_g = _sigmoid(g[:, 2 * H:4 * H])
        g_g = jnp.tanh(g[:, 4 * H:6 * H])
        o_g = _sigmoid(g[:, 6 * H:8 * H])
        c = f_g * c + i_g * g_g
        h = o_g * jnp.tanh(c)
        out_ref[t, :, 0:H] = h[:, 0:H]                           # forward hidden @ t
        out_ref[T - 1 - t, :, H:2 * H] = h[:, H:2 * H]           # backward hidden @ T-1-t


def bilstm(xc, wih_blk, whh_blk, b_blk, *, T, B, H):
    kernel = functools.partial(bilstm_kernel, T=T, B=B, H=H)
    return pl.pallas_call(
        kernel,
        out_shape=jax.ShapeDtypeStruct((T, B, 2 * H), jnp.float32),
        in_specs=[pl.BlockSpec(memory_space=pltpu.MemorySpace.VMEM)] * 4,
        out_specs=pl.BlockSpec(memory_space=pltpu.MemorySpace.VMEM),
    )(xc, wih_blk, whh_blk, b_blk)


def _interleave_gates(mf, mb, H):
    """[i|f|g|o] (.., 4H) per direction -> (.., 8H) [i_f i_b|f_f f_b|g_f g_b|o_f o_b]."""
    lead = mf.shape[:-1]
    f4 = mf.reshape(lead + (4, H))
    b4 = mb.reshape(lead + (4, H))
    return jnp.stack([f4, b4], axis=-2).reshape(lead + (8 * H,))


def build_bilstm_inputs(params, emb, T, B, D, H):
    """Plain-JAX glue: block-diagonal gate-interleaved weights + fused input rows."""
    zih = jnp.zeros_like(params["wihT_fwd"])
    wih_blk = jnp.concatenate(
        [_interleave_gates(params["wihT_fwd"], zih, H),
         _interleave_gates(zih, params["wihT_bwd"], H)], axis=0)        # (2D, 8H)
    zhh = jnp.zeros_like(params["whhT_fwd"])
    whh_blk = jnp.concatenate(
        [_interleave_gates(params["whhT_fwd"], zhh, H),
         _interleave_gates(zhh, params["whhT_bwd"], H)], axis=0)        # (2H, 8H)
    b_blk = _interleave_gates(params["b_fwd"], params["b_bwd"], H)      # (1, 8H)

    # Time-major rows carrying both time orders: row (t*B+b) = [x(t,b) | x(T-1-t,b)].
    x_tm = jnp.transpose(emb, (1, 0, 2))                                # (T, B, D)
    xc = jnp.concatenate([x_tm, x_tm[::-1]], axis=-1).reshape(T * B, 2 * D)
    return xc, wih_blk, whh_blk, b_blk


# ----------------------------------------------------------------------------
# Kernel 2: fused CNN head.
#   conv1_D (per-timestep linear, no activation) ->
#   for each K in Ks: relu(convK_1) -> relu(conv3) -> relu(conv4, pad=(1,0)) ->
#   x3 + x4 -> global max-pool over time -> concat -> fc1.
# Everything 2D, whole batch in one invocation (static Python loop over B).
# ----------------------------------------------------------------------------
def make_cnn_head_kernel(B, T, Ks, Co):
    nK = len(Ks)

    def kernel(*refs):
        z_ref, w1_ref, b1_ref = refs[0:3]
        wK_refs = refs[3:3 + nK]
        bK_refs = refs[3 + nK:3 + 2 * nK]
        (w3_ref, b3_ref, w4_ref, b4_ref, wfc_ref, bfc_ref) = refs[3 + 2 * nK:9 + 2 * nK]
        logits_ref = refs[9 + 2 * nK]
        feat_ref = refs[10 + 2 * nK]

        # conv1_D over the whole (B*T) row slab: per-timestep linear, NO relu.
        y_all = (jnp.dot(z_ref[...], w1_ref[...], preferred_element_type=jnp.float32)
                 + b1_ref[...])                                   # (B*T, Co)

        # Hoist all weight/bias loads out of the batch loop.
        w3_taps = [w3_ref[d] for d in range(3)]
        w4_taps = [w4_ref[d] for d in range(3)]
        b3 = b3_ref[...]
        b4 = b4_ref[...]
        wK_taps = [[wK_refs[k][d] for d in range(Ks[k])] for k in range(nK)]
        bK = [bK_refs[k][...] for k in range(nK)]

        def conv_valid(x, taps, bias):
            Kt = len(taps)
            Lo = x.shape[0] - Kt + 1
            acc = jnp.dot(x[0:Lo, :], taps[0], preferred_element_type=jnp.float32)
            for d in range(1, Kt):
                acc = acc + jnp.dot(x[d:d + Lo, :], taps[d],
                                    preferred_element_type=jnp.float32)
            return acc + bias

        zero_row = jnp.zeros((1, Co), jnp.float32)
        feat_rows = []
        for b in range(B):
            y = y_all[b * T:(b + 1) * T, :]                               # (T, Co)
            pooled = []
            for k in range(nK):
                a = jnp.maximum(conv_valid(y, wK_taps[k], bK[k]), 0.0)    # (L1, Co)
                x3 = jnp.maximum(conv_valid(a, w3_taps, b3), 0.0)         # (L2, Co)
                # conv4: kernel 3, padding (1, 0) along time -> same length L2
                x3p = jnp.concatenate([zero_row, x3, zero_row], axis=0)   # (L2+2, Co)
                x4 = jnp.maximum(conv_valid(x3p, w4_taps, b4), 0.0)       # (L2, Co)
                pooled.append(jnp.max(x3 + x4, axis=0, keepdims=True))    # (1, Co)
            feat_rows.append(jnp.concatenate(pooled, axis=1))             # (1, nK*Co)

        feat = jnp.concatenate(feat_rows, axis=0)                         # (B, nK*Co)
        feat_ref[...] = feat
        # TODO(synk): CNN_dropout is identity at inference (no RNG masking).
        logits_ref[...] = (jnp.dot(feat, wfc_ref[...], preferred_element_type=jnp.float32)
                           + bfc_ref[...])

    return kernel


def cnn_head(z2d, params, Ks, *, B, T):
    Co = params["w1"].shape[1]
    C = params["wfc"].shape[1]
    nK = len(Ks)
    kernel = make_cnn_head_kernel(B, T, tuple(Ks), Co)

    args = [z2d, params["w1"], params["b1"]]
    args += [params["wK"][i] for i in range(nK)]
    args += [params["bK"][i] for i in range(nK)]
    args += [params["w3"], params["b3"], params["w4"], params["b4"],
             params["wfc"], params["bfc"]]

    logits, feat = pl.pallas_call(
        kernel,
        out_shape=(jax.ShapeDtypeStruct((B, C), jnp.float32),
                   jax.ShapeDtypeStruct((B, nK * Co), jnp.float32)),
        in_specs=[pl.BlockSpec(memory_space=pltpu.MemorySpace.VMEM)] * len(args),
        out_specs=(pl.BlockSpec(memory_space=pltpu.MemorySpace.VMEM),
                   pl.BlockSpec(memory_space=pltpu.MemorySpace.VMEM)),
    )(*args)
    return logits, feat


# ----------------------------------------------------------------------------
# Parameter init (deterministic, synthetic)
# ----------------------------------------------------------------------------
def _nrm(key, idx, shape, scale=0.1):
    return scale * jax.random.normal(jax.random.fold_in(key, idx), shape, dtype=jnp.float32)


def init_params(key, V, D, H, Co, Ks, C):
    p = {}
    ctr = [0]

    def nxt(shape):
        ctr[0] += 1
        return _nrm(key, ctr[0], shape)

    p["emb_A"] = nxt((V, D))
    p["emb_B"] = nxt((V, D))
    for d in ("fwd", "bwd"):
        p[f"wihT_{d}"] = nxt((D, 4 * H))   # W_ih^T, gate order i,f,g,o
        p[f"whhT_{d}"] = nxt((H, 4 * H))   # W_hh^T
        p[f"b_{d}"] = nxt((1, 4 * H))      # b_ih + b_hh folded together
    p["w1"] = nxt((2 * H, Co))             # conv1_D weight (Co,1,1,2H) -> (2H, Co)
    p["b1"] = nxt((1, Co))
    p["wK"] = [nxt((K, Co, Co)) for K in Ks]   # convK_1 weights, taps-first layout
    p["bK"] = [nxt((1, Co)) for _ in Ks]
    p["w3"] = nxt((3, Co, Co))
    p["b3"] = nxt((1, Co))
    p["w4"] = nxt((3, Co, Co))
    p["b4"] = nxt((1, Co))
    p["wfc"] = nxt((len(Ks) * Co, C))
    p["bfc"] = nxt((1, C))
    return p


# ----------------------------------------------------------------------------
# Full forward (TC.forward): embedding gather in plain JAX (glue), then
# two fused Pallas kernels.
# ----------------------------------------------------------------------------
def tc_forward(params, tokens, Ks):
    B, T = tokens.shape
    D = params["emb_A"].shape[1]
    H = params["whhT_fwd"].shape[0]

    # embed_A(x) + embed_B(x)   (gather glue in plain JAX)
    emb = (jnp.take(params["emb_A"], tokens, axis=0)
           + jnp.take(params["emb_B"], tokens, axis=0))           # (B, T, D)

    xc, wih_blk, whh_blk, b_blk = build_bilstm_inputs(params, emb, T, B, D, H)
    # TODO(synk): LSTM_dropout is a no-op for num_layers=1 (matches PyTorch).
    lstm_out = bilstm(xc, wih_blk, whh_blk, b_blk, T=T, B=B, H=H)  # (T, B, 2H)
    z2d = jnp.transpose(lstm_out, (1, 0, 2)).reshape(B * T, 2 * H)  # (B*T, 2H), batch-major

    logits, feature = cnn_head(z2d, params, Ks, B=B, T=T)
    return logits, feature


# ----------------------------------------------------------------------------
# Pure-JAX reference (same semantics as the PyTorch module) for validation.
# ----------------------------------------------------------------------------
def reference_forward(params, tokens, Ks):
    B, T = tokens.shape
    H = params["whhT_fwd"].shape[0]
    emb = (jnp.take(params["emb_A"], tokens, axis=0)
           + jnp.take(params["emb_B"], tokens, axis=0))           # (B, T, D)

    def run_dir(wihT, whhT, b, time_order):
        h = jnp.zeros((B, H), jnp.float32)
        c = jnp.zeros((B, H), jnp.float32)
        hs = [None] * T
        for t in time_order:
            g = emb[:, t, :] @ wihT + h @ whhT + b
            i = _sigmoid(g[:, 0:H])
            f = _sigmoid(g[:, H:2 * H])
            gg = jnp.tanh(g[:, 2 * H:3 * H])
            o = _sigmoid(g[:, 3 * H:4 * H])
            c = f * c + i * gg
            h = o * jnp.tanh(c)
            hs[t] = h
        return jnp.stack(hs, axis=1)                              # (B, T, H)

    hf = run_dir(params["wihT_fwd"], params["whhT_fwd"], params["b_fwd"], range(T))
    hb = run_dir(params["wihT_bwd"], params["whhT_bwd"], params["b_bwd"],
                 range(T - 1, -1, -1))
    y = jnp.concatenate([hf, hb], axis=-1)                        # (B, T, 2H)

    y1 = y @ params["w1"] + params["b1"]                          # (B, T, Co)

    def conv_valid(x, w, bias):                                   # x (B,L,Ci), w (K,Ci,Co)
        K = w.shape[0]
        L = x.shape[1] - K + 1
        acc = x[:, 0:L, :] @ w[0]
        for d in range(1, K):
            acc = acc + x[:, d:d + L, :] @ w[d]
        return acc + bias

    pooled = []
    for k in range(len(Ks)):
        a = jax.nn.relu(conv_valid(y1, params["wK"][k], params["bK"][k]))
        x3 = jax.nn.relu(conv_valid(a, params["w3"], params["b3"]))
        x3p = jnp.pad(x3, ((0, 0), (1, 1), (0, 0)))
        x4 = jax.nn.relu(conv_valid(x3p, params["w4"], params["b4"]))
        pooled.append(jnp.max(x3 + x4, axis=1))                   # (B, Co)
    feat = jnp.concatenate(pooled, axis=1)                        # (B, nK*Co)
    logits = feat @ params["wfc"] + params["bfc"]
    return logits, feat


if __name__ == "__main__":
    # Small shapes consistent with the module's forward.
    V, D, H, Co, C = 100, 16, 32, 8, 2
    Ks = [3, 4, 5]
    B, T = 2, 16

    key = jax.random.PRNGKey(0)
    params = init_params(key, V, D, H, Co, Ks, C)
    tokens = jax.random.randint(jax.random.fold_in(key, 999), (B, T), 0, V, dtype=jnp.int32)

    fwd = jax.jit(lambda p, tok: tc_forward(p, tok, Ks))
    logits, feature = fwd(params, tokens)
    jax.block_until_ready((logits, feature))

    assert logits.shape == (B, C), logits.shape
    assert feature.shape == (B, len(Ks) * Co), feature.shape
    assert bool(jnp.all(jnp.isfinite(logits))) and bool(jnp.all(jnp.isfinite(feature)))

    ref_logits, ref_feature = reference_forward(params, tokens, Ks)
    assert bool(jnp.allclose(feature, ref_feature, atol=2e-3, rtol=2e-3))
    assert bool(jnp.allclose(logits, ref_logits, atol=2e-3, rtol=2e-3))
    print("KERNEL_OK")
</pallas_src>

<mosaic_0001>
module attributes {stable_mosaic.version = 11 : i64} {
  func.func @bilstm_kernel(%arg0: memref<32x32xf32, #tpu.memory_space<vmem>>, %arg1: memref<32x256xf32, #tpu.memory_space<vmem>>, %arg2: memref<64x256xf32, #tpu.memory_space<vmem>>, %arg3: memref<1x256xf32, #tpu.memory_space<vmem>>, %arg4: memref<16x2x64xf32, #tpu.memory_space<vmem>>) attributes {dimension_semantics = [], scalar_prefetch = 0 : i64, scratch_operands = 0 : i64, tpu.core_type = #tpu.core_type<tc>} {
    %c0 = arith.constant 0 : index
    %c0_0 = arith.constant 0 : index
    %0 = vector.load %arg0[%c0, %c0_0] : memref<32x32xf32, #tpu.memory_space<vmem>>, vector<32x32xf32>
    %c0_1 = arith.constant 0 : index
    %c0_2 = arith.constant 0 : index
    %1 = vector.load %arg1[%c0_1, %c0_2] : memref<32x256xf32, #tpu.memory_space<vmem>>, vector<32x256xf32>
    %cst = arith.constant dense<0.000000e+00> : vector<32x256xf32>
    %2 = tpu.matmul %0, %1, %cst {dimension_numbers = #tpu.dot_dimension_numbers<[1], [0], [0], [1], [0, 0, 1, 1], [], []>} : vector<32x32xf32>, vector<32x256xf32>, vector<32x256xf32> -> vector<32x256xf32>
    %c0_3 = arith.constant 0 : index
    %c0_4 = arith.constant 0 : index
    %3 = vector.load %arg3[%c0_3, %c0_4] : memref<1x256xf32, #tpu.memory_space<vmem>>, vector<1x256xf32>
    %4 = vector.broadcast %3 : vector<1x256xf32> to vector<32x256xf32>
    %5 = arith.addf %2, %4 : vector<32x256xf32>
    %c0_5 = arith.constant 0 : index
    %c0_6 = arith.constant 0 : index
    %6 = vector.load %arg2[%c0_5, %c0_6] : memref<64x256xf32, #tpu.memory_space<vmem>>, vector<64x256xf32>
    %cst_7 = arith.constant 0.000000e+00 : f32
    %7 = vector.broadcast %cst_7 : f32 to vector<2x64xf32>
    %cst_8 = arith.constant 0.000000e+00 : f32
    %8 = vector.broadcast %cst_8 : f32 to vector<2x64xf32>
    %cst_9 = arith.constant dense<0.000000e+00> : vector<2x256xf32>
    %9 = tpu.matmul %7, %6, %cst_9 {dimension_numbers = #tpu.dot_dimension_numbers<[1], [0], [0], [1], [0, 0, 1, 1], [], []>} : vector<2x64xf32>, vector<64x256xf32>, vector<2x256xf32> -> vector<2x256xf32>
    %10 = vector.extract_strided_slice %5 {offsets = [0, 0], sizes = [2, 256], strides = [1, 1]} : vector<32x256xf32> to vector<2x256xf32>
    %11 = arith.addf %9, %10 : vector<2x256xf32>
    %12 = vector.extract_strided_slice %11 {offsets = [0, 0], sizes = [2, 64], strides = [1, 1]} : vector<2x256xf32> to vector<2x64xf32>
    %cst_10 = arith.constant 0.000000e+00 : f32
    %13 = vector.broadcast %cst_10 : f32 to vector<2x64xf32>
    %14 = arith.subf %13, %12 : vector<2x64xf32>
    %15 = math.exp %14 : vector<2x64xf32>
    %cst_11 = arith.constant 1.000000e+00 : f32
    %16 = vector.broadcast %cst_11 : f32 to vector<2x64xf32>
    %17 = arith.addf %16, %15 : vector<2x64xf32>
    %cst_12 = arith.constant 1.000000e+00 : f32
    %18 = vector.broadcast %cst_12 : f32 to vector<2x64xf32>
    %19 = arith.divf %18, %17 : vector<2x64xf32>
    %20 = vector.extract_strided_slice %11 {offsets = [0, 64], sizes = [2, 64], strides = [1, 1]} : vector<2x256xf32> to vector<2x64xf32>
    %cst_13 = arith.constant 0.000000e+00 : f32
    %21 = vector.broadcast %cst_13 : f32 to vector<2x64xf32>
    %22 = arith.subf %21, %20 : vector<2x64xf32>
    %23 = math.exp %22 : vector<2x64xf32>
    %cst_14 = arith.constant 1.000000e+00 : f32
    %24 = vector.broadcast %cst_14 : f32 to vector<2x64xf32>
    %25 = arith.addf %24, %23 : vector<2x64xf32>
    %cst_15 = arith.constant 1.000000e+00 : f32
    %26 = vector.broadcast %cst_15 : f32 to vector<2x64xf32>
    %27 = arith.divf %26, %25 : vector<2x64xf32>
    %28 = vector.extract_strided_slice %11 {offsets = [0, 128], sizes = [2, 64], strides = [1, 1]} : vector<2x256xf32> to vector<2x64xf32>
    %29 = math.tanh %28 : vector<2x64xf32>
    %30 = vector.extract_strided_slice %11 {offsets = [0, 192], sizes = [2, 64], strides = [1, 1]} : vector<2x256xf32> to vector<2x64xf32>
    %cst_16 = arith.constant 0.000000e+00 : f32
    %31 = vector.broadcast %cst_16 : f32 to vector<2x64xf32>
    %32 = arith.subf %31, %30 : vector<2x64xf32>
    %33 = math.exp %32 : vector<2x64xf32>
    %cst_17 = arith.constant 1.000000e+00 : f32
    %34 = vector.broadcast %cst_17 : f32 to vector<2x64xf32>
    %35 = arith.addf %34, %33 : vector<2x64xf32>
    %cst_18 = arith.constant 1.000000e+00 : f32
    %36 = vector.broadcast %cst_18 : f32 to vector<2x64xf32>
    %37 = arith.divf %36, %35 : vector<2x64xf32>
    %38 = arith.mulf %27, %8 : vector<2x64xf32>
    %39 = arith.mulf %19, %29 : vector<2x64xf32>
    %40 = arith.addf %38, %39 : vector<2x64xf32>
    %41 = math.tanh %40 : vector<2x64xf32>
    %42 = arith.mulf %37, %41 : vector<2x64xf32>
    %43 = vector.extract_strided_slice %42 {offsets = [0, 0], sizes = [2, 32], strides = [1, 1]} : vector<2x64xf32> to vector<2x32xf32>
    %c0_19 = arith.constant 0 : index
    %c0_20 = arith.constant 0 : index
    %c0_21 = arith.constant 0 : index
    %44 = vector.load %arg4[%c0_19, %c0_20, %c0_21] : memref<16x2x64xf32, #tpu.memory_space<vmem>>, vector<1x2x32xf32>
    %45 = vector.shape_cast %44 : vector<1x2x32xf32> to vector<2x32xf32>
    %46 = vector.shape_cast %43 : vector<2x32xf32> to vector<1x2x32xf32>
    tpu.vector_store %arg4[%c0_19, %c0_20, %c0_21], %46 {strides = array<i32>} : memref<16x2x64xf32, #tpu.memory_space<vmem>>, vector<1x2x32xf32>,
    %47 = vector.extract_strided_slice %42 {offsets = [0, 32], sizes = [2, 32], strides = [1, 1]} : vector<2x64xf32> to vector<2x32xf32>
    %c15 = arith.constant 15 : index
    %c0_22 = arith.constant 0 : index
    %c32 = arith.constant 32 : index
    %48 = vector.load %arg4[%c15, %c0_22, %c32] : memref<16x2x64xf32, #tpu.memory_space<vmem>>, vector<1x2x32xf32>
    %49 = vector.shape_cast %48 : vector<1x2x32xf32> to vector<2x32xf32>
    %50 = vector.shape_cast %47 : vector<2x32xf32> to vector<1x2x32xf32>
    tpu.vector_store %arg4[%c15, %c0_22, %c32], %50 {strides = array<i32>} : memref<16x2x64xf32, #tpu.memory_space<vmem>>, vector<1x2x32xf32>,
    %cst_23 = arith.constant dense<0.000000e+00> : vector<2x256xf32>
    %51 = tpu.matmul %42, %6, %cst_23 {dimension_numbers = #tpu.dot_dimension_numbers<[1], [0], [0], [1], [0, 0, 1, 1], [], []>} : vector<2x64xf32>, vector<64x256xf32>, vector<2x256xf32> -> vector<2x256xf32>
    %52 = vector.extract_strided_slice %5 {offsets = [2, 0], sizes = [2, 256], strides = [1, 1]} : vector<32x256xf32> to vector<2x256xf32>
    %53 = arith.addf %51, %52 : vector<2x256xf32>
    %54 = vector.extract_strided_slice %53 {offsets = [0, 0], sizes = [2, 64], strides = [1, 1]} : vector<2x256xf32> to vector<2x64xf32>
    %cst_24 = arith.constant 0.000000e+00 : f32
    %55 = vector.broadcast %cst_24 : f32 to vector<2x64xf32>
    %56 = arith.subf %55, %54 : vector<2x64xf32>
    %57 = math.exp %56 : vector<2x64xf32>
    %cst_25 = arith.constant 1.000000e+00 : f32
    %58 = vector.broadcast %cst_25 : f32 to vector<2x64xf32>
    %59 = arith.addf %58, %57 : vector<2x64xf32>
    %cst_26 = arith.constant 1.000000e+00 : f32
    %60 = vector.broadcast %cst_26 : f32 to vector<2x64xf32>
    %61 = arith.divf %60, %59 : vector<2x64xf32>
    %62 = vector.extract_strided_slice %53 {offsets = [0, 64], sizes = [2, 64], strides = [1, 1]} : vector<2x256xf32> to vector<2x64xf32>
    %cst_27 = arith.constant 0.000000e+00 : f32
    %63 = vector.broadcast %cst_27 : f32 to vector<2x64xf32>
    %64 = arith.subf %63, %62 : vector<2x64xf32>
    %65 = math.exp %64 : vector<2x64xf32>
    %cst_28 = arith.constant 1.000000e+00 : f32
    %66 = vector.broadcast %cst_28 : f32 to vector<2x64xf32>
    %67 = arith.addf %66, %65 : vector<2x64xf32>
    %cst_29 = arith.constant 1.000000e+00 : f32
    %68 = vector.broadcast %cst_29 : f32 to vector<2x64xf32>
    %69 = arith.divf %68, %67 : vector<2x64xf32>
    %70 = vector.extract_strided_slice %53 {offsets = [0, 128], sizes = [2, 64], strides = [1, 1]} : vector<2x256xf32> to vector<2x64xf32>
    %71 = math.tanh %70 : vector<2x64xf32>
    %72 = vector.extract_strided_slice %53 {offsets = [0, 192], sizes = [2, 64], strides = [1, 1]} : vector<2x256xf32> to vector<2x64xf32>
    %cst_30 = arith.constant 0.000000e+00 : f32
    %73 = vector.broadcast %cst_30 : f32 to vector<2x64xf32>
    %74 = arith.subf %73, %72 : vector<2x64xf32>
    %75 = math.exp %74 : vector<2x64xf32>
    %cst_31 = arith.constant 1.000000e+00 : f32
    %76 = vector.broadcast %cst_31 : f32 to vector<2x64xf32>
    %77 = arith.addf %76, %75 : vector<2x64xf32>
    %cst_32 = arith.constant 1.000000e+00 : f32
    %78 = vector.broadcast %cst_32 : f32 to vector<2x64xf32>
    %79 = arith.divf %78, %77 : vector<2x64xf32>
    %80 = arith.mulf %69, %40 : vector<2x64xf32>
    %81 = arith.mulf %61, %71 : vector<2x64xf32>
    %82 = arith.addf %80, %81 : vector<2x64xf32>
    %83 = math.tanh %82 : vector<2x64xf32>
    %84 = arith.mulf %79, %83 : vector<2x64xf32>
    %85 = vector.extract_strided_slice %84 {offsets = [0, 0], sizes = [2, 32], strides = [1, 1]} : vector<2x64xf32> to vector<2x32xf32>
    %c1 = arith.constant 1 : index
    %c0_33 = arith.constant 0 : index
    %c0_34 = arith.constant 0 : index
    %86 = vector.load %arg4[%c1, %c0_33, %c0_34] : memref<16x2x64xf32, #tpu.memory_space<vmem>>, vector<1x2x32xf32>
    %87 = vector.shape_cast %86 : vector<1x2x32xf32> to vector<2x32xf32>
    %88 = vector.shape_cast %85 : vector<2x32xf32> to vector<1x2x32xf32>
    tpu.vector_store %arg4[%c1, %c0_33, %c0_34], %88 {strides = array<i32>} : memref<16x2x64xf32, #tpu.memory_space<vmem>>, vector<1x2x32xf32>,
    %89 = vector.extract_strided_slice %84 {offsets = [0, 32], sizes = [2, 32], strides = [1, 1]} : vector<2x64xf32> to vector<2x32xf32>
    %c14 = arith.constant 14 : index
    %c0_35 = arith.constant 0 : index
    %c32_36 = arith.constant 32 : index
    %90 = vector.load %arg4[%c14, %c0_35, %c32_36] : memref<16x2x64xf32, #tpu.memory_space<vmem>>, vector<1x2x32xf32>
    %91 = vector.shape_cast %90 : vector<1x2x32xf32> to vector<2x32xf32>
    %92 = vector.shape_cast %89 : vector<2x32xf32> to vector<1x2x32xf32>
    tpu.vector_store %arg4[%c14, %c0_35, %c32_36], %92 {strides = array<i32>} : memref<16x2x64xf32, #tpu.memory_space<vmem>>, vector<1x2x32xf32>,
    %cst_37 = arith.constant dense<0.000000e+00> : vector<2x256xf32>
    %93 = tpu.matmul %84, %6, %cst_37 {dimension_numbers = #tpu.dot_dimension_numbers<[1], [0], [0], [1], [0, 0, 1, 1], [], []>} : vector<2x64xf32>, vector<64x256xf32>, vector<2x256xf32> -> vector<2x256xf32>
    %94 = vector.extract_strided_slice %5 {offsets = [4, 0], sizes = [2, 256], strides = [1, 1]} : vector<32x256xf32> to vector<2x256xf32>
    %95 = arith.addf %93, %94 : vector<2x256xf32>
    %96 = vector.extract_strided_slice %95 {offsets = [0, 0], sizes = [2, 64], strides = [1, 1]} : vector<2x256xf32> to vector<2x64xf32>
    %cst_38 = arith.constant 0.000000e+00 : f32
    %97 = vector.broadcast %cst_38 : f32 to vector<2x64xf32>
    %98 = arith.subf %97, %96 : vector<2x64xf32>
    %99 = math.exp %98 : vector<2x64xf32>
    %cst_39 = arith.constant 1.000000e+00 : f32
    %100 = vector.broadcast %cst_39 : f32 to vector<2x64xf32>
    %101 = arith.addf %100, %99 : vector<2x64xf32>
    %cst_40 = arith.constant 1.000000e+00 : f32
    %102 = vector.broadcast %cst_40 : f32 to vector<2x64xf32>
    %103 = arith.divf %102, %101 : vector<2x64xf32>
    %104 = vector.extract_strided_slice %95 {offsets = [0, 64], sizes = [2, 64], strides = [1, 1]} : vector<2x256xf32> to vector<2x64xf32>
    %cst_41 = arith.constant 0.000000e+00 : f32
    %105 = vector.broadcast %cst_41 : f32 to vector<2x64xf32>
    %106 = arith.subf %105, %104 : vector<2x64xf32>
    %107 = math.exp %106 : vector<2x64xf32>
    %cst_42 = arith.constant 1.000000e+00 : f32
    %108 = vector.broadcast %cst_42 : f32 to vector<2x64xf32>
    %109 = arith.addf %108, %107 : vector<2x64xf32>
    %cst_43 = arith.constant 1.000000e+00 : f32
    %110 = vector.broadcast %cst_43 : f32 to vector<2x64xf32>
    %111 = arith.divf %110, %109 : vector<2x64xf32>
    %112 = vector.extract_strided_slice %95 {offsets = [0, 128], sizes = [2, 64], strides = [1, 1]} : vector<2x256xf32> to vector<2x64xf32>
    %113 = math.tanh %112 : vector<2x64xf32>
    %114 = vector.extract_strided_slice %95 {offsets = [0, 192], sizes = [2, 64], strides = [1, 1]} : vector<2x256xf32> to vector<2x64xf32>
    %cst_44 = arith.constant 0.000000e+00 : f32
    %115 = vector.broadcast %cst_44 : f32 to vector<2x64xf32>
    %116 = arith.subf %115, %114 : vector<2x64xf32>
    %117 = math.exp %116 : vector<2x64xf32>
    %cst_45 = arith.constant 1.000000e+00 : f32
    %118 = vector.broadcast %cst_45 : f32 to vector<2x64xf32>
    %119 = arith.addf %118, %117 : vector<2x64xf32>
    %cst_46 = arith.constant 1.000000e+00 : f32
    %120 = vector.broadcast %cst_46 : f32 to vector<2x64xf32>
    %121 = arith.divf %120, %119 : vector<2x64xf32>
    %122 = arith.mulf %111, %82 : vector<2x64xf32>
    %123 = arith.mulf %103, %113 : vector<2x64xf32>
    %124 = arith.addf %122, %123 : vector<2x64xf32>
    %125 = math.tanh %124 : vector<2x64xf32>
    %126 = arith.mulf %121, %125 : vector<2x64xf32>
    %127 = vector.extract_strided_slice %126 {offsets = [0, 0], sizes = [2, 32], strides = [1, 1]} : vector<2x64xf32> to vector<2x32xf32>
    %c2 = arith.constant 2 : index
    %c0_47 = arith.constant 0 : index
    %c0_48 = arith.constant 0 : index
    %128 = vector.load %arg4[%c2, %c0_47, %c0_48] : memref<16x2x64xf32, #tpu.memory_space<vmem>>, vector<1x2x32xf32>
    %129 = vector.shape_cast %128 : vector<1x2x32xf32> to vector<2x32xf32>
    %130 = vector.shape_cast %127 : vector<2x32xf32> to vector<1x2x32xf32>
    tpu.vector_store %arg4[%c2, %c0_47, %c0_48], %130 {strides = array<i32>} : memref<16x2x64xf32, #tpu.memory_space<vmem>>, vector<1x2x32xf32>,
    %131 = vector.extract_strided_slice %126 {offsets = [0, 32], sizes = [2, 32], strides = [1, 1]} : vector<2x64xf32> to vector<2x32xf32>
    %c13 = arith.constant 13 : index
    %c0_49 = arith.constant 0 : index
    %c32_50 = arith.constant 32 : index
    %132 = vector.load %arg4[%c13, %c0_49, %c32_50] : memref<16x2x64xf32, #tpu.memory_space<vmem>>, vector<1x2x32xf32>
    %133 = vector.shape_cast %132 : vector<1x2x32xf32> to vector<2x32xf32>
    %134 = vector.shape_cast %131 : vector<2x32xf32> to vector<1x2x32xf32>
    tpu.vector_store %arg4[%c13, %c0_49, %c32_50], %134 {strides = array<i32>} : memref<16x2x64xf32, #tpu.memory_space<vmem>>, vector<1x2x32xf32>,
    %cst_51 = arith.constant dense<0.000000e+00> : vector<2x256xf32>
    %135 = tpu.matmul %126, %6, %cst_51 {dimension_numbers = #tpu.dot_dimension_numbers<[1], [0], [0], [1], [0, 0, 1, 1], [], []>} : vector<2x64xf32>, vector<64x256xf32>, vector<2x256xf32> -> vector<2x256xf32>
    %136 = vector.extract_strided_slice %5 {offsets = [6, 0], sizes = [2, 256], strides = [1, 1]} : vector<32x256xf32> to vector<2x256xf32>
    %137 = arith.addf %135, %136 : vector<2x256xf32>
    %138 = vector.extract_strided_slice %137 {offsets = [0, 0], sizes = [2, 64], strides = [1, 1]} : vector<2x256xf32> to vector<2x64xf32>
    %cst_52 = arith.constant 0.000000e+00 : f32
    %139 = vector.broadcast %cst_52 : f32 to vector<2x64xf32>
    %140 = arith.subf %139, %138 : vector<2x64xf32>
    %141 = math.exp %140 : vector<2x64xf32>
    %cst_53 = arith.constant 1.000000e+00 : f32
    %142 = vector.broadcast %cst_53 : f32 to vector<2x64xf32>
    %143 = arith.addf %142, %141 : vector<2x64xf32>
    %cst_54 = arith.constant 1.000000e+00 : f32
    %144 = vector.broadcast %cst_54 : f32 to vector<2x64xf32>
    %145 = arith.divf %144, %143 : vector<2x64xf32>
    %146 = vector.extract_strided_slice %137 {offsets = [0, 64], sizes = [2, 64], strides = [1, 1]} : vector<2x256xf32> to vector<2x64xf32>
    %cst_55 = arith.constant 0.000000e+00 : f32
    %147 = vector.broadcast %cst_55 : f32 to vector<2x64xf32>
    %148 = arith.subf %147, %146 : vector<2x64xf32>
    %149 = math.exp %148 : vector<2x64xf32>
    %cst_56 = arith.constant 1.000000e+00 : f32
    %150 = vector.broadcast %cst_56 : f32 to vector<2x64xf32>
    %151 = arith.addf %150, %149 : vector<2x64xf32>
    %cst_57 = arith.constant 1.000000e+00 : f32
    %152 = vector.broadcast %cst_57 : f32 to vector<2x64xf32>
    %153 = arith.divf %152, %151 : vector<2x64xf32>
    %154 = vector.extract_strided_slice %137 {offsets = [0, 128], sizes = [2, 64], strides = [1, 1]} : vector<2x256xf32> to vector<2x64xf32>
    %155 = math.tanh %154 : vector<2x64xf32>
    %156 = vector.extract_strided_slice %137 {offsets = [0, 192], sizes = [2, 64], strides = [1, 1]} : vector<2x256xf32> to vector<2x64xf32>
    %cst_58 = arith.constant 0.000000e+00 : f32
    %157 = vector.broadcast %cst_58 : f32 to vector<2x64xf32>
    %158 = arith.subf %157, %156 : vector<2x64xf32>
    %159 = math.exp %158 : vector<2x64xf32>
    %cst_59 = arith.constant 1.000000e+00 : f32
    %160 = vector.broadcast %cst_59 : f32 to vector<2x64xf32>
    %161 = arith.addf %160, %159 : vector<2x64xf32>
    %cst_60 = arith.constant 1.000000e+00 : f32
    %162 = vector.broadcast %cst_60 : f32 to vector<2x64xf32>
    %163 = arith.divf %162, %161 : vector<2x64xf32>
    %164 = arith.mulf %153, %124 : vector<2x64xf32>
    %165 = arith.mulf %145, %155 : vector<2x64xf32>
    %166 = arith.addf %164, %165 : vector<2x64xf32>
    %167 = math.tanh %166 : vector<2x64xf32>
    %168 = arith.mulf %163, %167 : vector<2x64xf32>
    %169 = vector.extract_strided_slice %168 {offsets = [0, 0], sizes = [2, 32], strides = [1, 1]} : vector<2x64xf32> to vector<2x32xf32>
    %c3 = arith.constant 3 : index
    %c0_61 = arith.constant 0 : index
    %c0_62 = arith.constant 0 : index
    %170 = vector.load %arg4[%c3, %c0_61, %c0_62] : memref<16x2x64xf32, #tpu.memory_space<vmem>>, vector<1x2x32xf32>
    %171 = vector.shape_cast %170 : vector<1x2x32xf32> to vector<2x32xf32>
    %172 = vector.shape_cast %169 : vector<2x32xf32> to vector<1x2x32xf32>
    tpu.vector_store %arg4[%c3, %c0_61, %c0_62], %172 {strides = array<i32>} : memref<16x2x64xf32, #tpu.memory_space<vmem>>, vector<1x2x32xf32>,
    %173 = vector.extract_strided_slice %168 {offsets = [0, 32], sizes = [2, 32], strides = [1, 1]} : vector<2x64xf32> to vector<2x32xf32>
    %c12 = arith.constant 12 : index
    %c0_63 = arith.constant 0 : index
    %c32_64 = arith.constant 32 : index
    %174 = vector.load %arg4[%c12, %c0_63, %c32_64] : memref<16x2x64xf32, #tpu.memory_space<vmem>>, vector<1x2x32xf32>
    %175 = vector.shape_cast %174 : vector<1x2x32xf32> to vector<2x32xf32>
    %176 = vector.shape_cast %173 : vector<2x32xf32> to vector<1x2x32xf32>
    tpu.vector_store %arg4[%c12, %c0_63, %c32_64], %176 {strides = array<i32>} : memref<16x2x64xf32, #tpu.memory_space<vmem>>, vector<1x2x32xf32>,
    %cst_65 = arith.constant dense<0.000000e+00> : vector<2x256xf32>
    %177 = tpu.matmul %168, %6, %cst_65 {dimension_numbers = #tpu.dot_dimension_numbers<[1], [0], [0], [1], [0, 0, 1, 1], [], []>} : vector<2x64xf32>, vector<64x256xf32>, vector<2x256xf32> -> vector<2x256xf32>
    %178 = vector.extract_strided_slice %5 {offsets = [8, 0], sizes = [2, 256], strides = [1, 1]} : vector<32x256xf32> to vector<2x256xf32>
    %179 = arith.addf %177, %178 : vector<2x256xf32>
    %180 = vector.extract_strided_slice %179 {offsets = [0, 0], sizes = [2, 64], strides = [1, 1]} : vector<2x256xf32> to vector<2x64xf32>
    %cst_66 = arith.constant 0.000000e+00 : f32
    %181 = vector.broadcast %cst_66 : f32 to vector<2x64xf32>
    %182 = arith.subf %181, %180 : vector<2x64xf32>
    %183 = math.exp %182 : vector<2x64xf32>
    %cst_67 = arith.constant 1.000000e+00 : f32
    %184 = vector.broadcast %cst_67 : f32 to vector<2x64xf32>
    %185 = arith.addf %184, %183 : vector<2x64xf32>
    %cst_68 = arith.constant 1.000000e+00 : f32
    %186 = vector.broadcast %cst_68 : f32 to vector<2x64xf32>
    %187 = arith.divf %186, %185 : vector<2x64xf32>
    %188 = vector.extract_strided_slice %179 {offsets = [0, 64], sizes = [2, 64], strides = [1, 1]} : vector<2x256xf32> to vector<2x64xf32>
    %cst_69 = arith.constant 0.000000e+00 : f32
    %189 = vector.broadcast %cst_69 : f32 to vector<2x64xf32>
    %190 = arith.subf %189, %188 : vector<2x64xf32>
    %191 = math.exp %190 : vector<2x64xf32>
    %cst_70 = arith.constant 1.000000e+00 : f32
    %192 = vector.broadcast %cst_70 : f32 to vector<2x64xf32>
    %193 = arith.addf %192, %191 : vector<2x64xf32>
    %cst_71 = arith.constant 1.000000e+00 : f32
    %194 = vector.broadcast %cst_71 : f32 to vector<2x64xf32>
    %195 = arith.divf %194, %193 : vector<2x64xf32>
    %196 = vector.extract_strided_slice %179 {offsets = [0, 128], sizes = [2, 64], strides = [1, 1]} : vector<2x256xf32> to vector<2x64xf32>
    %197 = math.tanh %196 : vector<2x64xf32>
    %198 = vector.extract_strided_slice %179 {offsets = [0, 192], sizes = [2, 64], strides = [1, 1]} : vector<2x256xf32> to vector<2x64xf32>
    %cst_72 = arith.constant 0.000000e+00 : f32
    %199 = vector.broadcast %cst_72 : f32 to vector<2x64xf32>
    %200 = arith.subf %199, %198 : vector<2x64xf32>
    %201 = math.exp %200 : vector<2x64xf32>
    %cst_73 = arith.constant 1.000000e+00 : f32
    %202 = vector.broadcast %cst_73 : f32 to vector<2x64xf32>
    %203 = arith.addf %202, %201 : vector<2x64xf32>
    %cst_74 = arith.constant 1.000000e+00 : f32
    %204 = vector.broadcast %cst_74 : f32 to vector<2x64xf32>
    %205 = arith.divf %204, %203 : vector<2x64xf32>
    %206 = arith.mulf %195, %166 : vector<2x64xf32>
    %207 = arith.mulf %187, %197 : vector<2x64xf32>
    %208 = arith.addf %206, %207 : vector<2x64xf32>
    %209 = math.tanh %208 : vector<2x64xf32>
    %210 = arith.mulf %205, %209 : vector<2x64xf32>
    %211 = vector.extract_strided_slice %210 {offsets = [0, 0], sizes = [2, 32], strides = [1, 1]} : vector<2x64xf32> to vector<2x32xf32>
    %c4 = arith.constant 4 : index
    %c0_75 = arith.constant 0 : index
    %c0_76 = arith.constant 0 : index
    %212 = vector.load %arg4[%c4, %c0_75, %c0_76] : memref<16x2x64xf32, #tpu.memory_space<vmem>>, vector<1x2x32xf32>
    %213 = vector.shape_cast %212 : vector<1x2x32xf32> to vector<2x32xf32>
    %214 = vector.shape_cast %211 : vector<2x32xf32> to vector<1x2x32xf32>
    tpu.vector_store %arg4[%c4, %c0_75, %c0_76], %214 {strides = array<i32>} : memref<16x2x64xf32, #tpu.memory_space<vmem>>, vector<1x2x32xf32>,
    %215 = vector.extract_strided_slice %210 {offsets = [0, 32], sizes = [2, 32], strides = [1, 1]} : vector<2x64xf32> to vector<2x32xf32>
    %c11 = arith.constant 11 : index
    %c0_77 = arith.constant 0 : index
    %c32_78 = arith.constant 32 : index
    %216 = vector.load %arg4[%c11, %c0_77, %c32_78] : memref<16x2x64xf32, #tpu.memory_space<vmem>>, vector<1x2x32xf32>
    %217 = vector.shape_cast %216 : vector<1x2x32xf32> to vector<2x32xf32>
    %218 = vector.shape_cast %215 : vector<2x32xf32> to vector<1x2x32xf32>
    tpu.vector_store %arg4[%c11, %c0_77, %c32_78], %218 {strides = array<i32>} : memref<16x2x64xf32, #tpu.memory_space<vmem>>, vector<1x2x32xf32>,
    %cst_79 = arith.constant dense<0.000000e+00> : vector<2x256xf32>
    %219 = tpu.matmul %210, %6, %cst_79 {dimension_numbers = #tpu.dot_dimension_numbers<[1], [0], [0], [1], [0, 0, 1, 1], [], []>} : vector<2x64xf32>, vector<64x256xf32>, vector<2x256xf32> -> vector<2x256xf32>
    %220 = vector.extract_strided_slice %5 {offsets = [10, 0], sizes = [2, 256], strides = [1, 1]} : vector<32x256xf32> to vector<2x256xf32>
    %221 = arith.addf %219, %220 : vector<2x256xf32>
    %222 = vector.extract_strided_slice %221 {offsets = [0, 0], sizes = [2, 64], strides = [1, 1]} : vector<2x256xf32> to vector<2x64xf32>
    %cst_80 = arith.constant 0.000000e+00 : f32
    %223 = vector.broadcast %cst_80 : f32 to vector<2x64xf32>
    %224 = arith.subf %223, %222 : vector<2x64xf32>
    %225 = math.exp %224 : vector<2x64xf32>
    %cst_81 = arith.constant 1.000000e+00 : f32
    %226 = vector.broadcast %cst_81 : f32 to vector<2x64xf32>
    %227 = arith.addf %226, %225 : vector<2x64xf32>
    %cst_82 = arith.constant 1.000000e+00 : f32
    %228 = vector.broadcast %cst_82 : f32 to vector<2x64xf32>
    %229 = arith.divf %228, %227 : vector<2x64xf32>
    %230 = vector.extract_strided_slice %221 {offsets = [0, 64], sizes = [2, 64], strides = [1, 1]} : vector<2x256xf32> to vector<2x64xf32>
    %cst_83 = arith.constant 0.000000e+00 : f32
    %231 = vector.broadcast %cst_83 : f32 to vector<2x64xf32>
    %232 = arith.subf %231, %230 : vector<2x64xf32>
    %233 = math.exp %232 : vector<2x64xf32>
    %cst_84 = arith.constant 1.000000e+00 : f32
    %234 = vector.broadcast %cst_84 : f32 to vector<2x64xf32>
    %235 = arith.addf %234, %233 : vector<2x64xf32>
    %cst_85 = arith.constant 1.000000e+00 : f32
    %236 = vector.broadcast %cst_85 : f32 to vector<2x64xf32>
    %237 = arith.divf %236, %235 : vector<2x64xf32>
    %238 = vector.extract_strided_slice %221 {offsets = [0, 128], sizes = [2, 64], strides = [1, 1]} : vector<2x256xf32> to vector<2x64xf32>
    %239 = math.tanh %238 : vector<2x64xf32>
    %240 = vector.extract_strided_slice %221 {offsets = [0, 192], sizes = [2, 64], strides = [1, 1]} : vector<2x256xf32> to vector<2x64xf32>
    %cst_86 = arith.constant 0.000000e+00 : f32
    %241 = vector.broadcast %cst_86 : f32 to vector<2x64xf32>
    %242 = arith.subf %241, %240 : vector<2x64xf32>
    %243 = math.exp %242 : vector<2x64xf32>
    %cst_87 = arith.constant 1.000000e+00 : f32
    %244 = vector.broadcast %cst_87 : f32 to vector<2x64xf32>
    %245 = arith.addf %244, %243 : vector<2x64xf32>
    %cst_88 = arith.constant 1.000000e+00 : f32
    %246 = vector.broadcast %cst_88 : f32 to vector<2x64xf32>
    %247 = arith.divf %246, %245 : vector<2x64xf32>
    %248 = arith.mulf %237, %208 : vector<2x64xf32>
    %249 = arith.mulf %229, %239 : vector<2x64xf32>
    %250 = arith.addf %248, %249 : vector<2x64xf32>
    %251 = math.tanh %250 : vector<2x64xf32>
    %252 = arith.mulf %247, %251 : vector<2x64xf32>
    %253 = vector.extract_strided_slice %252 {offsets = [0, 0], sizes = [2, 32], strides = [1, 1]} : vector<2x64xf32> to vector<2x32xf32>
    %c5 = arith.constant 5 : index
    %c0_89 = arith.constant 0 : index
    %c0_90 = arith.constant 0 : index
    %254 = vector.load %arg4[%c5, %c0_89, %c0_90] : memref<16x2x64xf32, #tpu.memory_space<vmem>>, vector<1x2x32xf32>
    %255 = vector.shape_cast %254 : vector<1x2x32xf32> to vector<2x32xf32>
    %256 = vector.shape_cast %253 : vector<2x32xf32> to vector<1x2x32xf32>
    tpu.vector_store %arg4[%c5, %c0_89, %c0_90], %256 {strides = array<i32>} : memref<16x2x64xf32, #tpu.memory_space<vmem>>, vector<1x2x32xf32>,
    %257 = vector.extract_strided_slice %252 {offsets = [0, 32], sizes = [2, 32], strides = [1, 1]} : vector<2x64xf32> to vector<2x32xf32>
    %c10 = arith.constant 10 : index
    %c0_91 = arith.constant 0 : index
    %c32_92 = arith.constant 32 : index
    %258 = vector.load %arg4[%c10, %c0_91, %c32_92] : memref<16x2x64xf32, #tpu.memory_space<vmem>>, vector<1x2x32xf32>
    %259 = vector.shape_cast %258 : vector<1x2x32xf32> to vector<2x32xf32>
    %260 = vector.shape_cast %257 : vector<2x32xf32> to vector<1x2x32xf32>
    tpu.vector_store %arg4[%c10, %c0_91, %c32_92], %260 {strides = array<i32>} : memref<16x2x64xf32, #tpu.memory_space<vmem>>, vector<1x2x32xf32>,
    %cst_93 = arith.constant dense<0.000000e+00> : vector<2x256xf32>
    %261 = tpu.matmul %252, %6, %cst_93 {dimension_numbers = #tpu.dot_dimension_numbers<[1], [0], [0], [1], [0, 0, 1, 1], [], []>} : vector<2x64xf32>, vector<64x256xf32>, vector<2x256xf32> -> vector<2x256xf32>
    %262 = vector.extract_strided_slice %5 {offsets = [12, 0], sizes = [2, 256], strides = [1, 1]} : vector<32x256xf32> to vector<2x256xf32>
    %263 = arith.addf %261, %262 : vector<2x256xf32>
    %264 = vector.extract_strided_slice %263 {offsets = [0, 0], sizes = [2, 64], strides = [1, 1]} : vector<2x256xf32> to vector<2x64xf32>
    %cst_94 = arith.constant 0.000000e+00 : f32
    %265 = vector.broadcast %cst_94 : f32 to vector<2x64xf32>
    %266 = arith.subf %265, %264 : vector<2x64xf32>
    %267 = math.exp %266 : vector<2x64xf32>
    %cst_95 = arith.constant 1.000000e+00 : f32
    %268 = vector.broadcast %cst_95 : f32 to vector<2x64xf32>
    %269 = arith.addf %268, %267 : vector<2x64xf32>
    %cst_96 = arith.constant 1.000000e+00 : f32
    %270 = vector.broadcast %cst_96 : f32 to vector<2x64xf32>
    %271 = arith.divf %270, %269 : vector<2x64xf32>
    %272 = vector.extract_strided_slice %263 {offsets = [0, 64], sizes = [2, 64], strides = [1, 1]} : vector<2x256xf32> to vector<2x64xf32>
    %cst_97 = arith.constant 0.000000e+00 : f32
    %273 = vector.broadcast %cst_97 : f32 to vector<2x64xf32>
    %274 = arith.subf %273, %272 : vector<2x64xf32>
    %275 = math.exp %274 : vector<2x64xf32>
    %cst_98 = arith.constant 1.000000e+00 : f32
    %276 = vector.broadcast %cst_98 : f32 to vector<2x64xf32>
    %277 = arith.addf %276, %275 : vector<2x64xf32>
    %cst_99 = arith.constant 1.000000e+00 : f32
    %278 = vector.broadcast %cst_99 : f32 to vector<2x64xf32>
    %279 = arith.divf %278, %277 : vector<2x64xf32>
    %280 = vector.extract_strided_slice %263 {offsets = [0, 128], sizes = [2, 64], strides = [1, 1]} : vector<2x256xf32> to vector<2x64xf32>
    %281 = math.tanh %280 : vector<2x64xf32>
    %282 = vector.extract_strided_slice %263 {offsets = [0, 192], sizes = [2, 64], strides = [1, 1]} : vector<2x256xf32> to vector<2x64xf32>
    %cst_100 = arith.constant 0.000000e+00 : f32
    %283 = vector.broadcast %cst_100 : f32 to vector<2x64xf32>
    %284 = arith.subf %283, %282 : vector<2x64xf32>
    %285 = math.exp %284 : vector<2x64xf32>
    %cst_101 = arith.constant 1.000000e+00 : f32
    %286 = vector.broadcast %cst_101 : f32 to vector<2x64xf32>
    %287 = arith.addf %286, %285 : vector<2x64xf32>
    %cst_102 = arith.constant 1.000000e+00 : f32
    %288 = vector.broadcast %cst_102 : f32 to vector<2x64xf32>
    %289 = arith.divf %288, %287 : vector<2x64xf32>
    %290 = arith.mulf %279, %250 : vector<2x64xf32>
    %291 = arith.mulf %271, %281 : vector<2x64xf32>
    %292 = arith.addf %290, %291 : vector<2x64xf32>
    %293 = math.tanh %292 : vector<2x64xf32>
    %294 = arith.mulf %289, %293 : vector<2x64xf32>
    %295 = vector.extract_strided_slice %294 {offsets = [0, 0], sizes = [2, 32], strides = [1, 1]} : vector<2x64xf32> to vector<2x32xf32>
    %c6 = arith.constant 6 : index
    %c0_103 = arith.constant 0 : index
    %c0_104 = arith.constant 0 : index
    %296 = vector.load %arg4[%c6, %c0_103, %c0_104] : memref<16x2x64xf32, #tpu.memory_space<vmem>>, vector<1x2x32xf32>
    %297 = vector.shape_cast %296 : vector<1x2x32xf32> to vector<2x32xf32>
    %298 = vector.shape_cast %295 : vector<2x32xf32> to vector<1x2x32xf32>
    tpu.vector_store %arg4[%c6, %c0_103, %c0_104], %298 {strides = array<i32>} : memref<16x2x64xf32, #tpu.memory_space<vmem>>, vector<1x2x32xf32>,
    %299 = vector.extract_strided_slice %294 {offsets = [0, 32], sizes = [2, 32], strides = [1, 1]} : vector<2x64xf32> to vector<2x32xf32>
    %c9 = arith.constant 9 : index
    %c0_105 = arith.constant 0 : index
    %c32_106 = arith.constant 32 : index
    %300 = vector.load %arg4[%c9, %c0_105, %c32_106] : memref<16x2x64xf32, #tpu.memory_space<vmem>>, vector<1x2x32xf32>
    %301 = vector.shape_cast %300 : vector<1x2x32xf32> to vector<2x32xf32>
    %302 = vector.shape_cast %299 : vector<2x32xf32> to vector<1x2x32xf32>
    tpu.vector_store %arg4[%c9, %c0_105, %c32_106], %302 {strides = array<i32>} : memref<16x2x64xf32, #tpu.memory_space<vmem>>, vector<1x2x32xf32>,
    %cst_107 = arith.constant dense<0.000000e+00> : vector<2x256xf32>
    %303 = tpu.matmul %294, %6, %cst_107 {dimension_numbers = #tpu.dot_dimension_numbers<[1], [0], [0], [1], [0, 0, 1, 1], [], []>} : vector<2x64xf32>, vector<64x256xf32>, vector<2x256xf32> -> vector<2x256xf32>
    %304 = vector.extract_strided_slice %5 {offsets = [14, 0], sizes = [2, 256], strides = [1, 1]} : vector<32x256xf32> to vector<2x256xf32>
    %305 = arith.addf %303, %304 : vector<2x256xf32>
    %306 = vector.extract_strided_slice %305 {offsets = [0, 0], sizes = [2, 64], strides = [1, 1]} : vector<2x256xf32> to vector<2x64xf32>
    %cst_108 = arith.constant 0.000000e+00 : f32
    %307 = vector.broadcast %cst_108 : f32 to vector<2x64xf32>
    %308 = arith.subf %307, %306 : vector<2x64xf32>
    %309 = math.exp %308 : vector<2x64xf32>
    %cst_109 = arith.constant 1.000000e+00 : f32
    %310 = vector.broadcast %cst_109 : f32 to vector<2x64xf32>
    %311 = arith.addf %310, %309 : vector<2x64xf32>
    %cst_110 = arith.constant 1.000000e+00 : f32
    %312 = vector.broadcast %cst_110 : f32 to vector<2x64xf32>
    %313 = arith.divf %312, %311 : vector<2x64xf32>
    %314 = vector.extract_strided_slice %305 {offsets = [0, 64], sizes = [2, 64], strides = [1, 1]} : vector<2x256xf32> to vector<2x64xf32>
    %cst_111 = arith.constant 0.000000e+00 : f32
    %315 = vector.broadcast %cst_111 : f32 to vector<2x64xf32>
    %316 = arith.subf %315, %314 : vector<2x64xf32>
    %317 = math.exp %316 : vector<2x64xf32>
    %cst_112 = arith.constant 1.000000e+00 : f32
    %318 = vector.broadcast %cst_112 : f32 to vector<2x64xf32>
    %319 = arith.addf %318, %317 : vector<2x64xf32>
    %cst_113 = arith.constant 1.000000e+00 : f32
    %320 = vector.broadcast %cst_113 : f32 to vector<2x64xf32>
    %321 = arith.divf %320, %319 : vector<2x64xf32>
    %322 = vector.extract_strided_slice %305 {offsets = [0, 128], sizes = [2, 64], strides = [1, 1]} : vector<2x256xf32> to vector<2x64xf32>
    %323 = math.tanh %322 : vector<2x64xf32>
    %324 = vector.extract_strided_slice %305 {offsets = [0, 192], sizes = [2, 64], strides = [1, 1]} : vector<2x256xf32> to vector<2x64xf32>
    %cst_114 = arith.constant 0.000000e+00 : f32
    %325 = vector.broadcast %cst_114 : f32 to vector<2x64xf32>
    %326 = arith.subf %325, %324 : vector<2x64xf32>
    %327 = math.exp %326 : vector<2x64xf32>
    %cst_115 = arith.constant 1.000000e+00 : f32
    %328 = vector.broadcast %cst_115 : f32 to vector<2x64xf32>
    %329 = arith.addf %328, %327 : vector<2x64xf32>
    %cst_116 = arith.constant 1.000000e+00 : f32
    %330 = vector.broadcast %cst_116 : f32 to vector<2x64xf32>
    %331 = arith.divf %330, %329 : vector<2x64xf32>
    %332 = arith.mulf %321, %292 : vector<2x64xf32>
    %333 = arith.mulf %313, %323 : vector<2x64xf32>
    %334 = arith.addf %332, %333 : vector<2x64xf32>
    %335 = math.tanh %334 : vector<2x64xf32>
    %336 = arith.mulf %331, %335 : vector<2x64xf32>
    %337 = vector.extract_strided_slice %336 {offsets = [0, 0], sizes = [2, 32], strides = [1, 1]} : vector<2x64xf32> to vector<2x32xf32>
    %c7 = arith.constant 7 : index
    %c0_117 = arith.constant 0 : index
    %c0_118 = arith.constant 0 : index
    %338 = vector.load %arg4[%c7, %c0_117, %c0_118] : memref<16x2x64xf32, #tpu.memory_space<vmem>>, vector<1x2x32xf32>
    %339 = vector.shape_cast %338 : vector<1x2x32xf32> to vector<2x32xf32>
    %340 = vector.shape_cast %337 : vector<2x32xf32> to vector<1x2x32xf32>
    tpu.vector_store %arg4[%c7, %c0_117, %c0_118], %340 {strides = array<i32>} : memref<16x2x64xf32, #tpu.memory_space<vmem>>, vector<1x2x32xf32>,
    %341 = vector.extract_strided_slice %336 {offsets = [0, 32], sizes = [2, 32], strides = [1, 1]} : vector<2x64xf32> to vector<2x32xf32>
    %c8 = arith.constant 8 : index
    %c0_119 = arith.constant 0 : index
    %c32_120 = arith.constant 32 : index
    %342 = vector.load %arg4[%c8, %c0_119, %c32_120] : memref<16x2x64xf32, #tpu.memory_space<vmem>>, vector<1x2x32xf32>
    %343 = vector.shape_cast %342 : vector<1x2x32xf32> to vector<2x32xf32>
    %344 = vector.shape_cast %341 : vector<2x32xf32> to vector<1x2x32xf32>
    tpu.vector_store %arg4[%c8, %c0_119, %c32_120], %344 {strides = array<i32>} : memref<16x2x64xf32, #tpu.memory_space<vmem>>, vector<1x2x32xf32>,
    %cst_121 = arith.constant dense<0.000000e+00> : vector<2x256xf32>
    %345 = tpu.matmul %336, %6, %cst_121 {dimension_numbers = #tpu.dot_dimension_numbers<[1], [0], [0], [1], [0, 0, 1, 1], [], []>} : vector<2x64xf32>, vector<64x256xf32>, vector<2x256xf32> -> vector<2x256xf32>
    %346 = vector.extract_strided_slice %5 {offsets = [16, 0], sizes = [2, 256], strides = [1, 1]} : vector<32x256xf32> to vector<2x256xf32>
    %347 = arith.addf %345, %346 : vector<2x256xf32>
    %348 = vector.extract_strided_slice %347 {offsets = [0, 0], sizes = [2, 64], strides = [1, 1]} : vector<2x256xf32> to vector<2x64xf32>
    %cst_122 = arith.constant 0.000000e+00 : f32
    %349 = vector.broadcast %cst_122 : f32 to vector<2x64xf32>
    %350 = arith.subf %349, %348 : vector<2x64xf32>
    %351 = math.exp %350 : vector<2x64xf32>
    %cst_123 = arith.constant 1.000000e+00 : f32
    %352 = vector.broadcast %cst_123 : f32 to vector<2x64xf32>
    %353 = arith.addf %352, %351 : vector<2x64xf32>
    %cst_124 = arith.constant 1.000000e+00 : f32
    %354 = vector.broadcast %cst_124 : f32 to vector<2x64xf32>
    %355 = arith.divf %354, %353 : vector<2x64xf32>
    %356 = vector.extract_strided_slice %347 {offsets = [0, 64], sizes = [2, 64], strides = [1, 1]} : vector<2x256xf32> to vector<2x64xf32>
    %cst_125 = arith.constant 0.000000e+00 : f32
    %357 = vector.broadcast %cst_125 : f32 to vector<2x64xf32>
    %358 = arith.subf %357, %356 : vector<2x64xf32>
    %359 = math.exp %358 : vector<2x64xf32>
    %cst_126 = arith.constant 1.000000e+00 : f32
    %360 = vector.broadcast %cst_126 : f32 to vector<2x64xf32>
    %361 = arith.addf %360, %359 : vector<2x64xf32>
    %cst_127 = arith.constant 1.000000e+00 : f32
    %362 = vector.broadcast %cst_127 : f32 to vector<2x64xf32>
    %363 = arith.divf %362, %361 : vector<2x64xf32>
    %364 = vector.extract_strided_slice %347 {offsets = [0, 128], sizes = [2, 64], strides = [1, 1]} : vector<2x256xf32> to vector<2x64xf32>
    %365 = math.tanh %364 : vector<2x64xf32>
    %366 = vector.extract_strided_slice %347 {offsets = [0, 192], sizes = [2, 64], strides = [1, 1]} : vector<2x256xf32> to vector<2x64xf32>
    %cst_128 = arith.constant 0.000000e+00 : f32
    %367 = vector.broadcast %cst_128 : f32 to vector<2x64xf32>
    %368 = arith.subf %367, %366 : vector<2x64xf32>
    %369 = math.exp %368 : vector<2x64xf32>
    %cst_129 = arith.constant 1.000000e+00 : f32
    %370 = vector.broadcast %cst_129 : f32 to vector<2x64xf32>
    %371 = arith.addf %370, %369 : vector<2x64xf32>
    %cst_130 = arith.constant 1.000000e+00 : f32
    %372 = vector.broadcast %cst_130 : f32 to vector<2x64xf32>
    %373 = arith.divf %372, %371 : vector<2x64xf32>
    %374 = arith.mulf %363, %334 : vector<2x64xf32>
    %375 = arith.mulf %355, %365 : vector<2x64xf32>
    %376 = arith.addf %374, %375 : vector<2x64xf32>
    %377 = math.tanh %376 : vector<2x64xf32>
    %378 = arith.mulf %373, %377 : vector<2x64xf32>
    %379 = vector.extract_strided_slice %378 {offsets = [0, 0], sizes = [2, 32], strides = [1, 1]} : vector<2x64xf32> to vector<2x32xf32>
    %c8_131 = arith.constant 8 : index
    %c0_132 = arith.constant 0 : index
    %c0_133 = arith.constant 0 : index
    %380 = vector.load %arg4[%c8_131, %c0_132, %c0_133] : memref<16x2x64xf32, #tpu.memory_space<vmem>>, vector<1x2x32xf32>
    %381 = vector.shape_cast %380 : vector<1x2x32xf32> to vector<2x32xf32>
    %382 = vector.shape_cast %379 : vector<2x32xf32> to vector<1x2x32xf32>
    tpu.vector_store %arg4[%c8_131, %c0_132, %c0_133], %382 {strides = array<i32>} : memref<16x2x64xf32, #tpu.memory_space<vmem>>, vector<1x2x32xf32>,
    %383 = vector.extract_strided_slice %378 {offsets = [0, 32], sizes = [2, 32], strides = [1, 1]} : vector<2x64xf32> to vector<2x32xf32>
    %c7_134 = arith.constant 7 : index
    %c0_135 = arith.constant 0 : index
    %c32_136 = arith.constant 32 : index
    %384 = vector.load %arg4[%c7_134, %c0_135, %c32_136] : memref<16x2x64xf32, #tpu.memory_space<vmem>>, vector<1x2x32xf32>
    %385 = vector.shape_cast %384 : vector<1x2x32xf32> to vector<2x32xf32>
    %386 = vector.shape_cast %383 : vector<2x32xf32> to vector<1x2x32xf32>
    tpu.vector_store %arg4[%c7_134, %c0_135, %c32_136], %386 {strides = array<i32>} : memref<16x2x64xf32, #tpu.memory_space<vmem>>, vector<1x2x32xf32>,
    %cst_137 = arith.constant dense<0.000000e+00> : vector<2x256xf32>
    %387 = tpu.matmul %378, %6, %cst_137 {dimension_numbers = #tpu.dot_dimension_numbers<[1], [0], [0], [1], [0, 0, 1, 1], [], []>} : vector<2x64xf32>, vector<64x256xf32>, vector<2x256xf32> -> vector<2x256xf32>
    %388 = vector.extract_strided_slice %5 {offsets = [18, 0], sizes = [2, 256], strides = [1, 1]} : vector<32x256xf32> to vector<2x256xf32>
    %389 = arith.addf %387, %388 : vector<2x256xf32>
    %390 = vector.extract_strided_slice %389 {offsets = [0, 0], sizes = [2, 64], strides = [1, 1]} : vector<2x256xf32> to vector<2x64xf32>
    %cst_138 = arith.constant 0.000000e+00 : f32
    %391 = vector.broadcast %cst_138 : f32 to vector<2x64xf32>
    %392 = arith.subf %391, %390 : vector<2x64xf32>
    %393 = math.exp %392 : vector<2x64xf32>
    %cst_139 = arith.constant 1.000000e+00 : f32
    %394 = vector.broadcast %cst_139 : f32 to vector<2x64xf32>
    %395 = arith.addf %394, %393 : vector<2x64xf32>
    %cst_140 = arith.constant 1.000000e+00 : f32
    %396 = vector.broadcast %cst_140 : f32 to vector<2x64xf32>
    %397 = arith.divf %396, %395 : vector<2x64xf32>
    %398 = vector.extract_strided_slice %389 {offsets = [0, 64], sizes = [2, 64], strides = [1, 1]} : vector<2x256xf32> to vector<2x64xf32>
    %cst_141 = arith.constant 0.000000e+00 : f32
    %399 = vector.broadcast %cst_141 : f32 to vector<2x64xf32>
    %400 = arith.subf %399, %398 : vector<2x64xf32>
    %401 = math.exp %400 : vector<2x64xf32>
    %cst_142 = arith.constant 1.000000e+00 : f32
    %402 = vector.broadcast %cst_142 : f32 to vector<2x64xf32>
    %403 = arith.addf %402, %401 : vector<2x64xf32>
    %cst_143 = arith.constant 1.000000e+00 : f32
    %404 = vector.broadcast %cst_143 : f32 to vector<2x64xf32>
    %405 = arith.divf %404, %403 : vector<2x64xf32>
    %406 = vector.extract_strided_slice %389 {offsets = [0, 128], sizes = [2, 64], strides = [1, 1]} : vector<2x256xf32> to vector<2x64xf32>
    %407 = math.tanh %406 : vector<2x64xf32>
    %408 = vector.extract_strided_slice %389 {offsets = [0, 192], sizes = [2, 64], strides = [1, 1]} : vector<2x256xf32> to vector<2x64xf32>
    %cst_144 = arith.constant 0.000000e+00 : f32
    %409 = vector.broadcast %cst_144 : f32 to vector<2x64xf32>
    %410 = arith.subf %409, %408 : vector<2x64xf32>
    %411 = math.exp %410 : vector<2x64xf32>
    %cst_145 = arith.constant 1.000000e+00 : f32
    %412 = vector.broadcast %cst_145 : f32 to vector<2x64xf32>
    %413 = arith.addf %412, %411 : vector<2x64xf32>
    %cst_146 = arith.constant 1.000000e+00 : f32
    %414 = vector.broadcast %cst_146 : f32 to vector<2x64xf32>
    %415 = arith.divf %414, %413 : vector<2x64xf32>
    %416 = arith.mulf %405, %376 : vector<2x64xf32>
    %417 = arith.mulf %397, %407 : vector<2x64xf32>
    %418 = arith.addf %416, %417 : vector<2x64xf32>
    %419 = math.tanh %418 : vector<2x64xf32>
    %420 = arith.mulf %415, %419 : vector<2x64xf32>
    %421 = vector.extract_strided_slice %420 {offsets = [0, 0], sizes = [2, 32], strides = [1, 1]} : vector<2x64xf32> to vector<2x32xf32>
    %c9_147 = arith.constant 9 : index
    %c0_148 = arith.constant 0 : index
    %c0_149 = arith.constant 0 : index
    %422 = vector.load %arg4[%c9_147, %c0_148, %c0_149] : memref<16x2x64xf32, #tpu.memory_space<vmem>>, vector<1x2x32xf32>
    %423 = vector.shape_cast %422 : vector<1x2x32xf32> to vector<2x32xf32>
    %424 = vector.shape_cast %421 : vector<2x32xf32> to vector<1x2x32xf32>
    tpu.vector_store %arg4[%c9_147, %c0_148, %c0_149], %424 {strides = array<i32>} : memref<16x2x64xf32, #tpu.memory_space<vmem>>, vector<1x2x32xf32>,
    %425 = vector.extract_strided_slice %420 {offsets = [0, 32], sizes = [2, 32], strides = [1, 1]} : vector<2x64xf32> to vector<2x32xf32>
    %c6_150 = arith.constant 6 : index
    %c0_151 = arith.constant 0 : index
    %c32_152 = arith.constant 32 : index
    %426 = vector.load %arg4[%c6_150, %c0_151, %c32_152] : memref<16x2x64xf32, #tpu.memory_space<vmem>>, vector<1x2x32xf32>
    %427 = vector.shape_cast %426 : vector<1x2x32xf32> to vector<2x32xf32>
    %428 = vector.shape_cast %425 : vector<2x32xf32> to vector<1x2x32xf32>
    tpu.vector_store %arg4[%c6_150, %c0_151, %c32_152], %428 {strides = array<i32>} : memref<16x2x64xf32, #tpu.memory_space<vmem>>, vector<1x2x32xf32>,
    %cst_153 = arith.constant dense<0.000000e+00> : vector<2x256xf32>
    %429 = tpu.matmul %420, %6, %cst_153 {dimension_numbers = #tpu.dot_dimension_numbers<[1], [0], [0], [1], [0, 0, 1, 1], [], []>} : vector<2x64xf32>, vector<64x256xf32>, vector<2x256xf32> -> vector<2x256xf32>
    %430 = vector.extract_strided_slice %5 {offsets = [20, 0], sizes = [2, 256], strides = [1, 1]} : vector<32x256xf32> to vector<2x256xf32>
    %431 = arith.addf %429, %430 : vector<2x256xf32>
    %432 = vector.extract_strided_slice %431 {offsets = [0, 0], sizes = [2, 64], strides = [1, 1]} : vector<2x256xf32> to vector<2x64xf32>
    %cst_154 = arith.constant 0.000000e+00 : f32
    %433 = vector.broadcast %cst_154 : f32 to vector<2x64xf32>
    %434 = arith.subf %433, %432 : vector<2x64xf32>
    %435 = math.exp %434 : vector<2x64xf32>
    %cst_155 = arith.constant 1.000000e+00 : f32
    %436 = vector.broadcast %cst_155 : f32 to vector<2x64xf32>
    %437 = arith.addf %436, %435 : vector<2x64xf32>
    %cst_156 = arith.constant 1.000000e+00 : f32
    %438 = vector.broadcast %cst_156 : f32 to vector<2x64xf32>
    %439 = arith.divf %438, %437 : vector<2x64xf32>
    %440 = vector.extract_strided_slice %431 {offsets = [0, 64], sizes = [2, 64], strides = [1, 1]} : vector<2x256xf32> to vector<2x64xf32>
    %cst_157 = arith.constant 0.000000e+00 : f32
    %441 = vector.broadcast %cst_157 : f32 to vector<2x64xf32>
    %442 = arith.subf %441, %440 : vector<2x64xf32>
    %443 = math.exp %442 : vector<2x64xf32>
    %cst_158 = arith.constant 1.000000e+00 : f32
    %444 = vector.broadcast %cst_158 : f32 to vector<2x64xf32>
    %445 = arith.addf %444, %443 : vector<2x64xf32>
    %cst_159 = arith.constant 1.000000e+00 : f32
    %446 = vector.broadcast %cst_159 : f32 to vector<2x64xf32>
    %447 = arith.divf %446, %445 : vector<2x64xf32>
    %448 = vector.extract_strided_slice %431 {offsets = [0, 128], sizes = [2, 64], strides = [1, 1]} : vector<2x256xf32> to vector<2x64xf32>
    %449 = math.tanh %448 : vector<2x64xf32>
    %450 = vector.extract_strided_slice %431 {offsets = [0, 192], sizes = [2, 64], strides = [1, 1]} : vector<2x256xf32> to vector<2x64xf32>
    %cst_160 = arith.constant 0.000000e+00 : f32
    %451 = vector.broadcast %cst_160 : f32 to vector<2x64xf32>
    %452 = arith.subf %451, %450 : vector<2x64xf32>
    %453 = math.exp %452 : vector<2x64xf32>
    %cst_161 = arith.constant 1.000000e+00 : f32
    %454 = vector.broadcast %cst_161 : f32 to vector<2x64xf32>
    %455 = arith.addf %454, %453 : vector<2x64xf32>
    %cst_162 = arith.constant 1.000000e+00 : f32
    %456 = vector.broadcast %cst_162 : f32 to vector<2x64xf32>
    %457 = arith.divf %456, %455 : vector<2x64xf32>
    %458 = arith.mulf %447, %418 : vector<2x64xf32>
    %459 = arith.mulf %439, %449 : vector<2x64xf32>
    %460 = arith.addf %458, %459 : vector<2x64xf32>
    %461 = math.tanh %460 : vector<2x64xf32>
    %462 = arith.mulf %457, %461 : vector<2x64xf32>
    %463 = vector.extract_strided_slice %462 {offsets = [0, 0], sizes = [2, 32], strides = [1, 1]} : vector<2x64xf32> to vector<2x32xf32>
    %c10_163 = arith.constant 10 : index
    %c0_164 = arith.constant 0 : index
    %c0_165 = arith.constant 0 : index
    %464 = vector.load %arg4[%c10_163, %c0_164, %c0_165] : memref<16x2x64xf32, #tpu.memory_space<vmem>>, vector<1x2x32xf32>
    %465 = vector.shape_cast %464 : vector<1x2x32xf32> to vector<2x32xf32>
    %466 = vector.shape_cast %463 : vector<2x32xf32> to vector<1x2x32xf32>
    tpu.vector_store %arg4[%c10_163, %c0_164, %c0_165], %466 {strides = array<i32>} : memref<16x2x64xf32, #tpu.memory_space<vmem>>, vector<1x2x32xf32>,
    %467 = vector.extract_strided_slice %462 {offsets = [0, 32], sizes = [2, 32], strides = [1, 1]} : vector<2x64xf32> to vector<2x32xf32>
    %c5_166 = arith.constant 5 : index
    %c0_167 = arith.constant 0 : index
    %c32_168 = arith.constant 32 : index
    %468 = vector.load %arg4[%c5_166, %c0_167, %c32_168] : memref<16x2x64xf32, #tpu.memory_space<vmem>>, vector<1x2x32xf32>
    %469 = vector.shape_cast %468 : vector<1x2x32xf32> to vector<2x32xf32>
    %470 = vector.shape_cast %467 : vector<2x32xf32> to vector<1x2x32xf32>
    tpu.vector_store %arg4[%c5_166, %c0_167, %c32_168], %470 {strides = array<i32>} : memref<16x2x64xf32, #tpu.memory_space<vmem>>, vector<1x2x32xf32>,
    %cst_169 = arith.constant dense<0.000000e+00> : vector<2x256xf32>
    %471 = tpu.matmul %462, %6, %cst_169 {dimension_numbers = #tpu.dot_dimension_numbers<[1], [0], [0], [1], [0, 0, 1, 1], [], []>} : vector<2x64xf32>, vector<64x256xf32>, vector<2x256xf32> -> vector<2x256xf32>
    %472 = vector.extract_strided_slice %5 {offsets = [22, 0], sizes = [2, 256], strides = [1, 1]} : vector<32x256xf32> to vector<2x256xf32>
    %473 = arith.addf %471, %472 : vector<2x256xf32>
    %474 = vector.extract_strided_slice %473 {offsets = [0, 0], sizes = [2, 64], strides = [1, 1]} : vector<2x256xf32> to vector<2x64xf32>
    %cst_170 = arith.constant 0.000000e+00 : f32
    %475 = vector.broadcast %cst_170 : f32 to vector<2x64xf32>
    %476 = arith.subf %475, %474 : vector<2x64xf32>
    %477 = math.exp %476 : vector<2x64xf32>
    %cst_171 = arith.constant 1.000000e+00 : f32
    %478 = vector.broadcast %cst_171 : f32 to vector<2x64xf32>
    %479 = arith.addf %478, %477 : vector<2x64xf32>
    %cst_172 = arith.constant 1.000000e+00 : f32
    %480 = vector.broadcast %cst_172 : f32 to vector<2x64xf32>
    %481 = arith.divf %480, %479 : vector<2x64xf32>
    %482 = vector.extract_strided_slice %473 {offsets = [0, 64], sizes = [2, 64], strides = [1, 1]} : vector<2x256xf32> to vector<2x64xf32>
    %cst_173 = arith.constant 0.000000e+00 : f32
    %483 = vector.broadcast %cst_173 : f32 to vector<2x64xf32>
    %484 = arith.subf %483, %482 : vector<2x64xf32>
    %485 = math.exp %484 : vector<2x64xf32>
    %cst_174 = arith.constant 1.000000e+00 : f32
    %486 = vector.broadcast %cst_174 : f32 to vector<2x64xf32>
    %487 = arith.addf %486, %485 : vector<2x64xf32>
    %cst_175 = arith.constant 1.000000e+00 : f32
    %488 = vector.broadcast %cst_175 : f32 to vector<2x64xf32>
    %489 = arith.divf %488, %487 : vector<2x64xf32>
    %490 = vector.extract_strided_slice %473 {offsets = [0, 128], sizes = [2, 64], strides = [1, 1]} : vector<2x256xf32> to vector<2x64xf32>
    %491 = math.tanh %490 : vector<2x64xf32>
    %492 = vector.extract_strided_slice %473 {offsets = [0, 192], sizes = [2, 64], strides = [1, 1]} : vector<2x256xf32> to vector<2x64xf32>
    %cst_176 = arith.constant 0.000000e+00 : f32
    %493 = vector.broadcast %cst_176 : f32 to vector<2x64xf32>
    %494 = arith.subf %493, %492 : vector<2x64xf32>
    %495 = math.exp %494 : vector<2x64xf32>
    %cst_177 = arith.constant 1.000000e+00 : f32
    %496 = vector.broadcast %cst_177 : f32 to vector<2x64xf32>
    %497 = arith.addf %496, %495 : vector<2x64xf32>
    %cst_178 = arith.constant 1.000000e+00 : f32
    %498 = vector.broadcast %cst_178 : f32 to vector<2x64xf32>
    %499 = arith.divf %498, %497 : vector<2x64xf32>
    %500 = arith.mulf %489, %460 : vector<2x64xf32>
    %501 = arith.mulf %481, %491 : vector<2x64xf32>
    %502 = arith.addf %500, %501 : vector<2x64xf32>
    %503 = math.tanh %502 : vector<2x64xf32>
    %504 = arith.mulf %499, %503 : vector<2x64xf32>
    %505 = vector.extract_strided_slice %504 {offsets = [0, 0], sizes = [2, 32], strides = [1, 1]} : vector<2x64xf32> to vector<2x32xf32>
    %c11_179 = arith.constant 11 : index
    %c0_180 = arith.constant 0 : index
    %c0_181 = arith.constant 0 : index
    %506 = vector.load %arg4[%c11_179, %c0_180, %c0_181] : memref<16x2x64xf32, #tpu.memory_space<vmem>>, vector<1x2x32xf32>
    %507 = vector.shape_cast %506 : vector<1x2x32xf32> to vector<2x32xf32>
    %508 = vector.shape_cast %505 : vector<2x32xf32> to vector<1x2x32xf32>
    tpu.vector_store %arg4[%c11_179, %c0_180, %c0_181], %508 {strides = array<i32>} : memref<16x2x64xf32, #tpu.memory_space<vmem>>, vector<1x2x32xf32>,
    %509 = vector.extract_strided_slice %504 {offsets = [0, 32], sizes = [2, 32], strides = [1, 1]} : vector<2x64xf32> to vector<2x32xf32>
    %c4_182 = arith.constant 4 : index
    %c0_183 = arith.constant 0 : index
    %c32_184 = arith.constant 32 : index
    %510 = vector.load %arg4[%c4_182, %c0_183, %c32_184] : memref<16x2x64xf32, #tpu.memory_space<vmem>>, vector<1x2x32xf32>
    %511 = vector.shape_cast %510 : vector<1x2x32xf32> to vector<2x32xf32>
    %512 = vector.shape_cast %509 : vector<2x32xf32> to vector<1x2x32xf32>
    tpu.vector_store %arg4[%c4_182, %c0_183, %c32_184], %512 {strides = array<i32>} : memref<16x2x64xf32, #tpu.memory_space<vmem>>, vector<1x2x32xf32>,
    %cst_185 = arith.constant dense<0.000000e+00> : vector<2x256xf32>
    %513 = tpu.matmul %504, %6, %cst_185 {dimension_numbers = #tpu.dot_dimension_numbers<[1], [0], [0], [1], [0, 0, 1, 1], [], []>} : vector<2x64xf32>, vector<64x256xf32>, vector<2x256xf32> -> vector<2x256xf32>
    %514 = vector.extract_strided_slice %5 {offsets = [24, 0], sizes = [2, 256], strides = [1, 1]} : vector<32x256xf32> to vector<2x256xf32>
    %515 = arith.addf %513, %514 : vector<2x256xf32>
    %516 = vector.extract_strided_slice %515 {offsets = [0, 0], sizes = [2, 64], strides = [1, 1]} : vector<2x256xf32> to vector<2x64xf32>
    %cst_186 = arith.constant 0.000000e+00 : f32
    %517 = vector.broadcast %cst_186 : f32 to vector<2x64xf32>
    %518 = arith.subf %517, %516 : vector<2x64xf32>
    %519 = math.exp %518 : vector<2x64xf32>
    %cst_187 = arith.constant 1.000000e+00 : f32
    %520 = vector.broadcast %cst_187 : f32 to vector<2x64xf32>
    %521 = arith.addf %520, %519 : vector<2x64xf32>
    %cst_188 = arith.constant 1.000000e+00 : f32
    %522 = vector.broadcast %cst_188 : f32 to vector<2x64xf32>
    %523 = arith.divf %522, %521 : vector<2x64xf32>
    %524 = vector.extract_strided_slice %515 {offsets = [0, 64], sizes = [2, 64], strides = [1, 1]} : vector<2x256xf32> to vector<2x64xf32>
    %cst_189 = arith.constant 0.000000e+00 : f32
    %525 = vector.broadcast %cst_189 : f32 to vector<2x64xf32>
    %526 = arith.subf %525, %524 : vector<2x64xf32>
    %527 = math.exp %526 : vector<2x64xf32>
    %cst_190 = arith.constant 1.000000e+00 : f32
    %528 = vector.broadcast %cst_190 : f32 to vector<2x64xf32>
    %529 = arith.addf %528, %527 : vector<2x64xf32>
    %cst_191 = arith.constant 1.000000e+00 : f32
    %530 = vector.broadcast %cst_191 : f32 to vector<2x64xf32>
    %531 = arith.divf %530, %529 : vector<2x64xf32>
    %532 = vector.extract_strided_slice %515 {offsets = [0, 128], sizes = [2, 64], strides = [1, 1]} : vector<2x256xf32> to vector<2x64xf32>
    %533 = math.tanh %532 : vector<2x64xf32>
    %534 = vector.extract_strided_slice %515 {offsets = [0, 192], sizes = [2, 64], strides = [1, 1]} : vector<2x256xf32> to vector<2x64xf32>
    %cst_192 = arith.constant 0.000000e+00 : f32
    %535 = vector.broadcast %cst_192 : f32 to vector<2x64xf32>
    %536 = arith.subf %535, %534 : vector<2x64xf32>
    %537 = math.exp %536 : vector<2x64xf32>
    %cst_193 = arith.constant 1.000000e+00 : f32
    %538 = vector.broadcast %cst_193 : f32 to vector<2x64xf32>
    %539 = arith.addf %538, %537 : vector<2x64xf32>
    %cst_194 = arith.constant 1.000000e+00 : f32
    %540 = vector.broadcast %cst_194 : f32 to vector<2x64xf32>
    %541 = arith.divf %540, %539 : vector<2x64xf32>
    %542 = arith.mulf %531, %502 : vector<2x64xf32>
    %543 = arith.mulf %523, %533 : vector<2x64xf32>
    %544 = arith.addf %542, %543 : vector<2x64xf32>
    %545 = math.tanh %544 : vector<2x64xf32>
    %546 = arith.mulf %541, %545 : vector<2x64xf32>
    %547 = vector.extract_strided_slice %546 {offsets = [0, 0], sizes = [2, 32], strides = [1, 1]} : vector<2x64xf32> to vector<2x32xf32>
    %c12_195 = arith.constant 12 : index
    %c0_196 = arith.constant 0 : index
    %c0_197 = arith.constant 0 : index
    %548 = vector.load %arg4[%c12_195, %c0_196, %c0_197] : memref<16x2x64xf32, #tpu.memory_space<vmem>>, vector<1x2x32xf32>
    %549 = vector.shape_cast %548 : vector<1x2x32xf32> to vector<2x32xf32>
    %550 = vector.shape_cast %547 : vector<2x32xf32> to vector<1x2x32xf32>
    tpu.vector_store %arg4[%c12_195, %c0_196, %c0_197], %550 {strides = array<i32>} : memref<16x2x64xf32, #tpu.memory_space<vmem>>, vector<1x2x32xf32>,
    %551 = vector.extract_strided_slice %546 {offsets = [0, 32], sizes = [2, 32], strides = [1, 1]} : vector<2x64xf32> to vector<2x32xf32>
    %c3_198 = arith.constant 3 : index
    %c0_199 = arith.constant 0 : index
    %c32_200 = arith.constant 32 : index
    %552 = vector.load %arg4[%c3_198, %c0_199, %c32_200] : memref<16x2x64xf32, #tpu.memory_space<vmem>>, vector<1x2x32xf32>
    %553 = vector.shape_cast %552 : vector<1x2x32xf32> to vector<2x32xf32>
    %554 = vector.shape_cast %551 : vector<2x32xf32> to vector<1x2x32xf32>
    tpu.vector_store %arg4[%c3_198, %c0_199, %c32_200], %554 {strides = array<i32>} : memref<16x2x64xf32, #tpu.memory_space<vmem>>, vector<1x2x32xf32>,
    %cst_201 = arith.constant dense<0.000000e+00> : vector<2x256xf32>
    %555 = tpu.matmul %546, %6, %cst_201 {dimension_numbers = #tpu.dot_dimension_numbers<[1], [0], [0], [1], [0, 0, 1, 1], [], []>} : vector<2x64xf32>, vector<64x256xf32>, vector<2x256xf32> -> vector<2x256xf32>
    %556 = vector.extract_strided_slice %5 {offsets = [26, 0], sizes = [2, 256], strides = [1, 1]} : vector<32x256xf32> to vector<2x256xf32>
    %557 = arith.addf %555, %556 : vector<2x256xf32>
    %558 = vector.extract_strided_slice %557 {offsets = [0, 0], sizes = [2, 64], strides = [1, 1]} : vector<2x256xf32> to vector<2x64xf32>
    %cst_202 = arith.constant 0.000000e+00 : f32
    %559 = vector.broadcast %cst_202 : f32 to vector<2x64xf32>
    %560 = arith.subf %559, %558 : vector<2x64xf32>
    %561 = math.exp %560 : vector<2x64xf32>
    %cst_203 = arith.constant 1.000000e+00 : f32
    %562 = vector.broadcast %cst_203 : f32 to vector<2x64xf32>
    %563 = arith.addf %562, %561 : vector<2x64xf32>
    %cst_204 = arith.constant 1.000000e+00 : f32
    %564 = vector.broadcast %cst_204 : f32 to vector<2x64xf32>
    %565 = arith.divf %564, %563 : vector<2x64xf32>
    %566 = vector.extract_strided_slice %557 {offsets = [0, 64], sizes = [2, 64], strides = [1, 1]} : vector<2x256xf32> to vector<2x64xf32>
    %cst_205 = arith.constant 0.000000e+00 : f32
    %567 = vector.broadcast %cst_205 : f32 to vector<2x64xf32>
    %568 = arith.subf %567, %566 : vector<2x64xf32>
    %569 = math.exp %568 : vector<2x64xf32>
    %cst_206 = arith.constant 1.000000e+00 : f32
    %570 = vector.broadcast %cst_206 : f32 to vector<2x64xf32>
    %571 = arith.addf %570, %569 : vector<2x64xf32>
    %cst_207 = arith.constant 1.000000e+00 : f32
    %572 = vector.broadcast %cst_207 : f32 to vector<2x64xf32>
    %573 = arith.divf %572, %571 : vector<2x64xf32>
    %574 = vector.extract_strided_slice %557 {offsets = [0, 128], sizes = [2, 64], strides = [1, 1]} : vector<2x256xf32> to vector<2x64xf32>
    %575 = math.tanh %574 : vector<2x64xf32>
    %576 = vector.extract_strided_slice %557 {offsets = [0, 192], sizes = [2, 64], strides = [1, 1]} : vector<2x256xf32> to vector<2x64xf32>
    %cst_208 = arith.constant 0.000000e+00 : f32
    %577 = vector.broadcast %cst_208 : f32 to vector<2x64xf32>
    %578 = arith.subf %577, %576 : vector<2x64xf32>
    %579 = math.exp %578 : vector<2x64xf32>
    %cst_209 = arith.constant 1.000000e+00 : f32
    %580 = vector.broadcast %cst_209 : f32 to vector<2x64xf32>
    %581 = arith.addf %580, %579 : vector<2x64xf32>
    %cst_210 = arith.constant 1.000000e+00 : f32
    %582 = vector.broadcast %cst_210 : f32 to vector<2x64xf32>
    %583 = arith.divf %582, %581 : vector<2x64xf32>
    %584 = arith.mulf %573, %544 : vector<2x64xf32>
    %585 = arith.mulf %565, %575 : vector<2x64xf32>
    %586 = arith.addf %584, %585 : vector<2x64xf32>
    %587 = math.tanh %586 : vector<2x64xf32>
    %588 = arith.mulf %583, %587 : vector<2x64xf32>
    %589 = vector.extract_strided_slice %588 {offsets = [0, 0], sizes = [2, 32], strides = [1, 1]} : vector<2x64xf32> to vector<2x32xf32>
    %c13_211 = arith.constant 13 : index
    %c0_212 = arith.constant 0 : index
    %c0_213 = arith.constant 0 : index
    %590 = vector.load %arg4[%c13_211, %c0_212, %c0_213] : memref<16x2x64xf32, #tpu.memory_space<vmem>>, vector<1x2x32xf32>
    %591 = vector.shape_cast %590 : vector<1x2x32xf32> to vector<2x32xf32>
    %592 = vector.shape_cast %589 : vector<2x32xf32> to vector<1x2x32xf32>
    tpu.vector_store %arg4[%c13_211, %c0_212, %c0_213], %592 {strides = array<i32>} : memref<16x2x64xf32, #tpu.memory_space<vmem>>, vector<1x2x32xf32>,
    %593 = vector.extract_strided_slice %588 {offsets = [0, 32], sizes = [2, 32], strides = [1, 1]} : vector<2x64xf32> to vector<2x32xf32>
    %c2_214 = arith.constant 2 : index
    %c0_215 = arith.constant 0 : index
    %c32_216 = arith.constant 32 : index
    %594 = vector.load %arg4[%c2_214, %c0_215, %c32_216] : memref<16x2x64xf32, #tpu.memory_space<vmem>>, vector<1x2x32xf32>
    %595 = vector.shape_cast %594 : vector<1x2x32xf32> to vector<2x32xf32>
    %596 = vector.shape_cast %593 : vector<2x32xf32> to vector<1x2x32xf32>
    tpu.vector_store %arg4[%c2_214, %c0_215, %c32_216], %596 {strides = array<i32>} : memref<16x2x64xf32, #tpu.memory_space<vmem>>, vector<1x2x32xf32>,
    %cst_217 = arith.constant dense<0.000000e+00> : vector<2x256xf32>
    %597 = tpu.matmul %588, %6, %cst_217 {dimension_numbers = #tpu.dot_dimension_numbers<[1], [0], [0], [1], [0, 0, 1, 1], [], []>} : vector<2x64xf32>, vector<64x256xf32>, vector<2x256xf32> -> vector<2x256xf32>
    %598 = vector.extract_strided_slice %5 {offsets = [28, 0], sizes = [2, 256], strides = [1, 1]} : vector<32x256xf32> to vector<2x256xf32>
    %599 = arith.addf %597, %598 : vector<2x256xf32>
    %600 = vector.extract_strided_slice %599 {offsets = [0, 0], sizes = [2, 64], strides = [1, 1]} : vector<2x256xf32> to vector<2x64xf32>
    %cst_218 = arith.constant 0.000000e+00 : f32
    %601 = vector.broadcast %cst_218 : f32 to vector<2x64xf32>
    %602 = arith.subf %601, %600 : vector<2x64xf32>
    %603 = math.exp %602 : vector<2x64xf32>
    %cst_219 = arith.constant 1.000000e+00 : f32
    %604 = vector.broadcast %cst_219 : f32 to vector<2x64xf32>
    %605 = arith.addf %604, %603 : vector<2x64xf32>
    %cst_220 = arith.constant 1.000000e+00 : f32
    %606 = vector.broadcast %cst_220 : f32 to vector<2x64xf32>
    %607 = arith.divf %606, %605 : vector<2x64xf32>
    %608 = vector.extract_strided_slice %599 {offsets = [0, 64], sizes = [2, 64], strides = [1, 1]} : vector<2x256xf32> to vector<2x64xf32>
    %cst_221 = arith.constant 0.000000e+00 : f32
    %609 = vector.broadcast %cst_221 : f32 to vector<2x64xf32>
    %610 = arith.subf %609, %608 : vector<2x64xf32>
    %611 = math.exp %610 : vector<2x64xf32>
    %cst_222 = arith.constant 1.000000e+00 : f32
    %612 = vector.broadcast %cst_222 : f32 to vector<2x64xf32>
    %613 = arith.addf %612, %611 : vector<2x64xf32>
    %cst_223 = arith.constant 1.000000e+00 : f32
    %614 = vector.broadcast %cst_223 : f32 to vector<2x64xf32>
    %615 = arith.divf %614, %613 : vector<2x64xf32>
    %616 = vector.extract_strided_slice %599 {offsets = [0, 128], sizes = [2, 64], strides = [1, 1]} : vector<2x256xf32> to vector<2x64xf32>
    %617 = math.tanh %616 : vector<2x64xf32>
    %618 = vector.extract_strided_slice %599 {offsets = [0, 192], sizes = [2, 64], strides = [1, 1]} : vector<2x256xf32> to vector<2x64xf32>
    %cst_224 = arith.constant 0.000000e+00 : f32
    %619 = vector.broadcast %cst_224 : f32 to vector<2x64xf32>
    %620 = arith.subf %619, %618 : vector<2x64xf32>
    %621 = math.exp %620 : vector<2x64xf32>
    %cst_225 = arith.constant 1.000000e+00 : f32
    %622 = vector.broadcast %cst_225 : f32 to vector<2x64xf32>
    %623 = arith.addf %622, %621 : vector<2x64xf32>
    %cst_226 = arith.constant 1.000000e+00 : f32
    %624 = vector.broadcast %cst_226 : f32 to vector<2x64xf32>
    %625 = arith.divf %624, %623 : vector<2x64xf32>
    %626 = arith.mulf %615, %586 : vector<2x64xf32>
    %627 = arith.mulf %607, %617 : vector<2x64xf32>
    %628 = arith.addf %626, %627 : vector<2x64xf32>
    %629 = math.tanh %628 : vector<2x64xf32>
    %630 = arith.mulf %625, %629 : vector<2x64xf32>
    %631 = vector.extract_strided_slice %630 {offsets = [0, 0], sizes = [2, 32], strides = [1, 1]} : vector<2x64xf32> to vector<2x32xf32>
    %c14_227 = arith.constant 14 : index
    %c0_228 = arith.constant 0 : index
    %c0_229 = arith.constant 0 : index
    %632 = vector.load %arg4[%c14_227, %c0_228, %c0_229] : memref<16x2x64xf32, #tpu.memory_space<vmem>>, vector<1x2x32xf32>
    %633 = vector.shape_cast %632 : vector<1x2x32xf32> to vector<2x32xf32>
    %634 = vector.shape_cast %631 : vector<2x32xf32> to vector<1x2x32xf32>
    tpu.vector_store %arg4[%c14_227, %c0_228, %c0_229], %634 {strides = array<i32>} : memref<16x2x64xf32, #tpu.memory_space<vmem>>, vector<1x2x32xf32>,
    %635 = vector.extract_strided_slice %630 {offsets = [0, 32], sizes = [2, 32], strides = [1, 1]} : vector<2x64xf32> to vector<2x32xf32>
    %c1_230 = arith.constant 1 : index
    %c0_231 = arith.constant 0 : index
    %c32_232 = arith.constant 32 : index
    %636 = vector.load %arg4[%c1_230, %c0_231, %c32_232] : memref<16x2x64xf32, #tpu.memory_space<vmem>>, vector<1x2x32xf32>
    %637 = vector.shape_cast %636 : vector<1x2x32xf32> to vector<2x32xf32>
    %638 = vector.shape_cast %635 : vector<2x32xf32> to vector<1x2x32xf32>
    tpu.vector_store %arg4[%c1_230, %c0_231, %c32_232], %638 {strides = array<i32>} : memref<16x2x64xf32, #tpu.memory_space<vmem>>, vector<1x2x32xf32>,
    %cst_233 = arith.constant dense<0.000000e+00> : vector<2x256xf32>
    %639 = tpu.matmul %630, %6, %cst_233 {dimension_numbers = #tpu.dot_dimension_numbers<[1], [0], [0], [1], [0, 0, 1, 1], [], []>} : vector<2x64xf32>, vector<64x256xf32>, vector<2x256xf32> -> vector<2x256xf32>
    %640 = vector.extract_strided_slice %5 {offsets = [30, 0], sizes = [2, 256], strides = [1, 1]} : vector<32x256xf32> to vector<2x256xf32>
    %641 = arith.addf %639, %640 : vector<2x256xf32>
    %642 = vector.extract_strided_slice %641 {offsets = [0, 0], sizes = [2, 64], strides = [1, 1]} : vector<2x256xf32> to vector<2x64xf32>
    %cst_234 = arith.constant 0.000000e+00 : f32
    %643 = vector.broadcast %cst_234 : f32 to vector<2x64xf32>
    %644 = arith.subf %643, %642 : vector<2x64xf32>
    %645 = math.exp %644 : vector<2x64xf32>
    %cst_235 = arith.constant 1.000000e+00 : f32
    %646 = vector.broadcast %cst_235 : f32 to vector<2x64xf32>
    %647 = arith.addf %646, %645 : vector<2x64xf32>
    %cst_236 = arith.constant 1.000000e+00 : f32
    %648 = vector.broadcast %cst_236 : f32 to vector<2x64xf32>
    %649 = arith.divf %648, %647 : vector<2x64xf32>
    %650 = vector.extract_strided_slice %641 {offsets = [0, 64], sizes = [2, 64], strides = [1, 1]} : vector<2x256xf32> to vector<2x64xf32>
    %cst_237 = arith.constant 0.000000e+00 : f32
    %651 = vector.broadcast %cst_237 : f32 to vector<2x64xf32>
    %652 = arith.subf %651, %650 : vector<2x64xf32>
    %653 = math.exp %652 : vector<2x64xf32>
    %cst_238 = arith.constant 1.000000e+00 : f32
    %654 = vector.broadcast %cst_238 : f32 to vector<2x64xf32>
    %655 = arith.addf %654, %653 : vector<2x64xf32>
    %cst_239 = arith.constant 1.000000e+00 : f32
    %656 = vector.broadcast %cst_239 : f32 to vector<2x64xf32>
    %657 = arith.divf %656, %655 : vector<2x64xf32>
    %658 = vector.extract_strided_slice %641 {offsets = [0, 128], sizes = [2, 64], strides = [1, 1]} : vector<2x256xf32> to vector<2x64xf32>
    %659 = math.tanh %658 : vector<2x64xf32>
    %660 = vector.extract_strided_slice %641 {offsets = [0, 192], sizes = [2, 64], strides = [1, 1]} : vector<2x256xf32> to vector<2x64xf32>
    %cst_240 = arith.constant 0.000000e+00 : f32
    %661 = vector.broadcast %cst_240 : f32 to vector<2x64xf32>
    %662 = arith.subf %661, %660 : vector<2x64xf32>
    %663 = math.exp %662 : vector<2x64xf32>
    %cst_241 = arith.constant 1.000000e+00 : f32
    %664 = vector.broadcast %cst_241 : f32 to vector<2x64xf32>
    %665 = arith.addf %664, %663 : vector<2x64xf32>
    %cst_242 = arith.constant 1.000000e+00 : f32
    %666 = vector.broadcast %cst_242 : f32 to vector<2x64xf32>
    %667 = arith.divf %666, %665 : vector<2x64xf32>
    %668 = arith.mulf %657, %628 : vector<2x64xf32>
    %669 = arith.mulf %649, %659 : vector<2x64xf32>
    %670 = arith.addf %668, %669 : vector<2x64xf32>
    %671 = math.tanh %670 : vector<2x64xf32>
    %672 = arith.mulf %667, %671 : vector<2x64xf32>
    %673 = vector.extract_strided_slice %672 {offsets = [0, 0], sizes = [2, 32], strides = [1, 1]} : vector<2x64xf32> to vector<2x32xf32>
    %c15_243 = arith.constant 15 : index
    %c0_244 = arith.constant 0 : index
    %c0_245 = arith.constant 0 : index
    %674 = vector.load %arg4[%c15_243, %c0_244, %c0_245] : memref<16x2x64xf32, #tpu.memory_space<vmem>>, vector<1x2x32xf32>
    %675 = vector.shape_cast %674 : vector<1x2x32xf32> to vector<2x32xf32>
    %676 = vector.shape_cast %673 : vector<2x32xf32> to vector<1x2x32xf32>
    tpu.vector_store %arg4[%c15_243, %c0_244, %c0_245], %676 {strides = array<i32>} : memref<16x2x64xf32, #tpu.memory_space<vmem>>, vector<1x2x32xf32>,
    %677 = vector.extract_strided_slice %672 {offsets = [0, 32], sizes = [2, 32], strides = [1, 1]} : vector<2x64xf32> to vector<2x32xf32>
    %c0_246 = arith.constant 0 : index
    %c0_247 = arith.constant 0 : index
    %c32_248 = arith.constant 32 : index
    %678 = vector.load %arg4[%c0_246, %c0_247, %c32_248] : memref<16x2x64xf32, #tpu.memory_space<vmem>>, vector<1x2x32xf32>
    %679 = vector.shape_cast %678 : vector<1x2x32xf32> to vector<2x32xf32>
    %680 = vector.shape_cast %677 : vector<2x32xf32> to vector<1x2x32xf32>
    tpu.vector_store %arg4[%c0_246, %c0_247, %c32_248], %680 {strides = array<i32>} : memref<16x2x64xf32, #tpu.memory_space<vmem>>, vector<1x2x32xf32>,
    return
  }
}

module attributes {stable_mosaic.version = 11 : i64} {
  func.func @kernel(%arg0: memref<32x64xf32, #tpu.memory_space<vmem>>, %arg1: memref<64x8xf32, #tpu.memory_space<vmem>>, %arg2: memref<1x8xf32, #tpu.memory_space<vmem>>, %arg3: memref<3x8x8xf32, #tpu.memory_space<vmem>>, %arg4: memref<4x8x8xf32, #tpu.memory_space<vmem>>, %arg5: memref<5x8x8xf32, #tpu.memory_space<vmem>>, %arg6: memref<1x8xf32, #tpu.memory_space<vmem>>, %arg7: memref<1x8xf32, #tpu.memory_space<vmem>>, %arg8: memref<1x8xf32, #tpu.memory_space<vmem>>, %arg9: memref<3x8x8xf32, #tpu.memory_space<vmem>>, %arg10: memref<1x8xf32, #tpu.memory_space<vmem>>, %arg11: memref<3x8x8xf32, #tpu.memory_space<vmem>>, %arg12: memref<1x8xf32, #tpu.memory_space<vmem>>, %arg13: memref<24x2xf32, #tpu.memory_space<vmem>>, %arg14: memref<1x2xf32, #tpu.memory_space<vmem>>, %arg15: memref<2x2xf32, #tpu.memory_space<vmem>>, %arg16: memref<2x24xf32, #tpu.memory_space<vmem>>) attributes {dimension_semantics = [], scalar_prefetch = 0 : i64, scratch_operands = 0 : i64, tpu.core_type = #tpu.core_type<tc>} {
    %c0 = arith.constant 0 : index
    %c0_0 = arith.constant 0 : index
    %0 = vector.load %arg0[%c0, %c0_0] : memref<32x64xf32, #tpu.memory_space<vmem>>, vector<32x64xf32>
    %c0_1 = arith.constant 0 : index
    %c0_2 = arith.constant 0 : index
    %1 = vector.load %arg1[%c0_1, %c0_2] : memref<64x8xf32, #tpu.memory_space<vmem>>, vector<64x8xf32>
    %cst = arith.constant dense<0.000000e+00> : vector<32x8xf32>
    %2 = tpu.matmul %0, %1, %cst {dimension_numbers = #tpu.dot_dimension_numbers<[1], [0], [0], [1], [0, 0, 1, 1], [], []>} : vector<32x64xf32>, vector<64x8xf32>, vector<32x8xf32> -> vector<32x8xf32>
    %c0_3 = arith.constant 0 : index
    %c0_4 = arith.constant 0 : index
    %3 = vector.load %arg2[%c0_3, %c0_4] : memref<1x8xf32, #tpu.memory_space<vmem>>, vector<1x8xf32>
    %4 = vector.broadcast %3 : vector<1x8xf32> to vector<32x8xf32>
    %5 = arith.addf %2, %4 : vector<32x8xf32>
    %c0_5 = arith.constant 0 : index
    %c0_6 = arith.constant 0 : index
    %c0_7 = arith.constant 0 : index
    %6 = vector.load %arg9[%c0_5, %c0_6, %c0_7] : memref<3x8x8xf32, #tpu.memory_space<vmem>>, vector<1x8x8xf32>
    %7 = vector.shape_cast %6 : vector<1x8x8xf32> to vector<8x8xf32>
    %c1 = arith.constant 1 : index
    %c0_8 = arith.constant 0 : index
    %c0_9 = arith.constant 0 : index
    %8 = vector.load %arg9[%c1, %c0_8, %c0_9] : memref<3x8x8xf32, #tpu.memory_space<vmem>>, vector<1x8x8xf32>
    %9 = vector.shape_cast %8 : vector<1x8x8xf32> to vector<8x8xf32>
    %c2 = arith.constant 2 : index
    %c0_10 = arith.constant 0 : index
    %c0_11 = arith.constant 0 : index
    %10 = vector.load %arg9[%c2, %c0_10, %c0_11] : memref<3x8x8xf32, #tpu.memory_space<vmem>>, vector<1x8x8xf32>
    %11 = vector.shape_cast %10 : vector<1x8x8xf32> to vector<8x8xf32>
    %c0_12 = arith.constant 0 : index
    %c0_13 = arith.constant 0 : index
    %c0_14 = arith.constant 0 : index
    %12 = vector.load %arg11[%c0_12, %c0_13, %c0_14] : memref<3x8x8xf32, #tpu.memory_space<vmem>>, vector<1x8x8xf32>
    %13 = vector.shape_cast %12 : vector<1x8x8xf32> to vector<8x8xf32>
    %c1_15 = arith.constant 1 : index
    %c0_16 = arith.constant 0 : index
    %c0_17 = arith.constant 0 : index
    %14 = vector.load %arg11[%c1_15, %c0_16, %c0_17] : memref<3x8x8xf32, #tpu.memory_space<vmem>>, vector<1x8x8xf32>
    %15 = vector.shape_cast %14 : vector<1x8x8xf32> to vector<8x8xf32>
    %c2_18 = arith.constant 2 : index
    %c0_19 = arith.constant 0 : index
    %c0_20 = arith.constant 0 : index
    %16 = vector.load %arg11[%c2_18, %c0_19, %c0_20] : memref<3x8x8xf32, #tpu.memory_space<vmem>>, vector<1x8x8xf32>
    %17 = vector.shape_cast %16 : vector<1x8x8xf32> to vector<8x8xf32>
    %c0_21 = arith.constant 0 : index
    %c0_22 = arith.constant 0 : index
    %18 = vector.load %arg10[%c0_21, %c0_22] : memref<1x8xf32, #tpu.memory_space<vmem>>, vector<1x8xf32>
    %c0_23 = arith.constant 0 : index
    %c0_24 = arith.constant 0 : index
    %19 = vector.load %arg12[%c0_23, %c0_24] : memref<1x8xf32, #tpu.memory_space<vmem>>, vector<1x8xf32>
    %c0_25 = arith.constant 0 : index
    %c0_26 = arith.constant 0 : index
    %c0_27 = arith.constant 0 : index
    %20 = vector.load %arg3[%c0_25, %c0_26, %c0_27] : memref<3x8x8xf32, #tpu.memory_space<vmem>>, vector<1x8x8xf32>
    %21 = vector.shape_cast %20 : vector<1x8x8xf32> to vector<8x8xf32>
    %c1_28 = arith.constant 1 : index
    %c0_29 = arith.constant 0 : index
    %c0_30 = arith.constant 0 : index
    %22 = vector.load %arg3[%c1_28, %c0_29, %c0_30] : memref<3x8x8xf32, #tpu.memory_space<vmem>>, vector<1x8x8xf32>
    %23 = vector.shape_cast %22 : vector<1x8x8xf32> to vector<8x8xf32>
    %c2_31 = arith.constant 2 : index
    %c0_32 = arith.constant 0 : index
    %c0_33 = arith.constant 0 : index
    %24 = vector.load %arg3[%c2_31, %c0_32, %c0_33] : memref<3x8x8xf32, #tpu.memory_space<vmem>>, vector<1x8x8xf32>
    %25 = vector.shape_cast %24 : vector<1x8x8xf32> to vector<8x8xf32>
    %c0_34 = arith.constant 0 : index
    %c0_35 = arith.constant 0 : index
    %c0_36 = arith.constant 0 : index
    %26 = vector.load %arg4[%c0_34, %c0_35, %c0_36] : memref<4x8x8xf32, #tpu.memory_space<vmem>>, vector<1x8x8xf32>
    %27 = vector.shape_cast %26 : vector<1x8x8xf32> to vector<8x8xf32>
    %c1_37 = arith.constant 1 : index
    %c0_38 = arith.constant 0 : index
    %c0_39 = arith.constant 0 : index
    %28 = vector.load %arg4[%c1_37, %c0_38, %c0_39] : memref<4x8x8xf32, #tpu.memory_space<vmem>>, vector<1x8x8xf32>
    %29 = vector.shape_cast %28 : vector<1x8x8xf32> to vector<8x8xf32>
    %c2_40 = arith.constant 2 : index
    %c0_41 = arith.constant 0 : index
    %c0_42 = arith.constant 0 : index
    %30 = vector.load %arg4[%c2_40, %c0_41, %c0_42] : memref<4x8x8xf32, #tpu.memory_space<vmem>>, vector<1x8x8xf32>
    %31 = vector.shape_cast %30 : vector<1x8x8xf32> to vector<8x8xf32>
    %c3 = arith.constant 3 : index
    %c0_43 = arith.constant 0 : index
    %c0_44 = arith.constant 0 : index
    %32 = vector.load %arg4[%c3, %c0_43, %c0_44] : memref<4x8x8xf32, #tpu.memory_space<vmem>>, vector<1x8x8xf32>
    %33 = vector.shape_cast %32 : vector<1x8x8xf32> to vector<8x8xf32>
    %c0_45 = arith.constant 0 : index
    %c0_46 = arith.constant 0 : index
    %c0_47 = arith.constant 0 : index
    %34 = vector.load %arg5[%c0_45, %c0_46, %c0_47] : memref<5x8x8xf32, #tpu.memory_space<vmem>>, vector<1x8x8xf32>
    %35 = vector.shape_cast %34 : vector<1x8x8xf32> to vector<8x8xf32>
    %c1_48 = arith.constant 1 : index
    %c0_49 = arith.constant 0 : index
    %c0_50 = arith.constant 0 : index
    %36 = vector.load %arg5[%c1_48, %c0_49, %c0_50] : memref<5x8x8xf32, #tpu.memory_space<vmem>>, vector<1x8x8xf32>
    %37 = vector.shape_cast %36 : vector<1x8x8xf32> to vector<8x8xf32>
    %c2_51 = arith.constant 2 : index
    %c0_52 = arith.constant 0 : index
    %c0_53 = arith.constant 0 : index
    %38 = vector.load %arg5[%c2_51, %c0_52, %c0_53] : memref<5x8x8xf32, #tpu.memory_space<vmem>>, vector<1x8x8xf32>
    %39 = vector.shape_cast %38 : vector<1x8x8xf32> to vector<8x8xf32>
    %c3_54 = arith.constant 3 : index
    %c0_55 = arith.constant 0 : index
    %c0_56 = arith.constant 0 : index
    %40 = vector.load %arg5[%c3_54, %c0_55, %c0_56] : memref<5x8x8xf32, #tpu.memory_space<vmem>>, vector<1x8x8xf32>
    %41 = vector.shape_cast %40 : vector<1x8x8xf32> to vector<8x8xf32>
    %c4 = arith.constant 4 : index
    %c0_57 = arith.constant 0 : index
    %c0_58 = arith.constant 0 : index
    %42 = vector.load %arg5[%c4, %c0_57, %c0_58] : memref<5x8x8xf32, #tpu.memory_space<vmem>>, vector<1x8x8xf32>
    %43 = vector.shape_cast %42 : vector<1x8x8xf32> to vector<8x8xf32>
    %c0_59 = arith.constant 0 : index
    %c0_60 = arith.constant 0 : index
    %44 = vector.load %arg6[%c0_59, %c0_60] : memref<1x8xf32, #tpu.memory_space<vmem>>, vector<1x8xf32>
    %c0_61 = arith.constant 0 : index
    %c0_62 = arith.constant 0 : index
    %45 = vector.load %arg7[%c0_61, %c0_62] : memref<1x8xf32, #tpu.memory_space<vmem>>, vector<1x8xf32>
    %c0_63 = arith.constant 0 : index
    %c0_64 = arith.constant 0 : index
    %46 = vector.load %arg8[%c0_63, %c0_64] : memref<1x8xf32, #tpu.memory_space<vmem>>, vector<1x8xf32>
    %cst_65 = arith.constant 0.000000e+00 : f32
    %47 = vector.broadcast %cst_65 : f32 to vector<1x8xf32>
    %48 = vector.extract_strided_slice %5 {offsets = [0, 0], sizes = [16, 8], strides = [1, 1]} : vector<32x8xf32> to vector<16x8xf32>
    %49 = vector.extract_strided_slice %48 {offsets = [0, 0], sizes = [14, 8], strides = [1, 1]} : vector<16x8xf32> to vector<14x8xf32>
    %cst_66 = arith.constant dense<0.000000e+00> : vector<14x8xf32>
    %50 = tpu.matmul %49, %21, %cst_66 {dimension_numbers = #tpu.dot_dimension_numbers<[1], [0], [0], [1], [0, 0, 1, 1], [], []>} : vector<14x8xf32>, vector<8x8xf32>, vector<14x8xf32> -> vector<14x8xf32>
    %51 = vector.extract_strided_slice %48 {offsets = [1, 0], sizes = [14, 8], strides = [1, 1]} : vector<16x8xf32> to vector<14x8xf32>
    %cst_67 = arith.constant dense<0.000000e+00> : vector<14x8xf32>
    %52 = tpu.matmul %51, %23, %cst_67 {dimension_numbers = #tpu.dot_dimension_numbers<[1], [0], [0], [1], [0, 0, 1, 1], [], []>} : vector<14x8xf32>, vector<8x8xf32>, vector<14x8xf32> -> vector<14x8xf32>
    %53 = arith.addf %50, %52 : vector<14x8xf32>
    %54 = vector.extract_strided_slice %48 {offsets = [2, 0], sizes = [14, 8], strides = [1, 1]} : vector<16x8xf32> to vector<14x8xf32>
    %cst_68 = arith.constant dense<0.000000e+00> : vector<14x8xf32>
    %55 = tpu.matmul %54, %25, %cst_68 {dimension_numbers = #tpu.dot_dimension_numbers<[1], [0], [0], [1], [0, 0, 1, 1], [], []>} : vector<14x8xf32>, vector<8x8xf32>, vector<14x8xf32> -> vector<14x8xf32>
    %56 = arith.addf %53, %55 : vector<14x8xf32>
    %57 = vector.broadcast %44 : vector<1x8xf32> to vector<14x8xf32>
    %58 = arith.addf %56, %57 : vector<14x8xf32>
    %cst_69 = arith.constant 0.000000e+00 : f32
    %59 = vector.broadcast %cst_69 : f32 to vector<14x8xf32>
    %60 = arith.maximumf %58, %59 : vector<14x8xf32>
    %61 = vector.extract_strided_slice %60 {offsets = [0, 0], sizes = [12, 8], strides = [1, 1]} : vector<14x8xf32> to vector<12x8xf32>
    %cst_70 = arith.constant dense<0.000000e+00> : vector<12x8xf32>
    %62 = tpu.matmul %61, %7, %cst_70 {dimension_numbers = #tpu.dot_dimension_numbers<[1], [0], [0], [1], [0, 0, 1, 1], [], []>} : vector<12x8xf32>, vector<8x8xf32>, vector<12x8xf32> -> vector<12x8xf32>
    %63 = vector.extract_strided_slice %60 {offsets = [1, 0], sizes = [12, 8], strides = [1, 1]} : vector<14x8xf32> to vector<12x8xf32>
    %cst_71 = arith.constant dense<0.000000e+00> : vector<12x8xf32>
    %64 = tpu.matmul %63, %9, %cst_71 {dimension_numbers = #tpu.dot_dimension_numbers<[1], [0], [0], [1], [0, 0, 1, 1], [], []>} : vector<12x8xf32>, vector<8x8xf32>, vector<12x8xf32> -> vector<12x8xf32>
    %65 = arith.addf %62, %64 : vector<12x8xf32>
    %66 = vector.extract_strided_slice %60 {offsets = [2, 0], sizes = [12, 8], strides = [1, 1]} : vector<14x8xf32> to vector<12x8xf32>
    %cst_72 = arith.constant dense<0.000000e+00> : vector<12x8xf32>
    %67 = tpu.matmul %66, %11, %cst_72 {dimension_numbers = #tpu.dot_dimension_numbers<[1], [0], [0], [1], [0, 0, 1, 1], [], []>} : vector<12x8xf32>, vector<8x8xf32>, vector<12x8xf32> -> vector<12x8xf32>
    %68 = arith.addf %65, %67 : vector<12x8xf32>
    %69 = vector.broadcast %18 : vector<1x8xf32> to vector<12x8xf32>
    %70 = arith.addf %68, %69 : vector<12x8xf32>
    %cst_73 = arith.constant 0.000000e+00 : f32
    %71 = vector.broadcast %cst_73 : f32 to vector<12x8xf32>
    %72 = arith.maximumf %70, %71 : vector<12x8xf32>
    %73 = tpu.concatenate %47, %72, %47 in 0 : vector<1x8xf32>, vector<12x8xf32>, vector<1x8xf32> -> vector<14x8xf32>
    %74 = vector.extract_strided_slice %73 {offsets = [0, 0], sizes = [12, 8], strides = [1, 1]} : vector<14x8xf32> to vector<12x8xf32>
    %cst_74 = arith.constant dense<0.000000e+00> : vector<12x8xf32>
    %75 = tpu.matmul %74, %13, %cst_74 {dimension_numbers = #tpu.dot_dimension_numbers<[1], [0], [0], [1], [0, 0, 1, 1], [], []>} : vector<12x8xf32>, vector<8x8xf32>, vector<12x8xf32> -> vector<12x8xf32>
    %76 = vector.extract_strided_slice %73 {offsets = [1, 0], sizes = [12, 8], strides = [1, 1]} : vector<14x8xf32> to vector<12x8xf32>
    %cst_75 = arith.constant dense<0.000000e+00> : vector<12x8xf32>
    %77 = tpu.matmul %76, %15, %cst_75 {dimension_numbers = #tpu.dot_dimension_numbers<[1], [0], [0], [1], [0, 0, 1, 1], [], []>} : vector<12x8xf32>, vector<8x8xf32>, vector<12x8xf32> -> vector<12x8xf32>
    %78 = arith.addf %75, %77 : vector<12x8xf32>
    %79 = vector.extract_strided_slice %73 {offsets = [2, 0], sizes = [12, 8], strides = [1, 1]} : vector<14x8xf32> to vector<12x8xf32>
    %cst_76 = arith.constant dense<0.000000e+00> : vector<12x8xf32>
    %80 = tpu.matmul %79, %17, %cst_76 {dimension_numbers = #tpu.dot_dimension_numbers<[1], [0], [0], [1], [0, 0, 1, 1], [], []>} : vector<12x8xf32>, vector<8x8xf32>, vector<12x8xf32> -> vector<12x8xf32>
    %81 = arith.addf %78, %80 : vector<12x8xf32>
    %82 = vector.broadcast %19 : vector<1x8xf32> to vector<12x8xf32>
    %83 = arith.addf %81, %82 : vector<12x8xf32>
    %cst_77 = arith.constant 0.000000e+00 : f32
    %84 = vector.broadcast %cst_77 : f32 to vector<12x8xf32>
    %85 = arith.maximumf %83, %84 : vector<12x8xf32>
    %86 = arith.addf %72, %85 : vector<12x8xf32>
    %cst_78 = arith.constant dense<0xFF800000> : vector<8xf32>
    %87 = vector.multi_reduction <maximumf>, %86, %cst_78 [0] : vector<12x8xf32> to vector<8xf32>
    %88 = vector.shape_cast %87 : vector<8xf32> to vector<1x8xf32>
    %89 = vector.extract_strided_slice %48 {offsets = [0, 0], sizes = [13, 8], strides = [1, 1]} : vector<16x8xf32> to vector<13x8xf32>
    %cst_79 = arith.constant dense<0.000000e+00> : vector<13x8xf32>
    %90 = tpu.matmul %89, %27, %cst_79 {dimension_numbers = #tpu.dot_dimension_numbers<[1], [0], [0], [1], [0, 0, 1, 1], [], []>} : vector<13x8xf32>, vector<8x8xf32>, vector<13x8xf32> -> vector<13x8xf32>
    %91 = vector.extract_strided_slice %48 {offsets = [1, 0], sizes = [13, 8], strides = [1, 1]} : vector<16x8xf32> to vector<13x8xf32>
    %cst_80 = arith.constant dense<0.000000e+00> : vector<13x8xf32>
    %92 = tpu.matmul %91, %29, %cst_80 {dimension_numbers = #tpu.dot_dimension_numbers<[1], [0], [0], [1], [0, 0, 1, 1], [], []>} : vector<13x8xf32>, vector<8x8xf32>, vector<13x8xf32> -> vector<13x8xf32>
    %93 = arith.addf %90, %92 : vector<13x8xf32>
    %94 = vector.extract_strided_slice %48 {offsets = [2, 0], sizes = [13, 8], strides = [1, 1]} : vector<16x8xf32> to vector<13x8xf32>
    %cst_81 = arith.constant dense<0.000000e+00> : vector<13x8xf32>
    %95 = tpu.matmul %94, %31, %cst_81 {dimension_numbers = #tpu.dot_dimension_numbers<[1], [0], [0], [1], [0, 0, 1, 1], [], []>} : vector<13x8xf32>, vector<8x8xf32>, vector<13x8xf32> -> vector<13x8xf32>
    %96 = arith.addf %93, %95 : vector<13x8xf32>
    %97 = vector.extract_strided_slice %48 {offsets = [3, 0], sizes = [13, 8], strides = [1, 1]} : vector<16x8xf32> to vector<13x8xf32>
    %cst_82 = arith.constant dense<0.000000e+00> : vector<13x8xf32>
    %98 = tpu.matmul %97, %33, %cst_82 {dimension_numbers = #tpu.dot_dimension_numbers<[1], [0], [0], [1], [0, 0, 1, 1], [], []>} : vector<13x8xf32>, vector<8x8xf32>, vector<13x8xf32> -> vector<13x8xf32>
    %99 = arith.addf %96, %98 : vector<13x8xf32>
    %100 = vector.broadcast %45 : vector<1x8xf32> to vector<13x8xf32>
    %101 = arith.addf %99, %100 : vector<13x8xf32>
    %cst_83 = arith.constant 0.000000e+00 : f32
    %102 = vector.broadcast %cst_83 : f32 to vector<13x8xf32>
    %103 = arith.maximumf %101, %102 : vector<13x8xf32>
    %104 = vector.extract_strided_slice %103 {offsets = [0, 0], sizes = [11, 8], strides = [1, 1]} : vector<13x8xf32> to vector<11x8xf32>
    %cst_84 = arith.constant dense<0.000000e+00> : vector<11x8xf32>
    %105 = tpu.matmul %104, %7, %cst_84 {dimension_numbers = #tpu.dot_dimension_numbers<[1], [0], [0], [1], [0, 0, 1, 1], [], []>} : vector<11x8xf32>, vector<8x8xf32>, vector<11x8xf32> -> vector<11x8xf32>
    %106 = vector.extract_strided_slice %103 {offsets = [1, 0], sizes = [11, 8], strides = [1, 1]} : vector<13x8xf32> to vector<11x8xf32>
    %cst_85 = arith.constant dense<0.000000e+00> : vector<11x8xf32>
    %107 = tpu.matmul %106, %9, %cst_85 {dimension_numbers = #tpu.dot_dimension_numbers<[1], [0], [0], [1], [0, 0, 1, 1], [], []>} : vector<11x8xf32>, vector<8x8xf32>, vector<11x8xf32> -> vector<11x8xf32>
    %108 = arith.addf %105, %107 : vector<11x8xf32>
    %109 = vector.extract_strided_slice %103 {offsets = [2, 0], sizes = [11, 8], strides = [1, 1]} : vector<13x8xf32> to vector<11x8xf32>
    %cst_86 = arith.constant dense<0.000000e+00> : vector<11x8xf32>
    %110 = tpu.matmul %109, %11, %cst_86 {dimension_numbers = #tpu.dot_dimension_numbers<[1], [0], [0], [1], [0, 0, 1, 1], [], []>} : vector<11x8xf32>, vector<8x8xf32>, vector<11x8xf32> -> vector<11x8xf32>
    %111 = arith.addf %108, %110 : vector<11x8xf32>
    %112 = vector.broadcast %18 : vector<1x8xf32> to vector<11x8xf32>
    %113 = arith.addf %111, %112 : vector<11x8xf32>
    %cst_87 = arith.constant 0.000000e+00 : f32
    %114 = vector.broadcast %cst_87 : f32 to vector<11x8xf32>
    %115 = arith.maximumf %113, %114 : vector<11x8xf32>
    %116 = tpu.concatenate %47, %115, %47 in 0 : vector<1x8xf32>, vector<11x8xf32>, vector<1x8xf32> -> vector<13x8xf32>
    %117 = vector.extract_strided_slice %116 {offsets = [0, 0], sizes = [11, 8], strides = [1, 1]} : vector<13x8xf32> to vector<11x8xf32>
    %cst_88 = arith.constant dense<0.000000e+00> : vector<11x8xf32>
    %118 = tpu.matmul %117, %13, %cst_88 {dimension_numbers = #tpu.dot_dimension_numbers<[1], [0], [0], [1], [0, 0, 1, 1], [], []>} : vector<11x8xf32>, vector<8x8xf32>, vector<11x8xf32> -> vector<11x8xf32>
    %119 = vector.extract_strided_slice %116 {offsets = [1, 0], sizes = [11, 8], strides = [1, 1]} : vector<13x8xf32> to vector<11x8xf32>
    %cst_89 = arith.constant dense<0.000000e+00> : vector<11x8xf32>
    %120 = tpu.matmul %119, %15, %cst_89 {dimension_numbers = #tpu.dot_dimension_numbers<[1], [0], [0], [1], [0, 0, 1, 1], [], []>} : vector<11x8xf32>, vector<8x8xf32>, vector<11x8xf32> -> vector<11x8xf32>
    %121 = arith.addf %118, %120 : vector<11x8xf32>
    %122 = vector.extract_strided_slice %116 {offsets = [2, 0], sizes = [11, 8], strides = [1, 1]} : vector<13x8xf32> to vector<11x8xf32>
    %cst_90 = arith.constant dense<0.000000e+00> : vector<11x8xf32>
    %123 = tpu.matmul %122, %17, %cst_90 {dimension_numbers = #tpu.dot_dimension_numbers<[1], [0], [0], [1], [0, 0, 1, 1], [], []>} : vector<11x8xf32>, vector<8x8xf32>, vector<11x8xf32> -> vector<11x8xf32>
    %124 = arith.addf %121, %123 : vector<11x8xf32>
    %125 = vector.broadcast %19 : vector<1x8xf32> to vector<11x8xf32>
    %126 = arith.addf %124, %125 : vector<11x8xf32>
    %cst_91 = arith.constant 0.000000e+00 : f32
    %127 = vector.broadcast %cst_91 : f32 to vector<11x8xf32>
    %128 = arith.maximumf %126, %127 : vector<11x8xf32>
    %129 = arith.addf %115, %128 : vector<11x8xf32>
    %cst_92 = arith.constant dense<0xFF800000> : vector<8xf32>
    %130 = vector.multi_reduction <maximumf>, %129, %cst_92 [0] : vector<11x8xf32> to vector<8xf32>
    %131 = vector.shape_cast %130 : vector<8xf32> to vector<1x8xf32>
    %132 = vector.extract_strided_slice %48 {offsets = [0, 0], sizes = [12, 8], strides = [1, 1]} : vector<16x8xf32> to vector<12x8xf32>
    %cst_93 = arith.constant dense<0.000000e+00> : vector<12x8xf32>
    %133 = tpu.matmul %132, %35, %cst_93 {dimension_numbers = #tpu.dot_dimension_numbers<[1], [0], [0], [1], [0, 0, 1, 1], [], []>} : vector<12x8xf32>, vector<8x8xf32>, vector<12x8xf32> -> vector<12x8xf32>
    %134 = vector.extract_strided_slice %48 {offsets = [1, 0], sizes = [12, 8], strides = [1, 1]} : vector<16x8xf32> to vector<12x8xf32>
    %cst_94 = arith.constant dense<0.000000e+00> : vector<12x8xf32>
    %135 = tpu.matmul %134, %37, %cst_94 {dimension_numbers = #tpu.dot_dimension_numbers<[1], [0], [0], [1], [0, 0, 1, 1], [], []>} : vector<12x8xf32>, vector<8x8xf32>, vector<12x8xf32> -> vector<12x8xf32>
    %136 = arith.addf %133, %135 : vector<12x8xf32>
    %137 = vector.extract_strided_slice %48 {offsets = [2, 0], sizes = [12, 8], strides = [1, 1]} : vector<16x8xf32> to vector<12x8xf32>
    %cst_95 = arith.constant dense<0.000000e+00> : vector<12x8xf32>
    %138 = tpu.matmul %137, %39, %cst_95 {dimension_numbers = #tpu.dot_dimension_numbers<[1], [0], [0], [1], [0, 0, 1, 1], [], []>} : vector<12x8xf32>, vector<8x8xf32>, vector<12x8xf32> -> vector<12x8xf32>
    %139 = arith.addf %136, %138 : vector<12x8xf32>
    %140 = vector.extract_strided_slice %48 {offsets = [3, 0], sizes = [12, 8], strides = [1, 1]} : vector<16x8xf32> to vector<12x8xf32>
    %cst_96 = arith.constant dense<0.000000e+00> : vector<12x8xf32>
    %141 = tpu.matmul %140, %41, %cst_96 {dimension_numbers = #tpu.dot_dimension_numbers<[1], [0], [0], [1], [0, 0, 1, 1], [], []>} : vector<12x8xf32>, vector<8x8xf32>, vector<12x8xf32> -> vector<12x8xf32>
    %142 = arith.addf %139, %141 : vector<12x8xf32>
    %143 = vector.extract_strided_slice %48 {offsets = [4, 0], sizes = [12, 8], strides = [1, 1]} : vector<16x8xf32> to vector<12x8xf32>
    %cst_97 = arith.constant dense<0.000000e+00> : vector<12x8xf32>
    %144 = tpu.matmul %143, %43, %cst_97 {dimension_numbers = #tpu.dot_dimension_numbers<[1], [0], [0], [1], [0, 0, 1, 1], [], []>} : vector<12x8xf32>, vector<8x8xf32>, vector<12x8xf32> -> vector<12x8xf32>
    %145 = arith.addf %142, %144 : vector<12x8xf32>
    %146 = vector.broadcast %46 : vector<1x8xf32> to vector<12x8xf32>
    %147 = arith.addf %145, %146 : vector<12x8xf32>
    %cst_98 = arith.constant 0.000000e+00 : f32
    %148 = vector.broadcast %cst_98 : f32 to vector<12x8xf32>
    %149 = arith.maximumf %147, %148 : vector<12x8xf32>
    %150 = vector.extract_strided_slice %149 {offsets = [0, 0], sizes = [10, 8], strides = [1, 1]} : vector<12x8xf32> to vector<10x8xf32>
    %cst_99 = arith.constant dense<0.000000e+00> : vector<10x8xf32>
    %151 = tpu.matmul %150, %7, %cst_99 {dimension_numbers = #tpu.dot_dimension_numbers<[1], [0], [0], [1], [0, 0, 1, 1], [], []>} : vector<10x8xf32>, vector<8x8xf32>, vector<10x8xf32> -> vector<10x8xf32>
    %152 = vector.extract_strided_slice %149 {offsets = [1, 0], sizes = [10, 8], strides = [1, 1]} : vector<12x8xf32> to vector<10x8xf32>
    %cst_100 = arith.constant dense<0.000000e+00> : vector<10x8xf32>
    %153 = tpu.matmul %152, %9, %cst_100 {dimension_numbers = #tpu.dot_dimension_numbers<[1], [0], [0], [1], [0, 0, 1, 1], [], []>} : vector<10x8xf32>, vector<8x8xf32>, vector<10x8xf32> -> vector<10x8xf32>
    %154 = arith.addf %151, %153 : vector<10x8xf32>
    %155 = vector.extract_strided_slice %149 {offsets = [2, 0], sizes = [10, 8], strides = [1, 1]} : vector<12x8xf32> to vector<10x8xf32>
    %cst_101 = arith.constant dense<0.000000e+00> : vector<10x8xf32>
    %156 = tpu.matmul %155, %11, %cst_101 {dimension_numbers = #tpu.dot_dimension_numbers<[1], [0], [0], [1], [0, 0, 1, 1], [], []>} : vector<10x8xf32>, vector<8x8xf32>, vector<10x8xf32> -> vector<10x8xf32>
    %157 = arith.addf %154, %156 : vector<10x8xf32>
    %158 = vector.broadcast %18 : vector<1x8xf32> to vector<10x8xf32>
    %159 = arith.addf %157, %158 : vector<10x8xf32>
    %cst_102 = arith.constant 0.000000e+00 : f32
    %160 = vector.broadcast %cst_102 : f32 to vector<10x8xf32>
    %161 = arith.maximumf %159, %160 : vector<10x8xf32>
    %162 = tpu.concatenate %47, %161, %47 in 0 : vector<1x8xf32>, vector<10x8xf32>, vector<1x8xf32> -> vector<12x8xf32>
    %163 = vector.extract_strided_slice %162 {offsets = [0, 0], sizes = [10, 8], strides = [1, 1]} : vector<12x8xf32> to vector<10x8xf32>
    %cst_103 = arith.constant dense<0.000000e+00> : vector<10x8xf32>
    %164 = tpu.matmul %163, %13, %cst_103 {dimension_numbers = #tpu.dot_dimension_numbers<[1], [0], [0], [1], [0, 0, 1, 1], [], []>} : vector<10x8xf32>, vector<8x8xf32>, vector<10x8xf32> -> vector<10x8xf32>
    %165 = vector.extract_strided_slice %162 {offsets = [1, 0], sizes = [10, 8], strides = [1, 1]} : vector<12x8xf32> to vector<10x8xf32>
    %cst_104 = arith.constant dense<0.000000e+00> : vector<10x8xf32>
    %166 = tpu.matmul %165, %15, %cst_104 {dimension_numbers = #tpu.dot_dimension_numbers<[1], [0], [0], [1], [0, 0, 1, 1], [], []>} : vector<10x8xf32>, vector<8x8xf32>, vector<10x8xf32> -> vector<10x8xf32>
    %167 = arith.addf %164, %166 : vector<10x8xf32>
    %168 = vector.extract_strided_slice %162 {offsets = [2, 0], sizes = [10, 8], strides = [1, 1]} : vector<12x8xf32> to vector<10x8xf32>
    %cst_105 = arith.constant dense<0.000000e+00> : vector<10x8xf32>
    %169 = tpu.matmul %168, %17, %cst_105 {dimension_numbers = #tpu.dot_dimension_numbers<[1], [0], [0], [1], [0, 0, 1, 1], [], []>} : vector<10x8xf32>, vector<8x8xf32>, vector<10x8xf32> -> vector<10x8xf32>
    %170 = arith.addf %167, %169 : vector<10x8xf32>
    %171 = vector.broadcast %19 : vector<1x8xf32> to vector<10x8xf32>
    %172 = arith.addf %170, %171 : vector<10x8xf32>
    %cst_106 = arith.constant 0.000000e+00 : f32
    %173 = vector.broadcast %cst_106 : f32 to vector<10x8xf32>
    %174 = arith.maximumf %172, %173 : vector<10x8xf32>
    %175 = arith.addf %161, %174 : vector<10x8xf32>
    %cst_107 = arith.constant dense<0xFF800000> : vector<8xf32>
    %176 = vector.multi_reduction <maximumf>, %175, %cst_107 [0] : vector<10x8xf32> to vector<8xf32>
    %177 = vector.shape_cast %176 : vector<8xf32> to vector<1x8xf32>
    %178 = tpu.concatenate %88, %131, %177 in 1 : vector<1x8xf32>, vector<1x8xf32>, vector<1x8xf32> -> vector<1x24xf32>
    %179 = vector.extract_strided_slice %5 {offsets = [16, 0], sizes = [16, 8], strides = [1, 1]} : vector<32x8xf32> to vector<16x8xf32>
    %180 = vector.extract_strided_slice %179 {offsets = [0, 0], sizes = [14, 8], strides = [1, 1]} : vector<16x8xf32> to vector<14x8xf32>
    %cst_108 = arith.constant dense<0.000000e+00> : vector<14x8xf32>
    %181 = tpu.matmul %180, %21, %cst_108 {dimension_numbers = #tpu.dot_dimension_numbers<[1], [0], [0], [1], [0, 0, 1, 1], [], []>} : vector<14x8xf32>, vector<8x8xf32>, vector<14x8xf32> -> vector<14x8xf32>
    %182 = vector.extract_strided_slice %179 {offsets = [1, 0], sizes = [14, 8], strides = [1, 1]} : vector<16x8xf32> to vector<14x8xf32>
    %cst_109 = arith.constant dense<0.000000e+00> : vector<14x8xf32>
    %183 = tpu.matmul %182, %23, %cst_109 {dimension_numbers = #tpu.dot_dimension_numbers<[1], [0], [0], [1], [0, 0, 1, 1], [], []>} : vector<14x8xf32>, vector<8x8xf32>, vector<14x8xf32> -> vector<14x8xf32>
    %184 = arith.addf %181, %183 : vector<14x8xf32>
    %185 = vector.extract_strided_slice %179 {offsets = [2, 0], sizes = [14, 8], strides = [1, 1]} : vector<16x8xf32> to vector<14x8xf32>
    %cst_110 = arith.constant dense<0.000000e+00> : vector<14x8xf32>
    %186 = tpu.matmul %185, %25, %cst_110 {dimension_numbers = #tpu.dot_dimension_numbers<[1], [0], [0], [1], [0, 0, 1, 1], [], []>} : vector<14x8xf32>, vector<8x8xf32>, vector<14x8xf32> -> vector<14x8xf32>
    %187 = arith.addf %184, %186 : vector<14x8xf32>
    %188 = vector.broadcast %44 : vector<1x8xf32> to vector<14x8xf32>
    %189 = arith.addf %187, %188 : vector<14x8xf32>
    %cst_111 = arith.constant 0.000000e+00 : f32
    %190 = vector.broadcast %cst_111 : f32 to vector<14x8xf32>
    %191 = arith.maximumf %189, %190 : vector<14x8xf32>
    %192 = vector.extract_strided_slice %191 {offsets = [0, 0], sizes = [12, 8], strides = [1, 1]} : vector<14x8xf32> to vector<12x8xf32>
    %cst_112 = arith.constant dense<0.000000e+00> : vector<12x8xf32>
    %193 = tpu.matmul %192, %7, %cst_112 {dimension_numbers = #tpu.dot_dimension_numbers<[1], [0], [0], [1], [0, 0, 1, 1], [], []>} : vector<12x8xf32>, vector<8x8xf32>, vector<12x8xf32> -> vector<12x8xf32>
    %194 = vector.extract_strided_slice %191 {offsets = [1, 0], sizes = [12, 8], strides = [1, 1]} : vector<14x8xf32> to vector<12x8xf32>
    %cst_113 = arith.constant dense<0.000000e+00> : vector<12x8xf32>
    %195 = tpu.matmul %194, %9, %cst_113 {dimension_numbers = #tpu.dot_dimension_numbers<[1], [0], [0], [1], [0, 0, 1, 1], [], []>} : vector<12x8xf32>, vector<8x8xf32>, vector<12x8xf32> -> vector<12x8xf32>
    %196 = arith.addf %193, %195 : vector<12x8xf32>
    %197 = vector.extract_strided_slice %191 {offsets = [2, 0], sizes = [12, 8], strides = [1, 1]} : vector<14x8xf32> to vector<12x8xf32>
    %cst_114 = arith.constant dense<0.000000e+00> : vector<12x8xf32>
    %198 = tpu.matmul %197, %11, %cst_114 {dimension_numbers = #tpu.dot_dimension_numbers<[1], [0], [0], [1], [0, 0, 1, 1], [], []>} : vector<12x8xf32>, vector<8x8xf32>, vector<12x8xf32> -> vector<12x8xf32>
    %199 = arith.addf %196, %198 : vector<12x8xf32>
    %200 = vector.broadcast %18 : vector<1x8xf32> to vector<12x8xf32>
    %201 = arith.addf %199, %200 : vector<12x8xf32>
    %cst_115 = arith.constant 0.000000e+00 : f32
    %202 = vector.broadcast %cst_115 : f32 to vector<12x8xf32>
    %203 = arith.maximumf %201, %202 : vector<12x8xf32>
    %204 = tpu.concatenate %47, %203, %47 in 0 : vector<1x8xf32>, vector<12x8xf32>, vector<1x8xf32> -> vector<14x8xf32>
    %205 = vector.extract_strided_slice %204 {offsets = [0, 0], sizes = [12, 8], strides = [1, 1]} : vector<14x8xf32> to vector<12x8xf32>
    %cst_116 = arith.constant dense<0.000000e+00> : vector<12x8xf32>
    %206 = tpu.matmul %205, %13, %cst_116 {dimension_numbers = #tpu.dot_dimension_numbers<[1], [0], [0], [1], [0, 0, 1, 1], [], []>} : vector<12x8xf32>, vector<8x8xf32>, vector<12x8xf32> -> vector<12x8xf32>
    %207 = vector.extract_strided_slice %204 {offsets = [1, 0], sizes = [12, 8], strides = [1, 1]} : vector<14x8xf32> to vector<12x8xf32>
    %cst_117 = arith.constant dense<0.000000e+00> : vector<12x8xf32>
    %208 = tpu.matmul %207, %15, %cst_117 {dimension_numbers = #tpu.dot_dimension_numbers<[1], [0], [0], [1], [0, 0, 1, 1], [], []>} : vector<12x8xf32>, vector<8x8xf32>, vector<12x8xf32> -> vector<12x8xf32>
    %209 = arith.addf %206, %208 : vector<12x8xf32>
    %210 = vector.extract_strided_slice %204 {offsets = [2, 0], sizes = [12, 8], strides = [1, 1]} : vector<14x8xf32> to vector<12x8xf32>
    %cst_118 = arith.constant dense<0.000000e+00> : vector<12x8xf32>
    %211 = tpu.matmul %210, %17, %cst_118 {dimension_numbers = #tpu.dot_dimension_numbers<[1], [0], [0], [1], [0, 0, 1, 1], [], []>} : vector<12x8xf32>, vector<8x8xf32>, vector<12x8xf32> -> vector<12x8xf32>
    %212 = arith.addf %209, %211 : vector<12x8xf32>
    %213 = vector.broadcast %19 : vector<1x8xf32> to vector<12x8xf32>
    %214 = arith.addf %212, %213 : vector<12x8xf32>
    %cst_119 = arith.constant 0.000000e+00 : f32
    %215 = vector.broadcast %cst_119 : f32 to vector<12x8xf32>
    %216 = arith.maximumf %214, %215 : vector<12x8xf32>
    %217 = arith.addf %203, %216 : vector<12x8xf32>
    %cst_120 = arith.constant dense<0xFF800000> : vector<8xf32>
    %218 = vector.multi_reduction <maximumf>, %217, %cst_120 [0] : vector<12x8xf32> to vector<8xf32>
    %219 = vector.shape_cast %218 : vector<8xf32> to vector<1x8xf32>
    %220 = vector.extract_strided_slice %179 {offsets = [0, 0], sizes = [13, 8], strides = [1, 1]} : vector<16x8xf32> to vector<13x8xf32>
    %cst_121 = arith.constant dense<0.000000e+00> : vector<13x8xf32>
    %221 = tpu.matmul %220, %27, %cst_121 {dimension_numbers = #tpu.dot_dimension_numbers<[1], [0], [0], [1], [0, 0, 1, 1], [], []>} : vector<13x8xf32>, vector<8x8xf32>, vector<13x8xf32> -> vector<13x8xf32>
    %222 = vector.extract_strided_slice %179 {offsets = [1, 0], sizes = [13, 8], strides = [1, 1]} : vector<16x8xf32> to vector<13x8xf32>
    %cst_122 = arith.constant dense<0.000000e+00> : vector<13x8xf32>
    %223 = tpu.matmul %222, %29, %cst_122 {dimension_numbers = #tpu.dot_dimension_numbers<[1], [0], [0], [1], [0, 0, 1, 1], [], []>} : vector<13x8xf32>, vector<8x8xf32>, vector<13x8xf32> -> vector<13x8xf32>
    %224 = arith.addf %221, %223 : vector<13x8xf32>
    %225 = vector.extract_strided_slice %179 {offsets = [2, 0], sizes = [13, 8], strides = [1, 1]} : vector<16x8xf32> to vector<13x8xf32>
    %cst_123 = arith.constant dense<0.000000e+00> : vector<13x8xf32>
    %226 = tpu.matmul %225, %31, %cst_123 {dimension_numbers = #tpu.dot_dimension_numbers<[1], [0], [0], [1], [0, 0, 1, 1], [], []>} : vector<13x8xf32>, vector<8x8xf32>, vector<13x8xf32> -> vector<13x8xf32>
    %227 = arith.addf %224, %226 : vector<13x8xf32>
    %228 = vector.extract_strided_slice %179 {offsets = [3, 0], sizes = [13, 8], strides = [1, 1]} : vector<16x8xf32> to vector<13x8xf32>
    %cst_124 = arith.constant dense<0.000000e+00> : vector<13x8xf32>
    %229 = tpu.matmul %228, %33, %cst_124 {dimension_numbers = #tpu.dot_dimension_numbers<[1], [0], [0], [1], [0, 0, 1, 1], [], []>} : vector<13x8xf32>, vector<8x8xf32>, vector<13x8xf32> -> vector<13x8xf32>
    %230 = arith.addf %227, %229 : vector<13x8xf32>
    %231 = vector.broadcast %45 : vector<1x8xf32> to vector<13x8xf32>
    %232 = arith.addf %230, %231 : vector<13x8xf32>
    %cst_125 = arith.constant 0.000000e+00 : f32
    %233 = vector.broadcast %cst_125 : f32 to vector<13x8xf32>
    %234 = arith.maximumf %232, %233 : vector<13x8xf32>
    %235 = vector.extract_strided_slice %234 {offsets = [0, 0], sizes = [11, 8], strides = [1, 1]} : vector<13x8xf32> to vector<11x8xf32>
    %cst_126 = arith.constant dense<0.000000e+00> : vector<11x8xf32>
    %236 = tpu.matmul %235, %7, %cst_126 {dimension_numbers = #tpu.dot_dimension_numbers<[1], [0], [0], [1], [0, 0, 1, 1], [], []>} : vector<11x8xf32>, vector<8x8xf32>, vector<11x8xf32> -> vector<11x8xf32>
    %237 = vector.extract_strided_slice %234 {offsets = [1, 0], sizes = [11, 8], strides = [1, 1]} : vector<13x8xf32> to vector<11x8xf32>
    %cst_127 = arith.constant dense<0.000000e+00> : vector<11x8xf32>
    %238 = tpu.matmul %237, %9, %cst_127 {dimension_numbers = #tpu.dot_dimension_numbers<[1], [0], [0], [1], [0, 0, 1, 1], [], []>} : vector<11x8xf32>, vector<8x8xf32>, vector<11x8xf32> -> vector<11x8xf32>
    %239 = arith.addf %236, %238 : vector<11x8xf32>
    %240 = vector.extract_strided_slice %234 {offsets = [2, 0], sizes = [11, 8], strides = [1, 1]} : vector<13x8xf32> to vector<11x8xf32>
    %cst_128 = arith.constant dense<0.000000e+00> : vector<11x8xf32>
    %241 = tpu.matmul %240, %11, %cst_128 {dimension_numbers = #tpu.dot_dimension_numbers<[1], [0], [0], [1], [0, 0, 1, 1], [], []>} : vector<11x8xf32>, vector<8x8xf32>, vector<11x8xf32> -> vector<11x8xf32>
    %242 = arith.addf %239, %241 : vector<11x8xf32>
    %243 = vector.broadcast %18 : vector<1x8xf32> to vector<11x8xf32>
    %244 = arith.addf %242, %243 : vector<11x8xf32>
    %cst_129 = arith.constant 0.000000e+00 : f32
    %245 = vector.broadcast %cst_129 : f32 to vector<11x8xf32>
    %246 = arith.maximumf %244, %245 : vector<11x8xf32>
    %247 = tpu.concatenate %47, %246, %47 in 0 : vector<1x8xf32>, vector<11x8xf32>, vector<1x8xf32> -> vector<13x8xf32>
    %248 = vector.extract_strided_slice %247 {offsets = [0, 0], sizes = [11, 8], strides = [1, 1]} : vector<13x8xf32> to vector<11x8xf32>
    %cst_130 = arith.constant dense<0.000000e+00> : vector<11x8xf32>
    %249 = tpu.matmul %248, %13, %cst_130 {dimension_numbers = #tpu.dot_dimension_numbers<[1], [0], [0], [1], [0, 0, 1, 1], [], []>} : vector<11x8xf32>, vector<8x8xf32>, vector<11x8xf32> -> vector<11x8xf32>
    %250 = vector.extract_strided_slice %247 {offsets = [1, 0], sizes = [11, 8], strides = [1, 1]} : vector<13x8xf32> to vector<11x8xf32>
    %cst_131 = arith.constant dense<0.000000e+00> : vector<11x8xf32>
    %251 = tpu.matmul %250, %15, %cst_131 {dimension_numbers = #tpu.dot_dimension_numbers<[1], [0], [0], [1], [0, 0, 1, 1], [], []>} : vector<11x8xf32>, vector<8x8xf32>, vector<11x8xf32> -> vector<11x8xf32>
    %252 = arith.addf %249, %251 : vector<11x8xf32>
    %253 = vector.extract_strided_slice %247 {offsets = [2, 0], sizes = [11, 8], strides = [1, 1]} : vector<13x8xf32> to vector<11x8xf32>
    %cst_132 = arith.constant dense<0.000000e+00> : vector<11x8xf32>
    %254 = tpu.matmul %253, %17, %cst_132 {dimension_numbers = #tpu.dot_dimension_numbers<[1], [0], [0], [1], [0, 0, 1, 1], [], []>} : vector<11x8xf32>, vector<8x8xf32>, vector<11x8xf32> -> vector<11x8xf32>
    %255 = arith.addf %252, %254 : vector<11x8xf32>
    %256 = vector.broadcast %19 : vector<1x8xf32> to vector<11x8xf32>
    %257 = arith.addf %255, %256 : vector<11x8xf32>
    %cst_133 = arith.constant 0.000000e+00 : f32
    %258 = vector.broadcast %cst_133 : f32 to vector<11x8xf32>
    %259 = arith.maximumf %257, %258 : vector<11x8xf32>
    %260 = arith.addf %246, %259 : vector<11x8xf32>
    %cst_134 = arith.constant dense<0xFF800000> : vector<8xf32>
    %261 = vector.multi_reduction <maximumf>, %260, %cst_134 [0] : vector<11x8xf32> to vector<8xf32>
    %262 = vector.shape_cast %261 : vector<8xf32> to vector<1x8xf32>
    %263 = vector.extract_strided_slice %179 {offsets = [0, 0], sizes = [12, 8], strides = [1, 1]} : vector<16x8xf32> to vector<12x8xf32>
    %cst_135 = arith.constant dense<0.000000e+00> : vector<12x8xf32>
    %264 = tpu.matmul %263, %35, %cst_135 {dimension_numbers = #tpu.dot_dimension_numbers<[1], [0], [0], [1], [0, 0, 1, 1], [], []>} : vector<12x8xf32>, vector<8x8xf32>, vector<12x8xf32> -> vector<12x8xf32>
    %265 = vector.extract_strided_slice %179 {offsets = [1, 0], sizes = [12, 8], strides = [1, 1]} : vector<16x8xf32> to vector<12x8xf32>
    %cst_136 = arith.constant dense<0.000000e+00> : vector<12x8xf32>
    %266 = tpu.matmul %265, %37, %cst_136 {dimension_numbers = #tpu.dot_dimension_numbers<[1], [0], [0], [1], [0, 0, 1, 1], [], []>} : vector<12x8xf32>, vector<8x8xf32>, vector<12x8xf32> -> vector<12x8xf32>
    %267 = arith.addf %264, %266 : vector<12x8xf32>
    %268 = vector.extract_strided_slice %179 {offsets = [2, 0], sizes = [12, 8], strides = [1, 1]} : vector<16x8xf32> to vector<12x8xf32>
    %cst_137 = arith.constant dense<0.000000e+00> : vector<12x8xf32>
    %269 = tpu.matmul %268, %39, %cst_137 {dimension_numbers = #tpu.dot_dimension_numbers<[1], [0], [0], [1], [0, 0, 1, 1], [], []>} : vector<12x8xf32>, vector<8x8xf32>, vector<12x8xf32> -> vector<12x8xf32>
    %270 = arith.addf %267, %269 : vector<12x8xf32>
    %271 = vector.extract_strided_slice %179 {offsets = [3, 0], sizes = [12, 8], strides = [1, 1]} : vector<16x8xf32> to vector<12x8xf32>
    %cst_138 = arith.constant dense<0.000000e+00> : vector<12x8xf32>
    %272 = tpu.matmul %271, %41, %cst_138 {dimension_numbers = #tpu.dot_dimension_numbers<[1], [0], [0], [1], [0, 0, 1, 1], [], []>} : vector<12x8xf32>, vector<8x8xf32>, vector<12x8xf32> -> vector<12x8xf32>
    %273 = arith.addf %270, %272 : vector<12x8xf32>
    %274 = vector.extract_strided_slice %179 {offsets = [4, 0], sizes = [12, 8], strides = [1, 1]} : vector<16x8xf32> to vector<12x8xf32>
    %cst_139 = arith.constant dense<0.000000e+00> : vector<12x8xf32>
    %275 = tpu.matmul %274, %43, %cst_139 {dimension_numbers = #tpu.dot_dimension_numbers<[1], [0], [0], [1], [0, 0, 1, 1], [], []>} : vector<12x8xf32>, vector<8x8xf32>, vector<12x8xf32> -> vector<12x8xf32>
    %276 = arith.addf %273, %275 : vector<12x8xf32>
    %277 = vector.broadcast %46 : vector<1x8xf32> to vector<12x8xf32>
    %278 = arith.addf %276, %277 : vector<12x8xf32>
    %cst_140 = arith.constant 0.000000e+00 : f32
    %279 = vector.broadcast %cst_140 : f32 to vector<12x8xf32>
    %280 = arith.maximumf %278, %279 : vector<12x8xf32>
    %281 = vector.extract_strided_slice %280 {offsets = [0, 0], sizes = [10, 8], strides = [1, 1]} : vector<12x8xf32> to vector<10x8xf32>
    %cst_141 = arith.constant dense<0.000000e+00> : vector<10x8xf32>
    %282 = tpu.matmul %281, %7, %cst_141 {dimension_numbers = #tpu.dot_dimension_numbers<[1], [0], [0], [1], [0, 0, 1, 1], [], []>} : vector<10x8xf32>, vector<8x8xf32>, vector<10x8xf32> -> vector<10x8xf32>
    %283 = vector.extract_strided_slice %280 {offsets = [1, 0], sizes = [10, 8], strides = [1, 1]} : vector<12x8xf32> to vector<10x8xf32>
    %cst_142 = arith.constant dense<0.000000e+00> : vector<10x8xf32>
    %284 = tpu.matmul %283, %9, %cst_142 {dimension_numbers = #tpu.dot_dimension_numbers<[1], [0], [0], [1], [0, 0, 1, 1], [], []>} : vector<10x8xf32>, vector<8x8xf32>, vector<10x8xf32> -> vector<10x8xf32>
    %285 = arith.addf %282, %284 : vector<10x8xf32>
    %286 = vector.extract_strided_slice %280 {offsets = [2, 0], sizes = [10, 8], strides = [1, 1]} : vector<12x8xf32> to vector<10x8xf32>
    %cst_143 = arith.constant dense<0.000000e+00> : vector<10x8xf32>
    %287 = tpu.matmul %286, %11, %cst_143 {dimension_numbers = #tpu.dot_dimension_numbers<[1], [0], [0], [1], [0, 0, 1, 1], [], []>} : vector<10x8xf32>, vector<8x8xf32>, vector<10x8xf32> -> vector<10x8xf32>
    %288 = arith.addf %285, %287 : vector<10x8xf32>
    %289 = vector.broadcast %18 : vector<1x8xf32> to vector<10x8xf32>
    %290 = arith.addf %288, %289 : vector<10x8xf32>
    %cst_144 = arith.constant 0.000000e+00 : f32
    %291 = vector.broadcast %cst_144 : f32 to vector<10x8xf32>
    %292 = arith.maximumf %290, %291 : vector<10x8xf32>
    %293 = tpu.concatenate %47, %292, %47 in 0 : vector<1x8xf32>, vector<10x8xf32>, vector<1x8xf32> -> vector<12x8xf32>
    %294 = vector.extract_strided_slice %293 {offsets = [0, 0], sizes = [10, 8], strides = [1, 1]} : vector<12x8xf32> to vector<10x8xf32>
    %cst_145 = arith.constant dense<0.000000e+00> : vector<10x8xf32>
    %295 = tpu.matmul %294, %13, %cst_145 {dimension_numbers = #tpu.dot_dimension_numbers<[1], [0], [0], [1], [0, 0, 1, 1], [], []>} : vector<10x8xf32>, vector<8x8xf32>, vector<10x8xf32> -> vector<10x8xf32>
    %296 = vector.extract_strided_slice %293 {offsets = [1, 0], sizes = [10, 8], strides = [1, 1]} : vector<12x8xf32> to vector<10x8xf32>
    %cst_146 = arith.constant dense<0.000000e+00> : vector<10x8xf32>
    %297 = tpu.matmul %296, %15, %cst_146 {dimension_numbers = #tpu.dot_dimension_numbers<[1], [0], [0], [1], [0, 0, 1, 1], [], []>} : vector<10x8xf32>, vector<8x8xf32>, vector<10x8xf32> -> vector<10x8xf32>
    %298 = arith.addf %295, %297 : vector<10x8xf32>
    %299 = vector.extract_strided_slice %293 {offsets = [2, 0], sizes = [10, 8], strides = [1, 1]} : vector<12x8xf32> to vector<10x8xf32>
    %cst_147 = arith.constant dense<0.000000e+00> : vector<10x8xf32>
    %300 = tpu.matmul %299, %17, %cst_147 {dimension_numbers = #tpu.dot_dimension_numbers<[1], [0], [0], [1], [0, 0, 1, 1], [], []>} : vector<10x8xf32>, vector<8x8xf32>, vector<10x8xf32> -> vector<10x8xf32>
    %301 = arith.addf %298, %300 : vector<10x8xf32>
    %302 = vector.broadcast %19 : vector<1x8xf32> to vector<10x8xf32>
    %303 = arith.addf %301, %302 : vector<10x8xf32>
    %cst_148 = arith.constant 0.000000e+00 : f32
    %304 = vector.broadcast %cst_148 : f32 to vector<10x8xf32>
    %305 = arith.maximumf %303, %304 : vector<10x8xf32>
    %306 = arith.addf %292, %305 : vector<10x8xf32>
    %cst_149 = arith.constant dense<0xFF800000> : vector<8xf32>
    %307 = vector.multi_reduction <maximumf>, %306, %cst_149 [0] : vector<10x8xf32> to vector<8xf32>
    %308 = vector.shape_cast %307 : vector<8xf32> to vector<1x8xf32>
    %309 = tpu.concatenate %219, %262, %308 in 1 : vector<1x8xf32>, vector<1x8xf32>, vector<1x8xf32> -> vector<1x24xf32>
    %310 = tpu.concatenate %178, %309 in 0 : vector<1x24xf32>, vector<1x24xf32> -> vector<2x24xf32>
    %c0_150 = arith.constant 0 : index
    %c0_151 = arith.constant 0 : index
    %311 = vector.load %arg16[%c0_150, %c0_151] : memref<2x24xf32, #tpu.memory_space<vmem>>, vector<2x24xf32>
    tpu.vector_store %arg16[%c0_150, %c0_151], %310 {strides = array<i32>} : memref<2x24xf32, #tpu.memory_space<vmem>>, vector<2x24xf32>,
    %c0_152 = arith.constant 0 : index
    %c0_153 = arith.constant 0 : index
    %312 = vector.load %arg13[%c0_152, %c0_153] : memref<24x2xf32, #tpu.memory_space<vmem>>, vector<24x2xf32>
    %cst_154 = arith.constant dense<0.000000e+00> : vector<2x2xf32>
    %313 = tpu.matmul %310, %312, %cst_154 {dimension_numbers = #tpu.dot_dimension_numbers<[1], [0], [0], [1], [0, 0, 1, 1], [], []>} : vector<2x24xf32>, vector<24x2xf32>, vector<2x2xf32> -> vector<2x2xf32>
    %c0_155 = arith.constant 0 : index
    %c0_156 = arith.constant 0 : index
    %314 = vector.load %arg14[%c0_155, %c0_156] : memref<1x2xf32, #tpu.memory_space<vmem>>, vector<1x2xf32>
    %315 = vector.broadcast %314 : vector<1x2xf32> to vector<2x2xf32>
    %316 = arith.addf %313, %315 : vector<2x2xf32>
    %c0_157 = arith.constant 0 : index
    %c0_158 = arith.constant 0 : index
    %317 = vector.load %arg15[%c0_157, %c0_158] : memref<2x2xf32, #tpu.memory_space<vmem>>, vector<2x2xf32>
    tpu.vector_store %arg15[%c0_157, %c0_158], %316 {strides = array<i32>} : memref<2x2xf32, #tpu.memory_space<vmem>>, vector<2x2xf32>,
    return
  }
}

</mosaic_0001>

<bundles_post_ra>
// kernel: _lambda_.2
= control target key start
LH: loop header
LB: loop body
LE: loop exit
PB: predicated region body
PF: predicated region fallthrough
CT: control target
= control target key end

     0   :  { %v2361_v3 = vmov 0.0   ;;  %vm41_vm0 = vcmask 261120   ;;  %v31_v38 = vlaneseq  ;;  %vm260_vm1 = vcmask 254976   ;;  %s2897_s2 = inlined_call_operand.vmem [shape: f32[64,256], index: 2, kind: input, shape index: {}]   ;;  %s2898_s1 = inlined_call_operand.vmem [shape: f32[32,256], index: 1, kind: input, shape index: {}]   ;;  %s2899_s0 = inlined_call_operand.vmem [shape: f32[32,32], index: 0, kind: input, shape index: {}]   ;;  %s2900_s3 = inlined_call_operand.vmem [shape: f32[1,256], index: 3, kind: input, shape index: {}]   ;;  %s2901_s4 = inlined_call_operand.vmem [shape: f32[16,2,64], index: 4, kind: output, shape index: {}]  }
   0x1   :  { %v144_v0 = vld [vmem:[%s2897_s2 + $0x8] sm:$0xff]  ;;  %v146_v1 = vld [vmem:[%s2897_s2 + $0x18] sm:$0xff]  ;;  %v143_v2 = vld [vmem:[%s2897_s2] sm:$0xff]  ;;  %118 = vmatprep.mubr.f32.mxu0 %v2361_v3  ;;  %227 = vmatprep.mubr.f32.mxu1 %v2361_v3  ;;  %vm263_vm2 = vcmask 517376   ;;  %vm159_vm3 = vcmask 523264  }
   0x2   :  { %v2399_v4 = vpack.c.bf16 %v146_v1, %v144_v0  ;;  %v145_v5 = vld [vmem:[%s2897_s2 + $0x10] sm:$0xff]  ;;  %v148_v6 = vld [vmem:[%s2897_s2 + $0x28] sm:$0xff]  ;;  %v150_v7 = vld [vmem:[%s2897_s2 + $0x38] sm:$0xff]  ;;  %v32_v39 = vshrl.u32 %v31_v38, 7 }
   0x3   :  { %v2410_v8 = vpack.c.bf16 %v145_v5, %v143_v2  ;;  %v2412_v9 = vpack.c.bf16 %v150_v7, %v148_v6  ;;  %v22_v10 = vld [vmem:[%s2898_s1 + $0x8] sm:$0xff]  ;;  %v24_v11 = vld [vmem:[%s2898_s1 + $0x18] sm:$0xff]  ;;  %v147_v12 = vld [vmem:[%s2897_s2 + $0x20] sm:$0xff] }
   0x4   :  { %1912 = vmatprep.subr.bf16.mxu1 %v2399_v4  ;;  %v1903_v13 = vpack.c.bf16 %v24_v11, %v22_v10  ;;  %v149_v14 = vld [vmem:[%s2897_s2 + $0x30] sm:$0xff]  ;;  %v21_v15 = vld [vmem:[%s2898_s1] sm:$0xff]  ;;  %v152_v19 = vld [vmem:[%s2897_s2 + $0x48] sm:$0xff]  ;;  %v33_v40 = vsub.s32 0, %v32_v39  ;;  %v37_v42 = vsub.s32 1, %v32_v39 }
   0x5   :  { %v23_v16 = vld [vmem:[%s2898_s1 + $0x10] sm:$0xff]  ;;  %1914 = vmatpush1.bf16.msra.mxu1 %v2410_v8  ;;  %v2434_v17 = vpack.c.bf16 %v149_v14, %v147_v12  ;;  %v154_v20 = vld [vmem:[%s2897_s2 + $0x58] sm:$0xff]  ;;  %v26_v21 = vld [vmem:[%s2898_s1 + $0x28] sm:$0xff] }
   0x6   :  { %v1905_v18 = vpack.c.bf16 %v23_v16, %v21_v15  ;;  %1916 = vmatprep.subr.bf16.mxu1 %v2412_v9  ;;  %1904 = vmatprep.subr.bf16.mxu0 %v1903_v13  ;;  %v2446_v22 = vpack.c.bf16 %v154_v20, %v152_v19  ;;  %v28_v23 = vld [vmem:[%s2898_s1 + $0x38] sm:$0xff]  ;;  %v151_v24 = vld [vmem:[%s2897_s2 + $0x40] sm:$0xff]  ;;  %v153_v25 = vld [vmem:[%s2897_s2 + $0x50] sm:$0xff] }
   0x7   :  { %v1907_v26 = vpack.c.bf16 %v28_v23, %v26_v21  ;;  %v25_v27 = vld [vmem:[%s2898_s1 + $0x20] sm:$0xff]  ;;  %v27_v28 = vld [vmem:[%s2898_s1 + $0x30] sm:$0xff]  ;;  %v156_v29 = vld [vmem:[%s2897_s2 + $0x68] sm:$0xff]  ;;  %v2470_v32 = vpack.c.bf16 %v153_v25, %v151_v24 }
   0x8   :  { %1906 = vmatpush1.bf16.msra.mxu0 %v1905_v18  ;;  %v1909_v30 = vpack.c.bf16 %v27_v28, %v25_v27  ;;  %v158_v31 = vld [vmem:[%s2897_s2 + $0x78] sm:$0xff]  ;;  %v155_v34 = vld [vmem:[%s2897_s2 + $0x60] sm:$0xff]  ;;  %v157_v35 = vld [vmem:[%s2897_s2 + $0x70] sm:$0xff] }
   0x9   :  { %1918 = vmatpush1.bf16.msra.mxu1 %v2434_v17  ;;  %1908 = vmatprep.subr.bf16.mxu0 %v1907_v26  ;;  %v2473_v33 = vpack.c.bf16 %v158_v31, %v156_v29  ;;  %v17_v36 = vld [vmem:[%s2899_s0] sm:$0xff]  ;;  %v2486_v37 = vpack.c.bf16 %v157_v35, %v155_v34  ;;  %v18_v60 = vld [vmem:[%s2899_s0 + $0x8] sm:$0xff]  ;;  %v19_v61 = vld [vmem:[%s2899_s0 + $0x10] sm:$0xff] }
   0xa   :  { %1920 = vmatprep.subr.bf16.mxu1 %v2446_v22  ;;  %v29_v41 = vld [vmem:[%s2900_s3] sm:$0x3]  ;;  %s2362_s3 = smov 64   ;;  %v20_v62 = vld [vmem:[%s2899_s0 + $0x18] sm:$0xff] }
   0xb   :  { %v2514_v43 = vrot.slane %v29_v41, %v33_v40  ;;  %v2516_v45 = vrot.slane %v29_v41, %v37_v42 }
   0xc   :  { %1910 = vmatpush1.bf16.msra.mxu0 %v1909_v30 }
   0xd   :  { %1928 = vmatprep.subr.bf16.mxu0 %v2399_v4  ;;  %1922 = vmatpush1.bf16.msra.mxu1 %v2470_v32 }
   0xe   :  { %1924 = vmatprep.subr.bf16.mxu1 %v2473_v33 }
   0xf   :  { %1854 = vmatmul.mubr.msk.f32.vlgmr.msra.gmra.mrb[0].mxu0 %vm41_vm0, %v17_v36 }
  0x10   :  { %1930 = vmatpush1.bf16.msra.mxu0 %v2410_v8  ;;  %124 = vmatprep.mubr.f32.mxu0 %v2361_v3 }
  0x11   :  { %1932 = vmatprep.subr.bf16.mxu0 %v2412_v9  ;;  %1926 = vmatpush1.bf16.msra.mxu1 %v2486_v37 }
  0x12   :  { %1944 = vmatprep.subr.bf16.mxu1 %v2399_v4 }
  0x13   :  { %1855 = vmatmul.mubr.msk.f32.gmra.mrb[2].mxu0 %vm41_vm0, %v18_v60 }
  0x14   :  { %1934 = vmatpush1.bf16.msra.mxu0 %v2434_v17  ;;  %228 = vmatmul.mubr.f32.vlgmr.msra.gmra.mrb[0].mxu1 %v2361_v3 }
  0x15   :  { %1936 = vmatprep.subr.bf16.mxu0 %v2446_v22  ;;  %1946 = vmatpush1.bf16.msra.mxu1 %v2410_v8 }
  0x16   :  { %444 = vmatprep.mubr.f32.mxu1 %v2361_v3  ;;  %1948 = vmatprep.subr.bf16.mxu1 %v2412_v9 }
  0x17   :  { %130 = vmatprep.mubr.f32.mxu0 %v2361_v3 }
  0x18   :  { %1938 = vmatpush1.bf16.msra.mxu0 %v2470_v32 }
  0x19   :  { %1940 = vmatprep.subr.bf16.mxu0 %v2473_v33  ;;  %1950 = vmatpush1.bf16.msra.mxu1 %v2434_v17 }
  0x1a   :  { %1952 = vmatprep.subr.bf16.mxu1 %v2446_v22  ;;  %1856 = vmatmul.mubr.msk.f32.gmra.mrb[4].mxu0 %vm41_vm0, %v19_v61 }
  0x1b   :  { %136 = vmatprep.mubr.f32.mxu0 %v2361_v3 }
  0x1c   :  { %1942 = vmatpush1.bf16.msra.mxu0 %v2486_v37 }
  0x1d   :  { %1960 = vmatprep.subr.bf16.mxu0 %v2399_v4  ;;  %1954 = vmatpush1.bf16.msra.mxu1 %v2470_v32 }
  0x1e   :  { %1956 = vmatprep.subr.bf16.mxu1 %v2473_v33  ;;  %1857 = vmatmul.mubr.msk.f32.gmra.mrb[6].mxu0 %vm41_vm0, %v20_v62 }
  0x1f   :  { %337 = vmatprep.mubr.f32.mxu0 %v2361_v3 }
  0x21   :  { %1958 = vmatpush1.bf16.msra.mxu1 %v2486_v37 }
  0x22   :  { %1976 = vmatprep.subr.bf16.mxu1 %v2399_v4 }
  0xe2   :  { %v120_v44 = vpop.f32.mrb[0].mxu0 }
  0xe3   :  { %v122_v46 = vpop.f32.mrb[1].mxu0  ;;  %v2519_v47 = vadd.f32 %v120_v44, %v2514_v43 }
  0xe4   :  { %v2522_v48 = vadd.f32 %v122_v46, %v2516_v45 }
  0xe5   :  { %v267_v21 = vrot.slane %v2519_v47, 2 }
  0xe6   :  { %v2543_v13 = vpop.f32.mrb[2].mxu0  ;;  %v268_v24 = vrot.slane %v2522_v48, 2 }
  0xe7   :  { %v229_v49 = vpop.f32.mrb[0].mxu1  ;;  %v2545_v14 = vpop.f32.mrb[3].mxu0 }
  0xe8   :  { %v230_v50 = vadd.f32 %v229_v49, %v2519_v47  ;;  %v231_v51 = vpop.f32.mrb[1].mxu1 }
  0xe9   :  { %v232_v52 = vadd.f32 %v231_v51, %v2522_v48 }
  0xea   :  { %v234_v53 = vsub.f32 0.0, %v230_v50 }
  0xeb   :  { %v241_v63 = vsub.f32 0.0, %v232_v52 }
  0xec   :  { %v235_v54 = vmul.f32 1.442695, %v234_v53  ;;  %v374_v53 = vrot.slane %v2519_v47, 4 }
  0xed   :  { %v242_v0 = vmul.f32 1.442695, %v241_v63  ;;  %v2547_v15 = vpop.f32.mrb[4].mxu0 }
  0xee   :  { %2169 = vpow2.f32 %v235_v54  ;;  %v2549_v16 = vpop.f32.mrb[5].mxu0 }
  0xef   :  { %2171 = vtanh.f32 %v232_v52 }
  0xf1   :  { %v2551_v18 = vpop.f32.mrb[6].mxu0 }
  0xf2   :  { %v2553_v19 = vpop.f32.mrb[7].mxu0 }
  0xf8   :  { %v2170_v55 = vpop.eup %2169 }
  0xf9   :  { %v237_v56 = vadd.f32 1.0, %v2170_v55  ;;  %v2172_v57 = vpop.eup %2171  ;;  %v375_v55 = vrot.slane %v2522_v48, 4 }
  0xfb   :  { %2173 = vrcp.f32 %v237_v56 }
  0xfc   :  { %2175 = vpow2.f32 %v242_v0 }
 0x105   :  { %v2174_v58 = vpop.eup %2173 }
 0x106   :  { %v248_v59 = vmul.f32 %v2174_v58, %v2172_v57  ;;  %v2176_v1 = vpop.eup %2175  ;;  %v247_v5 = vmul.f32 0.0, %v2174_v58 }
 0x107   :  { %v244_v2 = vadd.f32 1.0, %v2176_v1 }
 0x108   :  { %250 = vrot.lane.b32.xlu0 %v248_v59, %s2362_s3 }
 0x109   :  { %2177 = vrcp.f32 %v244_v2 }
 0x113   :  { %v2178_v10 = vpop.eup %2177 }
 0x17a   :  { %v251_v6 = vpop.permute.xlu0 %250 }
 0x17b   :  { %v253_v7 = vadd.f32 %v251_v6, %v247_v5 }
 0x17d   :  { %2179 = vtanh.f32 %v253_v7 }
 0x187   :  { %v2180_v11 = vpop.eup %2179 }
 0x188   :  { %v255_v12 = vmul.f32 %v2180_v11, %v2178_v10 }
 0x18a   :  { %257 = vrot.lane.b32.xlu0 %v255_v12, %s2362_s3 }
 0x1fc   :  { %v258_v20 = vpop.permute.xlu0 %257 }
 0x1fd   :  { %261 = vst.msk [vmem:[%s2901_s4] sm:$0x3] %vm260_vm1, %v258_v20  ;;  %1859 = vmatmul.mubr.msk.f32.vlgmr.msra.gmra.mrb[8].mxu0 %vm159_vm3, %v258_v20 }
 0x1fe   :  { %1858 = vst.msk [vmem:[%s2901_s4 + $0x1e] sm:$0x3] %vm263_vm2, %v258_v20  ;;  %1962 = vmatpush1.bf16.msra.mxu0 %v2410_v8  ;;  %551 = vmatprep.mubr.f32.mxu0 %v2361_v3 }
 0x1ff   :  { %1964 = vmatprep.subr.bf16.mxu0 %v2412_v9 }
 0x202   :  { %1966 = vmatpush1.bf16.msra.mxu0 %v2434_v17 }
 0x203   :  { %1968 = vmatprep.subr.bf16.mxu0 %v2446_v22 }
 0x206   :  { %1970 = vmatpush1.bf16.msra.mxu0 %v2470_v32 }
 0x207   :  { %1972 = vmatprep.subr.bf16.mxu0 %v2473_v33 }
 0x20a   :  { %1974 = vmatpush1.bf16.msra.mxu0 %v2486_v37 }
 0x20b   :  { %1992 = vmatprep.subr.bf16.mxu0 %v2399_v4 }
 0x2d0   :  { %v339_v23 = vpop.f32.mrb[8].mxu0 }
 0x2d1   :  { %v340_v25 = vadd.f32 %v339_v23, %v267_v21  ;;  %v341_v26 = vpop.f32.mrb[9].mxu0 }
 0x2d2   :  { %v342_v27 = vadd.f32 %v341_v26, %v268_v24 }
 0x2d3   :  { %v344_v28 = vsub.f32 0.0, %v340_v25  ;;  %v481_v25 = vrot.slane %v2519_v47, 6 }
 0x2d4   :  { %v351_v38 = vsub.f32 0.0, %v342_v27 }
 0x2d5   :  { %v345_v29 = vmul.f32 1.442695, %v344_v28 }
 0x2d6   :  { %v352_v39 = vmul.f32 1.442695, %v351_v38 }
 0x2d7   :  { %2181 = vpow2.f32 %v345_v29 }
 0x2d8   :  { %2183 = vtanh.f32 %v342_v27  ;;  %v482_v27 = vrot.slane %v2522_v48, 6 }
 0x2e1   :  { %v2182_v30 = vpop.eup %2181 }
 0x2e2   :  { %v347_v31 = vadd.f32 1.0, %v2182_v30  ;;  %v2184_v34 = vpop.eup %2183 }
 0x2e4   :  { %2185 = vrcp.f32 %v347_v31 }
 0x2e5   :  { %2187 = vpow2.f32 %v352_v39 }
 0x2ee   :  { %v2186_v35 = vpop.eup %2185 }
 0x2ef   :  { %v358_v36 = vmul.f32 %v2186_v35, %v2184_v34  ;;  %v2188_v40 = vpop.eup %2187  ;;  %v357_v42 = vmul.f32 %v2186_v35, %v253_v7 }
 0x2f0   :  { %v354_v41 = vadd.f32 1.0, %v2188_v40 }
 0x2f1   :  { %360 = vrot.lane.b32.xlu1 %v358_v36, %s2362_s3 }
 0x2f2   :  { %2189 = vrcp.f32 %v354_v41 }
 0x2fc   :  { %v2190_v49 = vpop.eup %2189 }
 0x363   :  { %v361_v44 = vpop.permute.xlu1 %360 }
 0x364   :  { %v363_v46 = vadd.f32 %v361_v44, %v357_v42 }
 0x366   :  { %2191 = vtanh.f32 %v363_v46 }
 0x370   :  { %v2192_v50 = vpop.eup %2191 }
 0x371   :  { %v365_v51 = vmul.f32 %v2192_v50, %v2190_v49 }
 0x373   :  { %367 = vrot.lane.b32.xlu1 %v365_v51, %s2362_s3 }
 0x3e5   :  { %v368_v52 = vpop.permute.xlu1 %367 }
 0x3e6   :  { %1860 = vst.msk [vmem:[%s2901_s4 + $0x2] sm:$0x3] %vm260_vm1, %v368_v52  ;;  %1862 = vmatmul.mubr.msk.f32.vlgmr.msra.gmra.mrb[2].mxu1 %vm159_vm3, %v368_v52 }
 0x3e7   :  { %1861 = vst.msk [vmem:[%s2901_s4 + $0x1c] sm:$0x3] %vm263_vm2, %v368_v52  ;;  %1978 = vmatpush1.bf16.msra.mxu1 %v2410_v8  ;;  %654 = vmatprep.mubr.f32.mxu1 %v2361_v3 }
 0x3e8   :  { %1980 = vmatprep.subr.bf16.mxu1 %v2412_v9 }
 0x3eb   :  { %1982 = vmatpush1.bf16.msra.mxu1 %v2434_v17 }
 0x3ec   :  { %1984 = vmatprep.subr.bf16.mxu1 %v2446_v22 }
 0x3ef   :  { %1986 = vmatpush1.bf16.msra.mxu1 %v2470_v32 }
 0x3f0   :  { %1988 = vmatprep.subr.bf16.mxu1 %v2473_v33 }
 0x3f3   :  { %1990 = vmatpush1.bf16.msra.mxu1 %v2486_v37 }
 0x3f4   :  { %2008 = vmatprep.subr.bf16.mxu1 %v2399_v4 }
 0x4b9   :  { %v446_v54 = vpop.f32.mrb[2].mxu1 }
 0x4ba   :  { %v447_v56 = vadd.f32 %v446_v54, %v374_v53  ;;  %v448_v57 = vpop.f32.mrb[3].mxu1  ;;  %v2641_v54 = vadd.f32 %v2543_v13, %v2514_v43 }
 0x4bb   :  { %v449_v58 = vadd.f32 %v448_v57, %v375_v55 }
 0x4bc   :  { %v451_v59 = vsub.f32 0.0, %v447_v56 }
 0x4bd   :  { %v458_v2 = vsub.f32 0.0, %v449_v58 }
 0x4be   :  { %v452_v60 = vmul.f32 1.442695, %v451_v59 }
 0x4bf   :  { %v459_v5 = vmul.f32 1.442695, %v458_v2 }
 0x4c0   :  { %2193 = vpow2.f32 %v452_v60  ;;  %v2646_v60 = vadd.f32 %v2545_v14, %v2516_v45 }
 0x4c1   :  { %2195 = vtanh.f32 %v449_v58 }
 0x4ca   :  { %v2194_v61 = vpop.eup %2193 }
 0x4cb   :  { %v454_v62 = vadd.f32 1.0, %v2194_v61  ;;  %v2196_v63 = vpop.eup %2195 }
 0x4cd   :  { %2197 = vrcp.f32 %v454_v62 }
 0x4ce   :  { %2199 = vpow2.f32 %v459_v5 }
 0x4d7   :  { %v2198_v0 = vpop.eup %2197 }
 0x4d8   :  { %v465_v1 = vmul.f32 %v2198_v0, %v2196_v63  ;;  %v2200_v6 = vpop.eup %2199  ;;  %v464_v10 = vmul.f32 %v2198_v0, %v363_v46 }
 0x4d9   :  { %v461_v7 = vadd.f32 1.0, %v2200_v6 }
 0x4da   :  { %467 = vrot.lane.b32.xlu0 %v465_v1, %s2362_s3 }
 0x4db   :  { %2201 = vrcp.f32 %v461_v7 }
 0x4e5   :  { %v2202_v20 = vpop.eup %2201 }
 0x54c   :  { %v468_v11 = vpop.permute.xlu0 %467 }
 0x54d   :  { %v470_v12 = vadd.f32 %v468_v11, %v464_v10 }
 0x54f   :  { %2203 = vtanh.f32 %v470_v12 }
 0x559   :  { %v2204_v21 = vpop.eup %2203 }
 0x55a   :  { %v472_v23 = vmul.f32 %v2204_v21, %v2202_v20 }
 0x55c   :  { %474 = vrot.lane.b32.xlu1 %v472_v23, %s2362_s3 }
 0x5ce   :  { %v475_v24 = vpop.permute.xlu1 %474 }
 0x5cf   :  { %1863 = vst.msk [vmem:[%s2901_s4 + $0x4] sm:$0x3] %vm260_vm1, %v475_v24  ;;  %1865 = vmatmul.mubr.msk.f32.vlgmr.msra.gmra.mrb[10].mxu0 %vm159_vm3, %v475_v24 }
 0x5d0   :  { %1864 = vst.msk [vmem:[%s2901_s4 + $0x1a] sm:$0x3] %vm263_vm2, %v475_v24  ;;  %1994 = vmatpush1.bf16.msra.mxu0 %v2410_v8  ;;  %763 = vmatprep.mubr.f32.mxu0 %v2361_v3  ;;  %v693_v24 = vrot.slane %v2641_v54, 2 }
 0x5d1   :  { %1996 = vmatprep.subr.bf16.mxu0 %v2412_v9 }
 0x5d4   :  { %1998 = vmatpush1.bf16.msra.mxu0 %v2434_v17 }
 0x5d5   :  { %2000 = vmatprep.subr.bf16.mxu0 %v2446_v22 }
 0x5d8   :  { %2002 = vmatpush1.bf16.msra.mxu0 %v2470_v32 }
 0x5d9   :  { %2004 = vmatprep.subr.bf16.mxu0 %v2473_v33 }
 0x5dc   :  { %2006 = vmatpush1.bf16.msra.mxu0 %v2486_v37 }
 0x5dd   :  { %2024 = vmatprep.subr.bf16.mxu0 %v2399_v4 }
 0x6a2   :  { %v553_v26 = vpop.f32.mrb[10].mxu0 }
 0x6a3   :  { %v554_v28 = vadd.f32 %v553_v26, %v481_v25  ;;  %v555_v29 = vpop.f32.mrb[11].mxu0 }
 0x6a4   :  { %v556_v30 = vadd.f32 %v555_v29, %v482_v27 }
 0x6a5   :  { %v558_v31 = vsub.f32 0.0, %v554_v28 }
 0x6a6   :  { %v565_v41 = vsub.f32 0.0, %v556_v30 }
 0x6a7   :  { %v559_v34 = vmul.f32 1.442695, %v558_v31 }
 0x6a8   :  { %v566_v47 = vmul.f32 1.442695, %v565_v41 }
 0x6a9   :  { %2205 = vpow2.f32 %v559_v34 }
 0x6aa   :  { %2207 = vtanh.f32 %v556_v30  ;;  %v694_v30 = vrot.slane %v2646_v60, 2 }
 0x6b3   :  { %v2206_v35 = vpop.eup %2205 }
 0x6b4   :  { %v561_v36 = vadd.f32 1.0, %v2206_v35  ;;  %v2208_v38 = vpop.eup %2207 }
 0x6b6   :  { %2209 = vrcp.f32 %v561_v36 }
 0x6b7   :  { %2211 = vpow2.f32 %v566_v47 }
 0x6c0   :  { %v2210_v39 = vpop.eup %2209 }
 0x6c1   :  { %v572_v40 = vmul.f32 %v2210_v39, %v2208_v38  ;;  %v2212_v42 = vpop.eup %2211  ;;  %v571_v44 = vmul.f32 %v2210_v39, %v470_v12 }
 0x6c2   :  { %v568_v48 = vadd.f32 1.0, %v2212_v42 }
 0x6c3   :  { %574 = vrot.lane.b32.xlu0 %v572_v40, %s2362_s3 }
 0x6c4   :  { %2213 = vrcp.f32 %v568_v48 }
 0x6ce   :  { %v2214_v50 = vpop.eup %2213 }
 0x735   :  { %v575_v46 = vpop.permute.xlu0 %574 }
 0x736   :  { %v577_v49 = vadd.f32 %v575_v46, %v571_v44 }
 0x738   :  { %2215 = vtanh.f32 %v577_v49 }
 0x742   :  { %v2216_v51 = vpop.eup %2215 }
 0x743   :  { %v579_v52 = vmul.f32 %v2216_v51, %v2214_v50 }
 0x745   :  { %581 = vrot.lane.b32.xlu1 %v579_v52, %s2362_s3 }
 0x7b7   :  { %v582_v53 = vpop.permute.xlu1 %581 }
 0x7b8   :  { %1866 = vst.msk [vmem:[%s2901_s4 + $0x6] sm:$0x3] %vm260_vm1, %v582_v53  ;;  %1868 = vmatmul.mubr.msk.f32.vlgmr.msra.gmra.mrb[4].mxu1 %vm159_vm3, %v582_v53 }
 0x7b9   :  { %1867 = vst.msk [vmem:[%s2901_s4 + $0x18] sm:$0x3] %vm263_vm2, %v582_v53  ;;  %2010 = vmatpush1.bf16.msra.mxu1 %v2410_v8  ;;  %870 = vmatprep.mubr.f32.mxu1 %v2361_v3  ;;  %v800_v53 = vrot.slane %v2641_v54, 4 }
 0x7ba   :  { %2012 = vmatprep.subr.bf16.mxu1 %v2412_v9 }
 0x7bd   :  { %2014 = vmatpush1.bf16.msra.mxu1 %v2434_v17 }
 0x7be   :  { %2016 = vmatprep.subr.bf16.mxu1 %v2446_v22 }
 0x7c1   :  { %2018 = vmatpush1.bf16.msra.mxu1 %v2470_v32 }
 0x7c2   :  { %2020 = vmatprep.subr.bf16.mxu1 %v2473_v33 }
 0x7c5   :  { %2022 = vmatpush1.bf16.msra.mxu1 %v2486_v37 }
 0x7c6   :  { %2040 = vmatprep.subr.bf16.mxu1 %v2399_v4 }
 0x88b   :  { %v656_v55 = vpop.f32.mrb[4].mxu1 }
 0x88c   :  { %v657_v56 = vadd.f32 %v656_v55, %v2641_v54  ;;  %v658_v57 = vpop.f32.mrb[5].mxu1 }
 0x88d   :  { %v659_v61 = vadd.f32 %v658_v57, %v2646_v60 }
 0x88e   :  { %v661_v58 = vsub.f32 0.0, %v657_v56 }
 0x88f   :  { %v668_v2 = vsub.f32 0.0, %v659_v61 }
 0x890   :  { %v662_v59 = vmul.f32 1.442695, %v661_v58 }
 0x891   :  { %v669_v5 = vmul.f32 1.442695, %v668_v2 }
 0x892   :  { %2217 = vpow2.f32 %v662_v59 }
 0x893   :  { %2219 = vtanh.f32 %v659_v61  ;;  %v801_v61 = vrot.slane %v2646_v60, 4 }
 0x89c   :  { %v2218_v62 = vpop.eup %2217 }
 0x89d   :  { %v664_v63 = vadd.f32 1.0, %v2218_v62  ;;  %v2220_v0 = vpop.eup %2219 }
 0x89f   :  { %2221 = vrcp.f32 %v664_v63 }
 0x8a0   :  { %2223 = vpow2.f32 %v669_v5 }
 0x8a9   :  { %v2222_v13 = vpop.eup %2221 }
 0x8aa   :  { %v675_v1 = vmul.f32 %v2222_v13, %v2220_v0  ;;  %v2224_v6 = vpop.eup %2223  ;;  %v674_v10 = vmul.f32 %v2222_v13, %v577_v49 }
 0x8ab   :  { %v671_v7 = vadd.f32 1.0, %v2224_v6 }
 0x8ac   :  { %677 = vrot.lane.b32.xlu0 %v675_v1, %s2362_s3 }
 0x8ad   :  { %2225 = vrcp.f32 %v671_v7 }
 0x8b7   :  { %v2226_v12 = vpop.eup %2225 }
 0x91e   :  { %v678_v11 = vpop.permute.xlu0 %677 }
 0x91f   :  { %v680_v14 = vadd.f32 %v678_v11, %v674_v10 }
 0x921   :  { %2227 = vtanh.f32 %v680_v14 }
 0x92b   :  { %v2228_v20 = vpop.eup %2227 }
 0x92c   :  { %v682_v21 = vmul.f32 %v2228_v20, %v2226_v12 }
 0x92e   :  { %684 = vrot.lane.b32.xlu1 %v682_v21, %s2362_s3 }
 0x9a0   :  { %v685_v23 = vpop.permute.xlu1 %684 }
 0x9a1   :  { %1869 = vst.msk [vmem:[%s2901_s4 + $0x8] sm:$0x3] %vm260_vm1, %v685_v23  ;;  %1871 = vmatmul.mubr.msk.f32.vlgmr.msra.gmra.mrb[12].mxu0 %vm159_vm3, %v685_v23 }
 0x9a2   :  { %1870 = vst.msk [vmem:[%s2901_s4 + $0x16] sm:$0x3] %vm263_vm2, %v685_v23  ;;  %2026 = vmatpush1.bf16.msra.mxu0 %v2410_v8  ;;  %977 = vmatprep.mubr.f32.mxu0 %v2361_v3 }
 0x9a3   :  { %2028 = vmatprep.subr.bf16.mxu0 %v2412_v9 }
 0x9a6   :  { %2030 = vmatpush1.bf16.msra.mxu0 %v2434_v17 }
 0x9a7   :  { %2032 = vmatprep.subr.bf16.mxu0 %v2446_v22 }
 0x9aa   :  { %2034 = vmatpush1.bf16.msra.mxu0 %v2470_v32 }
 0x9ab   :  { %2036 = vmatprep.subr.bf16.mxu0 %v2473_v33 }
 0x9ae   :  { %2038 = vmatpush1.bf16.msra.mxu0 %v2486_v37 }
 0x9af   :  { %2056 = vmatprep.subr.bf16.mxu0 %v2399_v4 }
 0xa74   :  { %v765_v25 = vpop.f32.mrb[12].mxu0 }
 0xa75   :  { %v766_v26 = vadd.f32 %v765_v25, %v693_v24  ;;  %v767_v27 = vpop.f32.mrb[13].mxu0  ;;  %v907_v25 = vrot.slane %v2641_v54, 6 }
 0xa76   :  { %v768_v31 = vadd.f32 %v767_v27, %v694_v30 }
 0xa77   :  { %v770_v28 = vsub.f32 0.0, %v766_v26 }
 0xa78   :  { %v777_v40 = vsub.f32 0.0, %v768_v31 }
 0xa79   :  { %v771_v29 = vmul.f32 1.442695, %v770_v28 }
 0xa7a   :  { %v778_v41 = vmul.f32 1.442695, %v777_v40 }
 0xa7b   :  { %2229 = vpow2.f32 %v771_v29 }
 0xa7c   :  { %2231 = vtanh.f32 %v768_v31  ;;  %v908_v31 = vrot.slane %v2646_v60, 6 }
 0xa85   :  { %v2230_v34 = vpop.eup %2229 }
 0xa86   :  { %v773_v35 = vadd.f32 1.0, %v2230_v34  ;;  %v2232_v36 = vpop.eup %2231 }
 0xa88   :  { %2233 = vrcp.f32 %v773_v35 }
 0xa89   :  { %2235 = vpow2.f32 %v778_v41 }
 0xa92   :  { %v2234_v38 = vpop.eup %2233 }
 0xa93   :  { %v784_v39 = vmul.f32 %v2234_v38, %v2232_v36  ;;  %v2236_v47 = vpop.eup %2235  ;;  %v783_v48 = vmul.f32 %v2234_v38, %v680_v14 }
 0xa94   :  { %v780_v42 = vadd.f32 1.0, %v2236_v47 }
 0xa95   :  { %786 = vrot.lane.b32.xlu0 %v784_v39, %s2362_s3 }
 0xa96   :  { %2237 = vrcp.f32 %v780_v42 }
 0xaa0   :  { %v2238_v49 = vpop.eup %2237 }
 0xb07   :  { %v787_v44 = vpop.permute.xlu0 %786 }
 0xb08   :  { %v789_v46 = vadd.f32 %v787_v44, %v783_v48 }
 0xb0a   :  { %2239 = vtanh.f32 %v789_v46 }
 0xb14   :  { %v2240_v50 = vpop.eup %2239 }
 0xb15   :  { %v791_v51 = vmul.f32 %v2240_v50, %v2238_v49 }
 0xb17   :  { %793 = vrot.lane.b32.xlu1 %v791_v51, %s2362_s3 }
 0xb89   :  { %v794_v52 = vpop.permute.xlu1 %793 }
 0xb8a   :  { %1872 = vst.msk [vmem:[%s2901_s4 + $0xa] sm:$0x3] %vm260_vm1, %v794_v52  ;;  %1874 = vmatmul.mubr.msk.f32.vlgmr.msra.gmra.mrb[6].mxu1 %vm159_vm3, %v794_v52 }
 0xb8b   :  { %1873 = vst.msk [vmem:[%s2901_s4 + $0x14] sm:$0x3] %vm263_vm2, %v794_v52  ;;  %2042 = vmatpush1.bf16.msra.mxu1 %v2410_v8  ;;  %1080 = vmatprep.mubr.f32.mxu1 %v2361_v3  ;;  %v2737_v52 = vadd.f32 %v2547_v15, %v2514_v43 }
 0xb8c   :  { %2044 = vmatprep.subr.bf16.mxu1 %v2412_v9 }
 0xb8f   :  { %2046 = vmatpush1.bf16.msra.mxu1 %v2434_v17 }
 0xb90   :  { %2048 = vmatprep.subr.bf16.mxu1 %v2446_v22 }
 0xb93   :  { %2050 = vmatpush1.bf16.msra.mxu1 %v2470_v32 }
 0xb94   :  { %2052 = vmatprep.subr.bf16.mxu1 %v2473_v33 }
 0xb97   :  { %2054 = vmatpush1.bf16.msra.mxu1 %v2486_v37 }
 0xb98   :  { %2072 = vmatprep.subr.bf16.mxu1 %v2399_v4 }
 0xc5d   :  { %v872_v55 = vpop.f32.mrb[6].mxu1 }
 0xc5e   :  { %v873_v56 = vadd.f32 %v872_v55, %v800_v53  ;;  %v874_v57 = vpop.f32.mrb[7].mxu1 }
 0xc5f   :  { %v875_v62 = vadd.f32 %v874_v57, %v801_v61 }
 0xc60   :  { %v877_v58 = vsub.f32 0.0, %v873_v56 }
 0xc61   :  { %v884_v5 = vsub.f32 0.0, %v875_v62 }
 0xc62   :  { %v878_v59 = vmul.f32 1.442695, %v877_v58 }
 0xc63   :  { %v885_v6 = vmul.f32 1.442695, %v884_v5 }
 0xc64   :  { %2241 = vpow2.f32 %v878_v59  ;;  %v2742_v59 = vadd.f32 %v2549_v16, %v2516_v45 }
 0xc65   :  { %2243 = vtanh.f32 %v875_v62 }
 0xc6e   :  { %v2242_v63 = vpop.eup %2241 }
 0xc6f   :  { %v880_v0 = vadd.f32 1.0, %v2242_v63  ;;  %v2244_v13 = vpop.eup %2243 }
 0xc71   :  { %2245 = vrcp.f32 %v880_v0 }
 0xc72   :  { %2247 = vpow2.f32 %v885_v6 }
 0xc7b   :  { %v2246_v1 = vpop.eup %2245 }
 0xc7c   :  { %v891_v2 = vmul.f32 %v2246_v1, %v2244_v13  ;;  %v2248_v7 = vpop.eup %2247  ;;  %v890_v11 = vmul.f32 %v2246_v1, %v789_v46 }
 0xc7d   :  { %v887_v10 = vadd.f32 1.0, %v2248_v7 }
 0xc7e   :  { %893 = vrot.lane.b32.xlu0 %v891_v2, %s2362_s3 }
 0xc7f   :  { %2249 = vrcp.f32 %v887_v10 }
 0xc89   :  { %v2250_v20 = vpop.eup %2249 }
 0xcf0   :  { %v894_v14 = vpop.permute.xlu0 %893 }
 0xcf1   :  { %v896_v12 = vadd.f32 %v894_v14, %v890_v11 }
 0xcf3   :  { %2251 = vtanh.f32 %v896_v12 }
 0xcfd   :  { %v2252_v21 = vpop.eup %2251 }
 0xcfe   :  { %v898_v23 = vmul.f32 %v2252_v21, %v2250_v20  ;;  %v1117_v21 = vrot.slane %v2737_v52, 2 }
 0xd00   :  { %900 = vrot.lane.b32.xlu1 %v898_v23, %s2362_s3 }
 0xd72   :  { %v901_v24 = vpop.permute.xlu1 %900 }
 0xd73   :  { %1875 = vst.msk [vmem:[%s2901_s4 + $0xc] sm:$0x3] %vm260_vm1, %v901_v24  ;;  %1877 = vmatmul.mubr.msk.f32.vlgmr.msra.gmra.mrb[14].mxu0 %vm159_vm3, %v901_v24 }
 0xd74   :  { %1876 = vst.msk [vmem:[%s2901_s4 + $0x12] sm:$0x3] %vm263_vm2, %v901_v24  ;;  %2058 = vmatpush1.bf16.msra.mxu0 %v2410_v8  ;;  %1187 = vmatprep.mubr.f32.mxu0 %v2361_v3 }
 0xd75   :  { %2060 = vmatprep.subr.bf16.mxu0 %v2412_v9 }
 0xd78   :  { %2062 = vmatpush1.bf16.msra.mxu0 %v2434_v17 }
 0xd79   :  { %2064 = vmatprep.subr.bf16.mxu0 %v2446_v22 }
 0xd7c   :  { %2066 = vmatpush1.bf16.msra.mxu0 %v2470_v32 }
 0xd7d   :  { %2068 = vmatprep.subr.bf16.mxu0 %v2473_v33 }
 0xd80   :  { %2070 = vmatpush1.bf16.msra.mxu0 %v2486_v37 }
 0xd81   :  { %2088 = vmatprep.subr.bf16.mxu0 %v2399_v4 }
 0xe46   :  { %v979_v26 = vpop.f32.mrb[14].mxu0 }
 0xe47   :  { %v980_v27 = vadd.f32 %v979_v26, %v907_v25  ;;  %v981_v28 = vpop.f32.mrb[15].mxu0 }
 0xe48   :  { %v982_v34 = vadd.f32 %v981_v28, %v908_v31  ;;  %v1118_v28 = vrot.slane %v2742_v59, 2 }
 0xe49   :  { %v984_v29 = vsub.f32 0.0, %v980_v27 }
 0xe4a   :  { %v991_v41 = vsub.f32 0.0, %v982_v34 }
 0xe4b   :  { %v985_v30 = vmul.f32 1.442695, %v984_v29 }
 0xe4c   :  { %v992_v54 = vmul.f32 1.442695, %v991_v41 }
 0xe4d   :  { %2253 = vpow2.f32 %v985_v30 }
 0xe4e   :  { %2255 = vtanh.f32 %v982_v34 }
 0xe57   :  { %v2254_v35 = vpop.eup %2253 }
 0xe58   :  { %v987_v36 = vadd.f32 1.0, %v2254_v35  ;;  %v2256_v38 = vpop.eup %2255 }
 0xe5a   :  { %2257 = vrcp.f32 %v987_v36 }
 0xe5b   :  { %2259 = vpow2.f32 %v992_v54 }
 0xe64   :  { %v2258_v39 = vpop.eup %2257 }
 0xe65   :  { %v998_v40 = vmul.f32 %v2258_v39, %v2256_v38  ;;  %v2260_v47 = vpop.eup %2259  ;;  %v997_v48 = vmul.f32 %v2258_v39, %v896_v12 }
 0xe66   :  { %v994_v42 = vadd.f32 1.0, %v2260_v47 }
 0xe67   :  { %1000 = vrot.lane.b32.xlu0 %v998_v40, %s2362_s3 }
 0xe68   :  { %2261 = vrcp.f32 %v994_v42 }
 0xe72   :  { %v2262_v60 = vpop.eup %2261 }
 0xed9   :  { %v1001_v44 = vpop.permute.xlu0 %1000 }
 0xeda   :  { %v1003_v46 = vadd.f32 %v1001_v44, %v997_v48 }
 0xedc   :  { %2263 = vtanh.f32 %v1003_v46 }
 0xee6   :  { %v2264_v49 = vpop.eup %2263 }
 0xee7   :  { %v1005_v50 = vmul.f32 %v2264_v49, %v2262_v60  ;;  %v1222_v49 = vrot.slane %v2737_v52, 4 }
 0xee9   :  { %1007 = vrot.lane.b32.xlu1 %v1005_v50, %s2362_s3 }
 0xf5b   :  { %v1008_v51 = vpop.permute.xlu1 %1007 }
 0xf5c   :  { %1878 = vst.msk [vmem:[%s2901_s4 + $0xe] sm:$0x3] %vm260_vm1, %v1008_v51  ;;  %1880 = vmatmul.mubr.msk.f32.vlgmr.msra.gmra.mrb[8].mxu1 %vm159_vm3, %v1008_v51 }
 0xf5d   :  { %1879 = vst.msk [vmem:[%s2901_s4 + $0x10] sm:$0x3] %vm263_vm2, %v1008_v51  ;;  %2074 = vmatpush1.bf16.msra.mxu1 %v2410_v8  ;;  %1292 = vmatprep.mubr.f32.mxu1 %v2361_v3 }
 0xf5e   :  { %2076 = vmatprep.subr.bf16.mxu1 %v2412_v9 }
 0xf61   :  { %2078 = vmatpush1.bf16.msra.mxu1 %v2434_v17 }
 0xf62   :  { %2080 = vmatprep.subr.bf16.mxu1 %v2446_v22 }
 0xf65   :  { %2082 = vmatpush1.bf16.msra.mxu1 %v2470_v32 }
 0xf66   :  { %2084 = vmatprep.subr.bf16.mxu1 %v2473_v33 }
 0xf69   :  { %2086 = vmatpush1.bf16.msra.mxu1 %v2486_v37 }
 0xf6a   :  { %2104 = vmatprep.subr.bf16.mxu1 %v2399_v4 }
0x102f   :  { %v1082_v53 = vpop.f32.mrb[8].mxu1 }
0x1030   :  { %v1083_v55 = vadd.f32 %v1082_v53, %v2737_v52  ;;  %v1084_v56 = vpop.f32.mrb[9].mxu1 }
0x1031   :  { %v1085_v61 = vadd.f32 %v1084_v56, %v2742_v59 }
0x1032   :  { %v1087_v57 = vsub.f32 0.0, %v1083_v55 }
0x1033   :  { %v1094_v1 = vsub.f32 0.0, %v1085_v61 }
0x1034   :  { %v1088_v58 = vmul.f32 1.442695, %v1087_v57  ;;  %v1223_v57 = vrot.slane %v2742_v59, 4 }
0x1035   :  { %v1095_v2 = vmul.f32 1.442695, %v1094_v1 }
0x1036   :  { %2265 = vpow2.f32 %v1088_v58 }
0x1037   :  { %2267 = vtanh.f32 %v1085_v61 }
0x1040   :  { %v2266_v62 = vpop.eup %2265 }
0x1041   :  { %v1090_v63 = vadd.f32 1.0, %v2266_v62  ;;  %v2268_v0 = vpop.eup %2267 }
0x1043   :  { %2269 = vrcp.f32 %v1090_v63 }
0x1044   :  { %2271 = vpow2.f32 %v1095_v2 }
0x104d   :  { %v2270_v15 = vpop.eup %2269 }
0x104e   :  { %v1101_v13 = vmul.f32 %v2270_v15, %v2268_v0  ;;  %v2272_v5 = vpop.eup %2271  ;;  %v1100_v7 = vmul.f32 %v2270_v15, %v1003_v46 }
0x104f   :  { %v1097_v6 = vadd.f32 1.0, %v2272_v5 }
0x1050   :  { %1103 = vrot.lane.b32.xlu0 %v1101_v13, %s2362_s3 }
0x1051   :  { %2273 = vrcp.f32 %v1097_v6 }
0x105b   :  { %v2274_v11 = vpop.eup %2273 }
0x10c2   :  { %v1104_v10 = vpop.permute.xlu0 %1103 }
0x10c3   :  { %v1106_v16 = vadd.f32 %v1104_v10, %v1100_v7 }
0x10c5   :  { %2275 = vtanh.f32 %v1106_v16 }
0x10cf   :  { %v2276_v14 = vpop.eup %2275 }
0x10d0   :  { %v1108_v12 = vmul.f32 %v2276_v14, %v2274_v11 }
0x10d2   :  { %1110 = vrot.lane.b32.xlu1 %v1108_v12, %s2362_s3 }
0x1144   :  { %v1111_v20 = vpop.permute.xlu1 %1110 }
0x1145   :  { %1881 = vst.msk [vmem:[%s2901_s4 + $0x10] sm:$0x3] %vm260_vm1, %v1111_v20  ;;  %1883 = vmatmul.mubr.msk.f32.vlgmr.msra.gmra.mrb[16].mxu0 %vm159_vm3, %v1111_v20 }
0x1146   :  { %1882 = vst.msk [vmem:[%s2901_s4 + $0xe] sm:$0x3] %vm263_vm2, %v1111_v20  ;;  %2090 = vmatpush1.bf16.msra.mxu0 %v2410_v8  ;;  %1397 = vmatprep.mubr.f32.mxu0 %v2361_v3  ;;  %v1327_v20 = vrot.slane %v2737_v52, 6 }
0x1147   :  { %2092 = vmatprep.subr.bf16.mxu0 %v2412_v9 }
0x114a   :  { %2094 = vmatpush1.bf16.msra.mxu0 %v2434_v17 }
0x114b   :  { %2096 = vmatprep.subr.bf16.mxu0 %v2446_v22 }
0x114e   :  { %2098 = vmatpush1.bf16.msra.mxu0 %v2470_v32 }
0x114f   :  { %2100 = vmatprep.subr.bf16.mxu0 %v2473_v33 }
0x1152   :  { %2102 = vmatpush1.bf16.msra.mxu0 %v2486_v37 }
0x1153   :  { %2120 = vmatprep.subr.bf16.mxu0 %v2399_v4 }
0x1218   :  { %v1189_v23 = vpop.f32.mrb[16].mxu0 }
0x1219   :  { %v1190_v24 = vadd.f32 %v1189_v23, %v1117_v21  ;;  %v1191_v25 = vpop.f32.mrb[17].mxu0 }
0x121a   :  { %v1192_v29 = vadd.f32 %v1191_v25, %v1118_v28 }
0x121b   :  { %v1194_v26 = vsub.f32 0.0, %v1190_v24 }
0x121c   :  { %v1201_v38 = vsub.f32 0.0, %v1192_v29 }
0x121d   :  { %v1195_v27 = vmul.f32 1.442695, %v1194_v26 }
0x121e   :  { %v1202_v39 = vmul.f32 1.442695, %v1201_v38 }
0x121f   :  { %2277 = vpow2.f32 %v1195_v27  ;;  %v1328_v27 = vrot.slane %v2742_v59, 6 }
0x1220   :  { %2279 = vtanh.f32 %v1192_v29 }
0x1229   :  { %v2278_v30 = vpop.eup %2277 }
0x122a   :  { %v1197_v31 = vadd.f32 1.0, %v2278_v30  ;;  %v2280_v34 = vpop.eup %2279 }
0x122c   :  { %2281 = vrcp.f32 %v1197_v31 }
0x122d   :  { %2283 = vpow2.f32 %v1202_v39 }
0x1236   :  { %v2282_v35 = vpop.eup %2281 }
0x1237   :  { %v1208_v36 = vmul.f32 %v2282_v35, %v2280_v34  ;;  %v2284_v40 = vpop.eup %2283  ;;  %v1207_v54 = vmul.f32 %v2282_v35, %v1106_v16 }
0x1238   :  { %v1204_v41 = vadd.f32 1.0, %v2284_v40 }
0x1239   :  { %1210 = vrot.lane.b32.xlu0 %v1208_v36, %s2362_s3 }
0x123a   :  { %2285 = vrcp.f32 %v1204_v41 }
0x1244   :  { %v2286_v48 = vpop.eup %2285 }
0x12ab   :  { %v1211_v47 = vpop.permute.xlu0 %1210 }
0x12ac   :  { %v1213_v42 = vadd.f32 %v1211_v47, %v1207_v54 }
0x12ae   :  { %2287 = vtanh.f32 %v1213_v42 }
0x12b8   :  { %v2288_v44 = vpop.eup %2287 }
0x12b9   :  { %v1215_v46 = vmul.f32 %v2288_v44, %v2286_v48  ;;  %v2832_v48 = vadd.f32 %v2551_v18, %v2514_v43 }
0x12bb   :  { %1217 = vrot.lane.b32.xlu1 %v1215_v46, %s2362_s3 }
0x132d   :  { %v1218_v60 = vpop.permute.xlu1 %1217 }
0x132e   :  { %1884 = vst.msk [vmem:[%s2901_s4 + $0x12] sm:$0x3] %vm260_vm1, %v1218_v60  ;;  %1886 = vmatmul.mubr.msk.f32.vlgmr.msra.gmra.mrb[10].mxu1 %vm159_vm3, %v1218_v60 }
0x132f   :  { %1885 = vst.msk [vmem:[%s2901_s4 + $0xc] sm:$0x3] %vm263_vm2, %v1218_v60  ;;  %2106 = vmatpush1.bf16.msra.mxu1 %v2410_v8  ;;  %1498 = vmatprep.mubr.f32.mxu1 %v2361_v3 }
0x1330   :  { %2108 = vmatprep.subr.bf16.mxu1 %v2412_v9 }
0x1333   :  { %2110 = vmatpush1.bf16.msra.mxu1 %v2434_v17 }
0x1334   :  { %2112 = vmatprep.subr.bf16.mxu1 %v2446_v22 }
0x1337   :  { %2114 = vmatpush1.bf16.msra.mxu1 %v2470_v32 }
0x1338   :  { %2116 = vmatprep.subr.bf16.mxu1 %v2473_v33 }
0x133b   :  { %2118 = vmatpush1.bf16.msra.mxu1 %v2486_v37 }
0x133c   :  { %2136 = vmatprep.subr.bf16.mxu1 %v2399_v4 }
0x1401   :  { %v1294_v50 = vpop.f32.mrb[10].mxu1 }
0x1402   :  { %v1295_v51 = vadd.f32 %v1294_v50, %v1222_v49  ;;  %v1296_v53 = vpop.f32.mrb[11].mxu1 }
0x1403   :  { %v1297_v58 = vadd.f32 %v1296_v53, %v1223_v57 }
0x1404   :  { %v1299_v55 = vsub.f32 0.0, %v1295_v51  ;;  %v2837_v51 = vadd.f32 %v2553_v19, %v2516_v45 }
0x1405   :  { %v1306_v13 = vsub.f32 0.0, %v1297_v58 }
0x1406   :  { %v1300_v56 = vmul.f32 1.442695, %v1299_v55 }
0x1407   :  { %v1307_v1 = vmul.f32 1.442695, %v1306_v13 }
0x1408   :  { %2289 = vpow2.f32 %v1300_v56 }
0x1409   :  { %2291 = vtanh.f32 %v1297_v58 }
0x1412   :  { %v2290_v61 = vpop.eup %2289 }
0x1413   :  { %v1302_v62 = vadd.f32 1.0, %v2290_v61  ;;  %v2292_v63 = vpop.eup %2291 }
0x1415   :  { %2293 = vrcp.f32 %v1302_v62 }
0x1416   :  { %2295 = vpow2.f32 %v1307_v1 }
0x141f   :  { %v2294_v0 = vpop.eup %2293 }
0x1420   :  { %v1313_v15 = vmul.f32 %v2294_v0, %v2292_v63  ;;  %v2296_v2 = vpop.eup %2295  ;;  %v1312_v6 = vmul.f32 %v2294_v0, %v1213_v42 }
0x1421   :  { %v1309_v5 = vadd.f32 1.0, %v2296_v2 }
0x1422   :  { %1315 = vrot.lane.b32.xlu0 %v1313_v15, %s2362_s3 }
0x1423   :  { %2297 = vrcp.f32 %v1309_v5  ;;  %v1535_v5 = vrot.slane %v2832_v48, 2 }
0x142d   :  { %v2298_v16 = vpop.eup %2297 }
0x1494   :  { %v1316_v7 = vpop.permute.xlu0 %1315 }
0x1495   :  { %v1318_v10 = vadd.f32 %v1316_v7, %v1312_v6 }
0x1497   :  { %2299 = vtanh.f32 %v1318_v10 }
0x14a1   :  { %v2300_v11 = vpop.eup %2299 }
0x14a2   :  { %v1320_v14 = vmul.f32 %v2300_v11, %v2298_v16 }
0x14a4   :  { %1322 = vrot.lane.b32.xlu1 %v1320_v14, %s2362_s3 }
0x1516   :  { %v1323_v12 = vpop.permute.xlu1 %1322 }
0x1517   :  { %1887 = vst.msk [vmem:[%s2901_s4 + $0x14] sm:$0x3] %vm260_vm1, %v1323_v12  ;;  %1889 = vmatmul.mubr.msk.f32.vlgmr.msra.gmra.mrb[18].mxu0 %vm159_vm3, %v1323_v12 }
0x1518   :  { %1888 = vst.msk [vmem:[%s2901_s4 + $0xa] sm:$0x3] %vm263_vm2, %v1323_v12  ;;  %2122 = vmatpush1.bf16.msra.mxu0 %v2410_v8  ;;  %1605 = vmatprep.mubr.f32.mxu0 %v2361_v3 }
0x1519   :  { %2124 = vmatprep.subr.bf16.mxu0 %v2412_v9 }
0x151c   :  { %2126 = vmatpush1.bf16.msra.mxu0 %v2434_v17 }
0x151d   :  { %2128 = vmatprep.subr.bf16.mxu0 %v2446_v22 }
0x1520   :  { %2130 = vmatpush1.bf16.msra.mxu0 %v2470_v32 }
0x1521   :  { %2132 = vmatprep.subr.bf16.mxu0 %v2473_v33 }
0x1524   :  { %2134 = vmatpush1.bf16.msra.mxu0 %v2486_v37 }
0x1525   :  { %2152 = vmatprep.subr.bf16.mxu0 %v2399_v4 }
0x15ea   :  { %v1399_v21 = vpop.f32.mrb[18].mxu0 }
0x15eb   :  { %v1400_v23 = vadd.f32 %v1399_v21, %v1327_v20  ;;  %v1401_v24 = vpop.f32.mrb[19].mxu0 }
0x15ec   :  { %v1402_v28 = vadd.f32 %v1401_v24, %v1328_v27 }
0x15ed   :  { %v1404_v25 = vsub.f32 0.0, %v1400_v23 }
0x15ee   :  { %v1411_v4 = vsub.f32 0.0, %v1402_v28 }
0x15ef   :  { %v1405_v26 = vmul.f32 1.442695, %v1404_v25 }
0x15f0   :  { %v1412_v52 = vmul.f32 1.442695, %v1411_v4 }
0x15f1   :  { %2301 = vpow2.f32 %v1405_v26 }
0x15f2   :  { %2303 = vtanh.f32 %v1402_v28 }
0x15fb   :  { %v2302_v29 = vpop.eup %2301 }
0x15fc   :  { %v1407_v30 = vadd.f32 1.0, %v2302_v29  ;;  %v2304_v31 = vpop.eup %2303  ;;  %v1640_v29 = vrot.slane %v2832_v48, 4 }
0x15fe   :  { %2305 = vrcp.f32 %v1407_v30 }
0x15ff   :  { %2307 = vpow2.f32 %v1412_v52  ;;  %v1641_v52 = vrot.slane %v2837_v51, 4 }
0x1608   :  { %v2306_v34 = vpop.eup %2305 }
0x1609   :  { %v1418_v35 = vmul.f32 %v2306_v34, %v2304_v31  ;;  %v2308_v36 = vpop.eup %2307  ;;  %v1417_v39 = vmul.f32 %v2306_v34, %v1318_v10 }
0x160a   :  { %v1414_v38 = vadd.f32 1.0, %v2308_v36 }
0x160b   :  { %1420 = vrot.lane.b32.xlu0 %v1418_v35, %s2362_s3 }
0x160c   :  { %2309 = vrcp.f32 %v1414_v38 }
0x1616   :  { %v2310_v59 = vpop.eup %2309 }
0x167d   :  { %v1421_v40 = vpop.permute.xlu0 %1420 }
0x167e   :  { %v1423_v41 = vadd.f32 %v1421_v40, %v1417_v39 }
0x1680   :  { %2311 = vtanh.f32 %v1423_v41 }
0x168a   :  { %v2312_v54 = vpop.eup %2311 }
0x168b   :  { %v1425_v47 = vmul.f32 %v2312_v54, %v2310_v59 }
0x168d   :  { %1427 = vrot.lane.b32.xlu1 %v1425_v47, %s2362_s3 }
0x16ff   :  { %v1428_v42 = vpop.permute.xlu1 %1427 }
0x1700   :  { %1890 = vst.msk [vmem:[%s2901_s4 + $0x16] sm:$0x3] %vm260_vm1, %v1428_v42  ;;  %1892 = vmatmul.mubr.msk.f32.vlgmr.msra.gmra.mrb[12].mxu1 %vm159_vm3, %v1428_v42 }
0x1701   :  { %1891 = vst.msk [vmem:[%s2901_s4 + $0x8] sm:$0x3] %vm263_vm2, %v1428_v42  ;;  %2138 = vmatpush1.bf16.msra.mxu1 %v2410_v8  ;;  %1710 = vmatprep.mubr.f32.mxu1 %v2361_v3 }
0x1702   :  { %2140 = vmatprep.subr.bf16.mxu1 %v2412_v9 }
0x1705   :  { %2142 = vmatpush1.bf16.msra.mxu1 %v2434_v17 }
0x1706   :  { %2144 = vmatprep.subr.bf16.mxu1 %v2446_v22 }
0x1709   :  { %2146 = vmatpush1.bf16.msra.mxu1 %v2470_v32 }
0x170a   :  { %2148 = vmatprep.subr.bf16.mxu1 %v2473_v33 }
0x170d   :  { %2150 = vmatpush1.bf16.msra.mxu1 %v2486_v37 }
0x17d3   :  { %v1500_v44 = vpop.f32.mrb[12].mxu1 }
0x17d4   :  { %v1501_v46 = vadd.f32 %v1500_v44, %v2832_v48  ;;  %v1502_v60 = vpop.f32.mrb[13].mxu1 }
0x17d5   :  { %v1503_v53 = vadd.f32 %v1502_v60, %v2837_v51 }
0x17d6   :  { %v1505_v49 = vsub.f32 0.0, %v1501_v46 }
0x17d7   :  { %v1512_v58 = vsub.f32 0.0, %v1503_v53 }
0x17d8   :  { %v1506_v50 = vmul.f32 1.442695, %v1505_v49 }
0x17d9   :  { %v1513_v61 = vmul.f32 1.442695, %v1512_v58 }
0x17da   :  { %2313 = vpow2.f32 %v1506_v50 }
0x17db   :  { %2315 = vtanh.f32 %v1503_v53 }
0x17e4   :  { %v2314_v55 = vpop.eup %2313 }
0x17e5   :  { %v1508_v56 = vadd.f32 1.0, %v2314_v55  ;;  %v2316_v57 = vpop.eup %2315 }
0x17e7   :  { %2317 = vrcp.f32 %v1508_v56 }
0x17e8   :  { %2319 = vpow2.f32 %v1513_v61 }
0x17f1   :  { %v2318_v43 = vpop.eup %2317 }
0x17f2   :  { %v1519_v18 = vmul.f32 %v2318_v43, %v2316_v57  ;;  %v2320_v62 = vpop.eup %2319  ;;  %v1518_v0 = vmul.f32 %v2318_v43, %v1423_v41  ;;  %v1745_v57 = vrot.slane %v2832_v48, 6 }
0x17f3   :  { %v1515_v63 = vadd.f32 1.0, %v2320_v62 }
0x17f4   :  { %1521 = vrot.lane.b32.xlu0 %v1519_v18, %s2362_s3 }
0x17f5   :  { %2321 = vrcp.f32 %v1515_v63  ;;  %v1746_v63 = vrot.slane %v2837_v51, 6 }
0x17ff   :  { %v2322_v19 = vpop.eup %2321 }
0x1866   :  { %v1522_v15 = vpop.permute.xlu0 %1521 }
0x1867   :  { %v1524_v45 = vadd.f32 %v1522_v15, %v1518_v0 }
0x1869   :  { %2323 = vtanh.f32 %v1524_v45 }
0x1873   :  { %v2324_v13 = vpop.eup %2323 }
0x1874   :  { %v1526_v1 = vmul.f32 %v2324_v13, %v2322_v19 }
0x1876   :  { %1528 = vrot.lane.b32.xlu1 %v1526_v1, %s2362_s3 }
0x18e8   :  { %v1529_v2 = vpop.permute.xlu1 %1528 }
0x18e9   :  { %1893 = vst.msk [vmem:[%s2901_s4 + $0x18] sm:$0x3] %vm260_vm1, %v1529_v2  ;;  %1895 = vmatmul.mubr.msk.f32.vlgmr.msra.gmra.mrb[20].mxu0 %vm159_vm3, %v1529_v2 }
0x18ea   :  { %1894 = vst.msk [vmem:[%s2901_s4 + $0x6] sm:$0x3] %vm263_vm2, %v1529_v2  ;;  %2154 = vmatpush1.bf16.msra.mxu0 %v2410_v8  ;;  %1815 = vmatprep.mubr.f32.mxu0 %v2361_v3  ;;  %v1536_v3 = vrot.slane %v2837_v51, 2 }
0x18eb   :  { %2156 = vmatprep.subr.bf16.mxu0 %v2412_v9 }
0x18ee   :  { %2158 = vmatpush1.bf16.msra.mxu0 %v2434_v17 }
0x18ef   :  { %2160 = vmatprep.subr.bf16.mxu0 %v2446_v22 }
0x18f2   :  { %2162 = vmatpush1.bf16.msra.mxu0 %v2470_v32 }
0x18f3   :  { %2164 = vmatprep.subr.bf16.mxu0 %v2473_v33 }
0x18f6   :  { %2166 = vmatpush1.bf16.msra.mxu0 %v2486_v37 }
0x19bc   :  { %v1607_v6 = vpop.f32.mrb[20].mxu0 }
0x19bd   :  { %v1608_v7 = vadd.f32 %v1607_v6, %v1535_v5  ;;  %v1609_v10 = vpop.f32.mrb[21].mxu0 }
0x19be   :  { %v1610_v9 = vadd.f32 %v1609_v10, %v1536_v3 }
0x19bf   :  { %v1612_v8 = vsub.f32 0.0, %v1608_v7 }
0x19c0   :  { %v1619_v37 = vsub.f32 0.0, %v1610_v9 }
0x19c1   :  { %v1613_v16 = vmul.f32 1.442695, %v1612_v8 }
0x19c2   :  { %v1620_v14 = vmul.f32 1.442695, %v1619_v37 }
0x19c3   :  { %2325 = vpow2.f32 %v1613_v16 }
0x19c4   :  { %2327 = vtanh.f32 %v1610_v9 }
0x19cd   :  { %v2326_v17 = vpop.eup %2325 }
0x19ce   :  { %v1615_v11 = vadd.f32 1.0, %v2326_v17  ;;  %v2328_v22 = vpop.eup %2327 }
0x19d0   :  { %2329 = vrcp.f32 %v1615_v11 }
0x19d1   :  { %2331 = vpow2.f32 %v1620_v14 }
0x19da   :  { %v2330_v32 = vpop.eup %2329 }
0x19db   :  { %v1626_v33 = vmul.f32 %v2330_v32, %v2328_v22  ;;  %v2332_v12 = vpop.eup %2331  ;;  %v1625_v21 = vmul.f32 %v2330_v32, %v1524_v45 }
0x19dc   :  { %v1622_v20 = vadd.f32 1.0, %v2332_v12 }
0x19dd   :  { %1628 = vrot.lane.b32.xlu0 %v1626_v33, %s2362_s3 }
0x19de   :  { %2333 = vrcp.f32 %v1622_v20 }
0x19e8   :  { %v2334_v25 = vpop.eup %2333 }
0x1a4f   :  { %v1629_v23 = vpop.permute.xlu0 %1628 }
0x1a50   :  { %v1631_v24 = vadd.f32 %v1629_v23, %v1625_v21 }
0x1a52   :  { %2335 = vtanh.f32 %v1631_v24 }
0x1a5c   :  { %v2336_v26 = vpop.eup %2335 }
0x1a5d   :  { %v1633_v27 = vmul.f32 %v2336_v26, %v2334_v25 }
0x1a5f   :  { %1635 = vrot.lane.b32.xlu1 %v1633_v27, %s2362_s3 }
0x1ad1   :  { %v1636_v28 = vpop.permute.xlu1 %1635 }
0x1ad2   :  { %1896 = vst.msk [vmem:[%s2901_s4 + $0x1a] sm:$0x3] %vm260_vm1, %v1636_v28  ;;  %1898 = vmatmul.mubr.msk.f32.vlgmr.msra.gmra.mrb[14].mxu1 %vm159_vm3, %v1636_v28 }
0x1ad3   :  { %1897 = vst.msk [vmem:[%s2901_s4 + $0x4] sm:$0x3] %vm263_vm2, %v1636_v28 }
0x1ba5   :  { %v1712_v30 = vpop.f32.mrb[14].mxu1 }
0x1ba6   :  { %v1713_v31 = vadd.f32 %v1712_v30, %v1640_v29  ;;  %v1714_v34 = vpop.f32.mrb[15].mxu1 }
0x1ba7   :  { %v1715_v36 = vadd.f32 %v1714_v34, %v1641_v52 }
0x1ba8   :  { %v1717_v35 = vsub.f32 0.0, %v1713_v31 }
0x1ba9   :  { %v1724_v54 = vsub.f32 0.0, %v1715_v36 }
0x1baa   :  { %v1718_v4 = vmul.f32 1.442695, %v1717_v35 }
0x1bab   :  { %v1725_v47 = vmul.f32 1.442695, %v1724_v54 }
0x1bac   :  { %2337 = vpow2.f32 %v1718_v4 }
0x1bad   :  { %2339 = vtanh.f32 %v1715_v36 }
0x1bb6   :  { %v2338_v38 = vpop.eup %2337 }
0x1bb7   :  { %v1720_v39 = vadd.f32 1.0, %v2338_v38  ;;  %v2340_v40 = vpop.eup %2339 }
0x1bb9   :  { %2341 = vrcp.f32 %v1720_v39 }
0x1bba   :  { %2343 = vpow2.f32 %v1725_v47 }
0x1bc3   :  { %v2342_v41 = vpop.eup %2341 }
0x1bc4   :  { %v1731_v59 = vmul.f32 %v2342_v41, %v2340_v40  ;;  %v2344_v42 = vpop.eup %2343  ;;  %v1730_v46 = vmul.f32 %v2342_v41, %v1631_v24 }
0x1bc5   :  { %v1727_v44 = vadd.f32 1.0, %v2344_v42 }
0x1bc6   :  { %1733 = vrot.lane.b32.xlu0 %v1731_v59, %s2362_s3 }
0x1bc7   :  { %2345 = vrcp.f32 %v1727_v44 }
0x1bd1   :  { %v2346_v50 = vpop.eup %2345 }
0x1c38   :  { %v1734_v60 = vpop.permute.xlu0 %1733 }
0x1c39   :  { %v1736_v49 = vadd.f32 %v1734_v60, %v1730_v46 }
0x1c3b   :  { %2347 = vtanh.f32 %v1736_v49 }
0x1c45   :  { %v2348_v53 = vpop.eup %2347 }
0x1c46   :  { %v1738_v55 = vmul.f32 %v2348_v53, %v2346_v50 }
0x1c48   :  { %1740 = vrot.lane.b32.xlu1 %v1738_v55, %s2362_s3 }
0x1cba   :  { %v1741_v56 = vpop.permute.xlu1 %1740 }
0x1cbb   :  { %1899 = vst.msk [vmem:[%s2901_s4 + $0x1c] sm:$0x3] %vm260_vm1, %v1741_v56  ;;  %1901 = vmatmul.mubr.msk.f32.vlgmr.msra.gmra.mrb[22].mxu0 %vm159_vm3, %v1741_v56 }
0x1cbc   :  { %1900 = vst.msk [vmem:[%s2901_s4 + $0x2] sm:$0x3] %vm263_vm2, %v1741_v56 }
0x1d8e   :  { %v1817_v43 = vpop.f32.mrb[22].mxu0 }
0x1d8f   :  { %v1818_v18 = vadd.f32 %v1817_v43, %v1745_v57  ;;  %v1819_v58 = vpop.f32.mrb[23].mxu0 }
0x1d90   :  { %v1820_v0 = vadd.f32 %v1819_v58, %v1746_v63 }
0x1d91   :  { %v1822_v61 = vsub.f32 0.0, %v1818_v18 }
0x1d92   :  { %v1829_v2 = vsub.f32 0.0, %v1820_v0 }
0x1d93   :  { %v1823_v62 = vmul.f32 1.442695, %v1822_v61 }
0x1d94   :  { %v1830_v48 = vmul.f32 1.442695, %v1829_v2 }
0x1d95   :  { %2349 = vpow2.f32 %v1823_v62 }
0x1d96   :  { %2351 = vtanh.f32 %v1820_v0 }
0x1d9f   :  { %v2350_v15 = vpop.eup %2349 }
0x1da0   :  { %v1825_v45 = vadd.f32 1.0, %v2350_v15  ;;  %v2352_v19 = vpop.eup %2351 }
0x1da2   :  { %2353 = vrcp.f32 %v1825_v45 }
0x1da3   :  { %2355 = vpow2.f32 %v1830_v48 }
0x1dac   :  { %v2354_v13 = vpop.eup %2353 }
0x1dad   :  { %v1836_v1 = vmul.f32 %v2354_v13, %v2352_v19  ;;  %v2356_v5 = vpop.eup %2355  ;;  %v1835_v7 = vmul.f32 %v2354_v13, %v1736_v49 }
0x1dae   :  { %v1832_v6 = vadd.f32 1.0, %v2356_v5 }
0x1daf   :  { %1838 = vrot.lane.b32.xlu0 %v1836_v1, %s2362_s3 }
0x1db0   :  { %2357 = vrcp.f32 %v1832_v6 }
0x1dba   :  { %v2358_v51 = vpop.eup %2357 }
0x1e21   :  { %v1839_v10 = vpop.permute.xlu0 %1838 }
0x1e22   :  { %v1841_v8 = vadd.f32 %v1839_v10, %v1835_v7 }
0x1e24   :  { %2359 = vtanh.f32 %v1841_v8 }
0x1e2e   :  { %v2360_v16 = vpop.eup %2359 }
0x1e2f   :  { %v1843_v3 = vmul.f32 %v2360_v16, %v2358_v51 }
0x1e31   :  { %1845 = vrot.lane.b32.xlu1 %v1843_v3, %s2362_s3 }
0x1ea3   :  { %v1846_v9 = vpop.permute.xlu1 %1845 }
0x1ea4   :  { %1902 = vst.msk [vmem:[%s2901_s4 + $0x1e] sm:$0x3] %vm260_vm1, %v1846_v9 }
0x1ea5   :  { %1849 = vst.msk [vmem:[%s2901_s4] sm:$0x3] %vm263_vm2, %v1846_v9 }

// kernel: _lambda_.3
= control target key start
LH: loop header
LB: loop body
LE: loop exit
PB: predicated region body
PF: predicated region fallthrough
CT: control target
= control target key end

     0   :  { %s7076_s0 = inlined_call_operand.vmem [shape: f32[32,64], index: 0, kind: input, shape index: {}]   ;;  %s7077_s1 = inlined_call_operand.vmem [shape: f32[64,8], index: 1, kind: input, shape index: {}]   ;;  %s7078_s2 = inlined_call_operand.vmem [shape: f32[1,8], index: 2, kind: input, shape index: {}]   ;;  %s7079_s3 = inlined_call_operand.vmem [shape: f32[3,8,8], index: 3, kind: input, shape index: {}]   ;;  %s7080_s4 = inlined_call_operand.vmem [shape: f32[4,8,8], index: 4, kind: input, shape index: {}]   ;;  %s7081_s5 = inlined_call_operand.vmem [shape: f32[5,8,8], index: 5, kind: input, shape index: {}]   ;;  %s7082_s6 = inlined_call_operand.vmem [shape: f32[1,8], index: 6, kind: input, shape index: {}]   ;;  %s7083_s7 = inlined_call_operand.vmem [shape: f32[1,8], index: 7, kind: input, shape index: {}]   ;;  %s7084_s8 = inlined_call_operand.vmem [shape: f32[1,8], index: 8, kind: input, shape index: {}]   ;;  %s7085_s9 = inlined_call_operand.vmem [shape: f32[3,8,8], index: 9, kind: input, shape index: {}]   ;;  %s7086_s10 = inlined_call_operand.vmem [shape: f32[1,8], index: 10, kind: input, shape index: {}]   ;;  %s7087_s11 = inlined_call_operand.vmem [shape: f32[3,8,8], index: 11, kind: input, shape index: {}]   ;;  %s7088_s12 = inlined_call_operand.vmem [shape: f32[1,8], index: 12, kind: input, shape index: {}]   ;;  %s7089_s13 = inlined_call_operand.vmem [shape: f32[24,2], index: 13, kind: input, shape index: {}]   ;;  %s7090_s14 = inlined_call_operand.vmem [shape: f32[1,2], index: 14, kind: input, shape index: {}]   ;;  %s7091_s15 = inlined_call_operand.hbm [shape: f32[2,2], index: 15, kind: output, shape index: {0}]   ;;  %s7092_s16 = inlined_call_operand.hbm [shape: f32[2,24], index: 16, kind: output, shape index: {1}]  }
   0x1   :  { %7094 = sst [smem:[#allocation8_spill]] %s7076_s0 }
   0x2   :  { %22 = vsyncpa [#allocation3], 0  ;;  %v58_v0 = vld [vmem:[%s7077_s1] sm:$0xff]  ;;  %v59_v1 = vld [vmem:[%s7077_s1 + $0x8] sm:$0xff]  ;;  %vm73_vm0 = vcmask 523264   ;;  %s7095_s20 = sld [smem:[#allocation8_spill]] }
   0x3   :  { %v60_v2 = vld [vmem:[%s7077_s1 + $0x10] sm:$0xff]  ;;  %v6108_v3 = vpack.c.bf16 %v59_v1, %v58_v0  ;;  %v61_v4 = vld [vmem:[%s7077_s1 + $0x18] sm:$0xff]  ;;  %v62_v6 = vld [vmem:[%s7077_s1 + $0x20] sm:$0xff] }
   0x4   :  { %v6112_v5 = vpack.c.bf16 %v61_v4, %v60_v2  ;;  %v63_v7 = vld [vmem:[%s7077_s1 + $0x28] sm:$0xff] }
   0x5   :  { %6109 = vmatprep.subr.bf16.mxu0 %v6108_v3 }
   0x8   :  { %v54_v8 = vld [vmem:[%s7095_s20] sm:$0xff] }
   0x9   :  { %5793 = vmatprep.mubr.msk.f32.mxu0 %vm73_vm0, %v54_v8 }
   0xa   :  { %23 = vsyncpa [#allocation5], 0  ;;  %6111 = vmatpush3.bf16.msra.mxu0 %v6108_v3  ;;  %v6116_v9 = vpack.c.bf16 %v63_v7, %v62_v6  ;;  %v64_v10 = vld [vmem:[%s7077_s1 + $0x30] sm:$0xff]  ;;  %v65_v11 = vld [vmem:[%s7077_s1 + $0x38] sm:$0xff]  ;;  %vm209_vm1 = vcmask 1046528   ;;  %vm213_vm2 = vcmask 64512  }
   0xb   :  { %6113 = vmatprep.subr.bf16.mxu0 %v6112_v5  ;;  %v6120_v12 = vpack.c.bf16 %v65_v11, %v64_v10  ;;  %v55_v13 = vld [vmem:[%s7095_s20 + $0x8] sm:$0xff]  ;;  %v6400_v15 = vld [vmem:[%s7079_s3] sm:$0xff]  ;;  %v6427_v24 = vld [vmem:[%s7079_s3 + $0x10] sm:$0xff]  ;;  %vm372_vm3 = vcmask 1045504   ;;  %vm733_vm4 = vcmask 1044480   ;;  %vm726_vm5 = vcmask 1040384  }
   0xc   :  { %v6393_v14 = vld [vmem:[%s7079_s3 + $0x8] sm:$0xff]  ;;  %v6406_v16 = vld [vmem:[%s7078_s2] ss:$0 sm:$0xff]  ;;  %v56_v30 = vld [vmem:[%s7095_s20 + $0x10] sm:$0xff]  ;;  %vm1584_vm6 = vcmask 1043456   ;;  %vm995_vm7 = vcmask 60416  }
   0xd   :  { %5799 = vmatprep.subr.mxu1 %v6393_v14  ;;  %v6453_v28 = vld [vmem:[%s7085_s9 + $0x8] sm:$0xff]  ;;  %v6460_v29 = vld [vmem:[%s7085_s9] sm:$0xff]  ;;  %v57_v31 = vld [vmem:[%s7095_s20 + $0x18] sm:$0xff]  ;;  %vm1840_vm8 = vcmask 59392   ;;  %vm2506_vm9 = vcmask 1042432   ;;  %vm2762_vm10 = vcmask 58368  }
   0xe   :  { %6115 = vmatpush3.bf16.msra.mxu0 %v6112_v5  ;;  %5800 = vmatpush3.msra.mxu1 %v6393_v14  ;;  %v6474_v32 = vld [vmem:[%s7082_s6] ss:$0 sm:$0xff]  ;;  %v6484_v45 = vld [vmem:[%s7085_s9 + $0x10] sm:$0xff]  ;;  %v6493_v46 = vld [vmem:[%s7080_s4 + $0x8] sm:$0xff]  ;;  %s6267_s2 = smov 16   ;;  %vm6270_vm11 = vmmov 0  }
   0xf   :  { %6117 = vmatprep.subr.bf16.mxu0 %v6116_v9  ;;  %5804 = vmatprep.subr.mxu1 %v6400_v15  ;;  %v6502_v47 = vld [vmem:[%s7080_s4] sm:$0xff]  ;;  %v6512_v48 = vld [vmem:[%s7080_s4 + $0x10] sm:$0xff]  ;;  %v6523_v49 = vld [vmem:[%s7080_s4 + $0x18] sm:$0xff]  ;;  %vm2780_vm12 = vcmask 130048   ;;  %vm5332_vm13 = vcmask 195584   ;;  %vm5320_vm14 = vcmask 189440  }
  0x10   :  { %v6549_v53 = vld [vmem:[%s7087_s11 + $0x8] sm:$0xff]  ;;  %v6558_v54 = vld [vmem:[%s7087_s11] sm:$0xff]  ;;  %v6591_v8 = vld [vmem:[%s7087_s11 + $0x10] sm:$0xff] }
  0x11   :  { %v6569_v57 = vld [vmem:[%s7086_s10] ss:$0 sm:$0xff] }
  0x12   :  { %6119 = vmatpush3.bf16.msra.mxu0 %v6116_v9 }
  0x13   :  { %6121 = vmatprep.subr.bf16.mxu0 %v6120_v12 }
  0x16   :  { %6123 = vmatpush3.bf16.msra.mxu0 %v6120_v12  ;;  %v6605_v12 = vld [vmem:[%s7083_s7] ss:$0 sm:$0xff] }
  0x17   :  { %5829 = vmatprep.subr.mxu0 %v6549_v53 }
  0x19   :  { %5794 = vmatmul.mubr.msk.f32.vlgmr.msra.gmra.mrb[0].mxu0 %vm73_vm0, %v55_v13 }
  0x1a   :  { %5796 = vmatprep.mubr.msk.f32.mxu0 %vm73_vm0, %v56_v30  ;;  %5830 = vmatpush3.msra.mxu0 %v6549_v53 }
  0x1b   :  { %5834 = vmatprep.subr.mxu0 %v6558_v54 }
  0x1d   :  { %5797 = vmatmul.mubr.msk.f32.gmra.mrb[2].mxu0 %vm73_vm0, %v57_v31 }
  0xec   :  { %v5795_v17 = vpop.f32.mrb[0].mxu0 }
  0xed   :  { %v6409_v18 = vadd.f32 %v5795_v17, %v6406_v16  ;;  %v152_v19 = vpop.f32.mrb[1].mxu0 }
  0xee   :  { %v6412_v20 = vadd.f32 %v6406_v16, %v152_v19 }
  0xef   :  { %v6415_v21 = vrot.slane %v6409_v18, 1  ;;  %v6437_v26 = vrot.slane %v6409_v18, 2  ;;  %v6533_v51 = vrot.slane %v6409_v18, 3 }
  0xf0   :  { %v210_v22 = vrot.slane %v6412_v20, 1  ;;  %v373_v25 = vrot.slane %v6412_v20, 2  ;;  %v1231_v50 = vrot.slane %v6412_v20, 3  ;;  %v6562_v55 = vpop.f32.mrb[2].mxu0 }
  0xf1   :  { %v6564_v56 = vpop.f32.mrb[3].mxu0 }
  0xf2   :  { %v6420_v23 = vsel %vm209_vm1, %v210_v22, %v6415_v21  ;;  %v6443_v27 = vsel %vm372_vm3, %v373_v25, %v6437_v26  ;;  %v6539_v52 = vsel %vm733_vm4, %v1231_v50, %v6533_v51 }
  0xf3   :  { %5801 = vmatprep.mubr.msk.f32.mxu1 %vm213_vm2, %v6420_v23 }
  0xf4   :  { %5802 = vmatmul.mubr.msk.f32.vlgmr.msra.gmra.mrb[0].mxu1 %vm213_vm2, %v6415_v21 }
  0xf5   :  { %5805 = vmatpush3.msra.mxu1 %v6400_v15  ;;  %5806 = vmatprep.mubr.msk.f32.mxu1 %vm213_vm2, %v6412_v20 }
  0xf6   :  { %5809 = vmatprep.subr.mxu1 %v6427_v24 }
  0xfc   :  { %5807 = vmatmul.mubr.msk.f32.vlgmr.msra.gmra.mrb[0].mxu1 %vm213_vm2, %v6409_v18 }
  0xfd   :  { %5810 = vmatpush3.msra.mxu1 %v6427_v24  ;;  %5811 = vmatprep.mubr.msk.f32.mxu1 %vm213_vm2, %v6443_v27 }
  0xfe   :  { %5814 = vmatprep.subr.mxu1 %v6453_v28 }
 0x104   :  { %5812 = vmatmul.mubr.msk.f32.vlgmr.msra.gmra.mrb[0].mxu1 %vm213_vm2, %v6437_v26 }
 0x105   :  { %5815 = vmatpush3.msra.mxu1 %v6453_v28 }
 0x106   :  { %5819 = vmatprep.subr.mxu1 %v6460_v29 }
 0x1d7   :  { %v5813_v33 = vpop.f32.mrb[0].mxu1 }
 0x1d8   :  { %v464_v34 = vadd.f32 %v5813_v33, %v6474_v32  ;;  %v446_v35 = vpop.f32.mrb[1].mxu1 }
 0x1d9   :  { %v463_v36 = vadd.f32 %v6474_v32, %v446_v35 }
 0x1da   :  { %v466_v37 = vmax.f32 %v464_v34, 0.0 }
 0x1db   :  { %v465_v38 = vmax.f32 %v463_v36, 0.0 }
 0x1dc   :  { %v470_v39 = vrot.slane %v466_v37, 1  ;;  %v631_v40 = vrot.slane %v466_v37, 2 }
 0x1dd   :  { %v469_v41 = vrot.slane %v465_v38, 1  ;;  %v630_v42 = vrot.slane %v465_v38, 2 }
 0x1df   :  { %v471_v43 = vsel %vm209_vm1, %v469_v41, %v470_v39  ;;  %v632_v44 = vsel %vm372_vm3, %v630_v42, %v631_v40  ;;  %v2153_v41 = vrot.slane %v6412_v20, 4  ;;  %v6675_v42 = vadd.f32 %v6562_v55, %v6406_v16 }
 0x1e0   :  { %5816 = vmatprep.mubr.msk.f32.mxu1 %vm213_vm2, %v471_v43  ;;  %v6679_v43 = vadd.f32 %v6406_v16, %v6564_v56 }
 0x1e1   :  { %5817 = vmatmul.mubr.msk.f32.vlgmr.msra.gmra.mrb[2].mxu1 %vm213_vm2, %v470_v39  ;;  %v6631_v39 = vld [vmem:[%s7081_s5] sm:$0xff]  ;;  %v6708_v50 = vrot.slane %v6675_v42, 2 }
 0x1e2   :  { %5820 = vmatpush3.msra.mxu1 %v6460_v29  ;;  %5821 = vmatprep.mubr.msk.f32.mxu1 %vm213_vm2, %v465_v38  ;;  %v6622_v38 = vld [vmem:[%s7081_s5 + $0x8] sm:$0xff] }
 0x1e3   :  { %5824 = vmatprep.subr.mxu1 %v6484_v45 }
 0x1e9   :  { %5822 = vmatmul.mubr.msk.f32.vlgmr.msra.gmra.mrb[2].mxu1 %vm213_vm2, %v466_v37 }
 0x1ea   :  { %5825 = vmatpush3.msra.mxu1 %v6484_v45  ;;  %5826 = vmatprep.mubr.msk.f32.mxu1 %vm213_vm2, %v632_v44  ;;  %v2945_v44 = vrot.slane %v6679_v43, 2 }
 0x1eb   :  { %5844 = vmatprep.subr.mxu1 %v6493_v46 }
 0x1f1   :  { %5827 = vmatmul.mubr.msk.f32.vlgmr.msra.gmra.mrb[2].mxu1 %vm213_vm2, %v631_v40  ;;  %v6641_v40 = vld [vmem:[%s7081_s5 + $0x10] sm:$0xff] }
 0x1f2   :  { %5845 = vmatpush3.msra.mxu1 %v6493_v46  ;;  %5846 = vmatprep.mubr.msk.f32.mxu1 %vm213_vm2, %v6420_v23 }
 0x1f3   :  { %5849 = vmatprep.subr.mxu1 %v6502_v47 }
 0x1f5   :  { %5847 = vmatmul.mubr.msk.f32.vlgmr.msra.gmra.mrb[4].mxu1 %vm213_vm2, %v6415_v21 }
 0x1f6   :  { %5850 = vmatpush3.msra.mxu1 %v6502_v47  ;;  %5851 = vmatprep.mubr.msk.f32.mxu1 %vm213_vm2, %v6412_v20 }
 0x1f7   :  { %5854 = vmatprep.subr.mxu1 %v6512_v48 }
 0x1fd   :  { %5852 = vmatmul.mubr.msk.f32.vlgmr.msra.gmra.mrb[4].mxu1 %vm213_vm2, %v6409_v18 }
 0x1fe   :  { %5855 = vmatpush3.msra.mxu1 %v6512_v48  ;;  %5856 = vmatprep.mubr.msk.f32.mxu1 %vm213_vm2, %v6443_v27 }
 0x1ff   :  { %5859 = vmatprep.subr.mxu1 %v6523_v49 }
 0x205   :  { %5857 = vmatmul.mubr.msk.f32.vlgmr.msra.gmra.mrb[4].mxu1 %vm213_vm2, %v6437_v26 }
 0x206   :  { %5860 = vmatpush3.msra.mxu1 %v6523_v49  ;;  %5861 = vmatprep.mubr.msk.f32.mxu1 %vm213_vm2, %v6539_v52 }
 0x207   :  { %5879 = vmatprep.subr.mxu1 %v6549_v53 }
 0x20d   :  { %5862 = vmatmul.mubr.msk.f32.vlgmr.msra.gmra.mrb[4].mxu1 %vm213_vm2, %v6533_v51 }
 0x20e   :  { %5880 = vmatpush3.msra.mxu1 %v6549_v53 }
 0x20f   :  { %5884 = vmatprep.subr.mxu1 %v6558_v54 }
 0x2c4   :  { %v5828_v58 = vpop.f32.mrb[2].mxu1 }
 0x2c5   :  { %v6572_v59 = vadd.f32 %v5828_v58, %v6569_v57  ;;  %v703_v60 = vpop.f32.mrb[3].mxu1 }
 0x2c6   :  { %v6575_v61 = vadd.f32 %v6569_v57, %v703_v60 }
 0x2c7   :  { %v723_v62 = vmax.f32 %v6572_v59, 0.0 }
 0x2c8   :  { %v722_v63 = vmax.f32 %v6575_v61, 0.0 }
 0x2c9   :  { %v728_v0 = vrot.slane %v723_v62, 7 }
 0x2ca   :  { %v727_v1 = vrot.slane %v722_v63, 7 }
 0x2cc   :  { %v729_v2 = vsel %vm726_vm5, %v727_v1, %v728_v0  ;;  %v732_v3 = vsel %vm726_vm5, 0.0, %v727_v1 }
 0x2cd   :  { %v734_v4 = vsel %vm733_vm4, %v729_v2, 0.0  ;;  %v737_v5 = vrot.slane %v732_v3, 1  ;;  %v898_v9 = vrot.slane %v732_v3, 2 }
 0x2ce   :  { %v738_v6 = vrot.slane %v734_v4, 1  ;;  %v899_v10 = vrot.slane %v734_v4, 2 }
 0x2d0   :  { %v739_v7 = vsel %vm209_vm1, %v737_v5, %v738_v6  ;;  %v900_v11 = vsel %vm372_vm3, %v898_v9, %v899_v10 }
 0x2d1   :  { %5831 = vmatprep.mubr.msk.f32.mxu0 %vm213_vm2, %v739_v7 }
 0x2d2   :  { %5832 = vmatmul.mubr.msk.f32.vlgmr.msra.gmra.mrb[4].mxu0 %vm213_vm2, %v738_v6 }
 0x2d3   :  { %5836 = vmatprep.mubr.msk.f32.mxu0 %vm213_vm2, %v732_v3  ;;  %5835 = vmatpush3.msra.mxu0 %v6558_v54 }
 0x2d4   :  { %5839 = vmatprep.subr.mxu0 %v6591_v8 }
 0x2da   :  { %5837 = vmatmul.mubr.msk.f32.vlgmr.msra.gmra.mrb[4].mxu0 %vm213_vm2, %v734_v4 }
 0x2db   :  { %5841 = vmatprep.mubr.msk.f32.mxu0 %vm213_vm2, %v900_v11  ;;  %5840 = vmatpush3.msra.mxu0 %v6591_v8 }
 0x2dc   :  { %5864 = vmatprep.subr.mxu0 %v6453_v28 }
 0x2e0   :  { %v5863_v13 = vpop.f32.mrb[4].mxu1 }
 0x2e1   :  { %v1322_v17 = vadd.f32 %v5863_v13, %v6605_v12  ;;  %v1304_v19 = vpop.f32.mrb[5].mxu1 }
 0x2e2   :  { %v1321_v22 = vadd.f32 %v6605_v12, %v1304_v19  ;;  %5842 = vmatmul.mubr.msk.f32.vlgmr.msra.gmra.mrb[4].mxu0 %vm213_vm2, %v899_v10 }
 0x2e3   :  { %v1324_v25 = vmax.f32 %v1322_v17, 0.0  ;;  %5865 = vmatpush3.msra.mxu0 %v6453_v28 }
 0x2e4   :  { %v1323_v30 = vmax.f32 %v1321_v22, 0.0  ;;  %5869 = vmatprep.subr.mxu0 %v6460_v29 }
 0x2e5   :  { %v1328_v31 = vrot.slane %v1324_v25, 1  ;;  %v1489_v33 = vrot.slane %v1324_v25, 2 }
 0x2e6   :  { %v1327_v34 = vrot.slane %v1323_v30, 1  ;;  %v1488_v35 = vrot.slane %v1323_v30, 2 }
 0x2e8   :  { %v1329_v36 = vsel %vm209_vm1, %v1327_v34, %v1328_v31  ;;  %v1490_v37 = vsel %vm372_vm3, %v1488_v35, %v1489_v33 }
 0x2e9   :  { %5866 = vmatprep.mubr.msk.f32.mxu0 %vm213_vm2, %v1329_v36 }
 0x2ea   :  { %5867 = vmatmul.mubr.msk.f32.vlgmr.msra.gmra.mrb[6].mxu0 %vm213_vm2, %v1328_v31  ;;  %v6771_v31 = vld [vmem:[%s7084_s8] ss:$0 sm:$0xff]  ;;  %s6266_s8 = smov 8  }
 0x2eb   :  { %5870 = vmatpush3.msra.mxu0 %v6460_v29  ;;  %5871 = vmatprep.mubr.msk.f32.mxu0 %vm213_vm2, %v1323_v30 }
 0x2ec   :  { %5874 = vmatprep.subr.mxu0 %v6484_v45 }
 0x2f2   :  { %5872 = vmatmul.mubr.msk.f32.vlgmr.msra.gmra.mrb[6].mxu0 %vm213_vm2, %v1324_v25 }
 0x2f3   :  { %5875 = vmatpush3.msra.mxu0 %v6484_v45  ;;  %5876 = vmatprep.mubr.msk.f32.mxu0 %vm213_vm2, %v1490_v37 }
 0x2f4   :  { %5894 = vmatprep.subr.mxu0 %v6622_v38 }
 0x2fa   :  { %5877 = vmatmul.mubr.msk.f32.vlgmr.msra.gmra.mrb[6].mxu0 %vm213_vm2, %v1489_v33 }
 0x2fb   :  { %5895 = vmatpush3.msra.mxu0 %v6622_v38  ;;  %5896 = vmatprep.mubr.msk.f32.mxu0 %vm213_vm2, %v6420_v23  ;;  %v6652_v23 = vld [vmem:[%s7081_s5 + $0x18] sm:$0xff] }
 0x2fc   :  { %5899 = vmatprep.subr.mxu0 %v6631_v39 }
 0x2fe   :  { %5897 = vmatmul.mubr.msk.f32.vlgmr.msra.gmra.mrb[8].mxu0 %vm213_vm2, %v6415_v21  ;;  %v6663_v21 = vld [vmem:[%s7081_s5 + $0x20] sm:$0xff] }
 0x2ff   :  { %5900 = vmatpush3.msra.mxu0 %v6631_v39  ;;  %5901 = vmatprep.mubr.msk.f32.mxu0 %vm213_vm2, %v6412_v20  ;;  %v6689_v20 = vrot.slane %v6675_v42, 1 }
 0x300   :  { %5904 = vmatprep.subr.mxu0 %v6641_v40 }
 0x306   :  { %5902 = vmatmul.mubr.msk.f32.vlgmr.msra.gmra.mrb[8].mxu0 %vm213_vm2, %v6409_v18 }
 0x307   :  { %5905 = vmatpush3.msra.mxu0 %v6641_v40  ;;  %5906 = vmatprep.mubr.msk.f32.mxu0 %vm213_vm2, %v6443_v27  ;;  %v2154_v27 = vrot.slane %v6409_v18, 4  ;;  %v2784_v18 = vrot.slane %v6679_v43, 1 }
 0x308   :  { %5909 = vmatprep.subr.mxu0 %v6652_v23 }
 0x309   :  { %v6693_v16 = vsel %vm209_vm1, %v2784_v18, %v6689_v20 }
 0x30e   :  { %5907 = vmatmul.mubr.msk.f32.vlgmr.msra.gmra.mrb[8].mxu0 %vm213_vm2, %v6437_v26  ;;  %v2155_v26 = vsel %vm1584_vm6, %v2153_v41, %v2154_v27 }
 0x30f   :  { %5910 = vmatpush3.msra.mxu0 %v6652_v23  ;;  %5911 = vmatprep.mubr.msk.f32.mxu0 %vm213_vm2, %v6539_v52 }
 0x310   :  { %5914 = vmatprep.subr.mxu0 %v6663_v21 }
 0x316   :  { %5912 = vmatmul.mubr.msk.f32.vlgmr.msra.gmra.mrb[8].mxu0 %vm213_vm2, %v6533_v51 }
 0x317   :  { %5915 = vmatpush3.msra.mxu0 %v6663_v21  ;;  %5916 = vmatprep.mubr.msk.f32.mxu0 %vm213_vm2, %v2155_v26 }
 0x318   :  { %5949 = vmatprep.subr.mxu0 %v6393_v14 }
 0x31e   :  { %5917 = vmatmul.mubr.msk.f32.vlgmr.msra.gmra.mrb[8].mxu0 %vm213_vm2, %v2154_v27 }
 0x31f   :  { %5950 = vmatpush3.msra.mxu0 %v6393_v14  ;;  %5951 = vmatprep.mubr.msk.f32.mxu0 %vm213_vm2, %v6693_v16  ;;  %v6712_v14 = vsel %vm372_vm3, %v2945_v44, %v6708_v50 }
 0x320   :  { %5954 = vmatprep.subr.mxu0 %v6400_v15 }
 0x322   :  { %5952 = vmatmul.mubr.msk.f32.vlgmr.msra.gmra.mrb[10].mxu0 %vm213_vm2, %v6689_v20 }
 0x323   :  { %5955 = vmatpush3.msra.mxu0 %v6400_v15  ;;  %5956 = vmatprep.mubr.msk.f32.mxu0 %vm213_vm2, %v6679_v43  ;;  %v6727_v15 = vld [vmem:[%s7088_s12] ss:$0 sm:$0xff] }
 0x324   :  { %5959 = vmatprep.subr.mxu0 %v6427_v24 }
 0x32a   :  { %5957 = vmatmul.mubr.msk.f32.vlgmr.msra.gmra.mrb[10].mxu0 %vm213_vm2, %v6675_v42 }
 0x32b   :  { %5960 = vmatpush3.msra.mxu0 %v6427_v24  ;;  %5961 = vmatprep.mubr.msk.f32.mxu0 %vm213_vm2, %v6712_v14 }
 0x32c   :  { %5979 = vmatprep.subr.mxu0 %v6549_v53 }
 0x332   :  { %5962 = vmatmul.mubr.msk.f32.vlgmr.msra.gmra.mrb[10].mxu0 %vm213_vm2, %v6708_v50 }
 0x333   :  { %5980 = vmatpush3.msra.mxu0 %v6549_v53 }
 0x334   :  { %5984 = vmatprep.subr.mxu0 %v6558_v54 }
 0x3b5   :  { %v5843_v51 = vpop.f32.mrb[4].mxu0 }
 0x3b6   :  { %v989_v24 = vadd.f32 %v5843_v51, %v6727_v15  ;;  %v971_v52 = vpop.f32.mrb[5].mxu0 }
 0x3b7   :  { %v988_v55 = vadd.f32 %v6727_v15, %v971_v52 }
 0x3b8   :  { %v991_v56 = vmax.f32 %v989_v24, 0.0 }
 0x3b9   :  { %v990_v58 = vmax.f32 %v988_v55, 0.0 }
 0x3ba   :  { %v993_v60 = vadd.f32 %v991_v56, %v723_v62 }
 0x3bb   :  { %v992_v0 = vadd.f32 %v990_v58, %v722_v63 }
 0x3bc   :  { %v996_v1 = vsel %vm995_vm7, %v993_v60, -inf }
 0x3bd   :  { %v994_v2 = vsel %vm213_vm2, %v992_v0, -inf }
 0x3be   :  { %v6737_v3 = vmax.f32 %v994_v2, %v996_v1 }
 0x3cd   :  { %v5878_v4 = vpop.f32.mrb[6].mxu0 }
 0x3ce   :  { %v6740_v5 = vadd.f32 %v5878_v4, %v6569_v57  ;;  %v1561_v6 = vpop.f32.mrb[7].mxu0 }
 0x3cf   :  { %v6743_v7 = vadd.f32 %v6569_v57, %v1561_v6 }
 0x3d0   :  { %v1575_v59 = vmax.f32 %v6740_v5, 0.0 }
 0x3d1   :  { %v1574_v62 = vmax.f32 %v6743_v7, 0.0 }
 0x3d2   :  { %v1579_v61 = vrot.slane %v1575_v59, 7 }
 0x3d3   :  { %v1578_v63 = vrot.slane %v1574_v62, 7 }
 0x3d5   :  { %v1580_v9 = vsel %vm726_vm5, %v1578_v63, %v1579_v61  ;;  %v1583_v10 = vsel %vm726_vm5, 0.0, %v1578_v63 }
 0x3d6   :  { %v1585_v11 = vsel %vm1584_vm6, %v1580_v9, 0.0  ;;  %v1588_v13 = vrot.slane %v1583_v10, 1  ;;  %v1749_v22 = vrot.slane %v1583_v10, 2 }
 0x3d7   :  { %v1589_v17 = vrot.slane %v1585_v11, 1  ;;  %v1750_v25 = vrot.slane %v1585_v11, 2 }
 0x3d9   :  { %v1590_v19 = vsel %vm209_vm1, %v1588_v13, %v1589_v17  ;;  %v1751_v30 = vsel %vm372_vm3, %v1749_v22, %v1750_v25 }
 0x3da   :  { %5881 = vmatprep.mubr.msk.f32.mxu1 %vm213_vm2, %v1590_v19 }
 0x3db   :  { %5882 = vmatmul.mubr.msk.f32.vlgmr.msra.gmra.mrb[6].mxu1 %vm213_vm2, %v1589_v17 }
 0x3dc   :  { %5886 = vmatprep.mubr.msk.f32.mxu1 %vm213_vm2, %v1583_v10  ;;  %5885 = vmatpush3.msra.mxu1 %v6558_v54 }
 0x3dd   :  { %5889 = vmatprep.subr.mxu1 %v6591_v8 }
 0x3e3   :  { %5887 = vmatmul.mubr.msk.f32.vlgmr.msra.gmra.mrb[6].mxu1 %vm213_vm2, %v1585_v11 }
 0x3e4   :  { %5891 = vmatprep.mubr.msk.f32.mxu1 %vm213_vm2, %v1751_v30  ;;  %5890 = vmatpush3.msra.mxu1 %v6591_v8 }
 0x3e5   :  { %5919 = vmatprep.subr.mxu1 %v6453_v28 }
 0x3eb   :  { %5892 = vmatmul.mubr.msk.f32.vlgmr.msra.gmra.mrb[6].mxu1 %vm213_vm2, %v1750_v25 }
 0x3ec   :  { %5920 = vmatpush3.msra.mxu1 %v6453_v28 }
 0x3ed   :  { %5924 = vmatprep.subr.mxu1 %v6460_v29 }
 0x3f1   :  { %v5918_v33 = vpop.f32.mrb[8].mxu0 }
 0x3f2   :  { %v2244_v34 = vadd.f32 %v5918_v33, %v6771_v31  ;;  %v2226_v35 = vpop.f32.mrb[9].mxu0 }
 0x3f3   :  { %v2243_v36 = vadd.f32 %v6771_v31, %v2226_v35 }
 0x3f4   :  { %v2246_v37 = vmax.f32 %v2244_v34, 0.0 }
 0x3f5   :  { %v2245_v41 = vmax.f32 %v2243_v36, 0.0 }
 0x3f6   :  { %v2250_v27 = vrot.slane %v2246_v37, 1  ;;  %v2411_v26 = vrot.slane %v2246_v37, 2 }
 0x3f7   :  { %v2249_v18 = vrot.slane %v2245_v41, 1  ;;  %v2410_v44 = vrot.slane %v2245_v41, 2 }
 0x3f9   :  { %v2251_v51 = vsel %vm209_vm1, %v2249_v18, %v2250_v27  ;;  %v2412_v24 = vsel %vm372_vm3, %v2410_v44, %v2411_v26 }
 0x3fa   :  { %5921 = vmatprep.mubr.msk.f32.mxu1 %vm213_vm2, %v2251_v51 }
 0x3fb   :  { %5922 = vmatmul.mubr.msk.f32.vlgmr.msra.gmra.mrb[8].mxu1 %vm213_vm2, %v2250_v27 }
 0x3fc   :  { %5925 = vmatpush3.msra.mxu1 %v6460_v29  ;;  %5926 = vmatprep.mubr.msk.f32.mxu1 %vm213_vm2, %v2245_v41 }
 0x3fd   :  { %5929 = vmatprep.subr.mxu1 %v6484_v45 }
 0x403   :  { %5927 = vmatmul.mubr.msk.f32.vlgmr.msra.gmra.mrb[8].mxu1 %vm213_vm2, %v2246_v37 }
 0x404   :  { %5930 = vmatpush3.msra.mxu1 %v6484_v45  ;;  %5931 = vmatprep.mubr.msk.f32.mxu1 %vm213_vm2, %v2412_v24 }
 0x405   :  { %v5963_v52 = vpop.f32.mrb[10].mxu0  ;;  %5934 = vmatprep.subr.mxu1 %v6549_v53 }
 0x406   :  { %v3030_v55 = vadd.f32 %v5963_v52, %v6474_v32  ;;  %v3018_v56 = vpop.f32.mrb[11].mxu0 }
 0x407   :  { %v3029_v58 = vadd.f32 %v6474_v32, %v3018_v56 }
 0x408   :  { %v6788_v60 = vmax.f32 %v3030_v55, 0.0 }
 0x409   :  { %v6790_v0 = vmax.f32 %v3029_v58, 0.0 }
 0x40a   :  { %v3036_v1 = vrot.slane %v6788_v60, 1  ;;  %v3197_v2 = vrot.slane %v6788_v60, 2 }
 0x40b   :  { %5932 = vmatmul.mubr.msk.f32.vlgmr.msra.gmra.mrb[8].mxu1 %vm213_vm2, %v2411_v26  ;;  %v3035_v4 = vrot.slane %v6790_v0, 1  ;;  %v3196_v6 = vrot.slane %v6790_v0, 2 }
 0x40c   :  { %5935 = vmatpush3.msra.mxu1 %v6549_v53 }
 0x40d   :  { %5939 = vmatprep.subr.mxu1 %v6558_v54  ;;  %v3037_v32 = vsel %vm209_vm1, %v3035_v4, %v3036_v1  ;;  %v3198_v61 = vsel %vm372_vm3, %v3196_v6, %v3197_v2 }
 0x4be   :  { %v5893_v63 = vpop.f32.mrb[6].mxu1 }
 0x4bf   :  { %v1834_v9 = vadd.f32 %v5893_v63, %v6727_v15  ;;  %v1822_v10 = vpop.f32.mrb[7].mxu1 }
 0x4c0   :  { %v1833_v11 = vadd.f32 %v6727_v15, %v1822_v10 }
 0x4c1   :  { %v1836_v13 = vmax.f32 %v1834_v9, 0.0 }
 0x4c2   :  { %v1835_v17 = vmax.f32 %v1833_v11, 0.0 }
 0x4c3   :  { %v1838_v19 = vadd.f32 %v1836_v13, %v1575_v59 }
 0x4c4   :  { %v1837_v22 = vadd.f32 %v1835_v17, %v1574_v62 }
 0x4c5   :  { %v1841_v25 = vsel %vm1840_vm8, %v1838_v19, -inf }
 0x4c6   :  { %v1839_v30 = vsel %vm213_vm2, %v1837_v22, -inf }
 0x4c7   :  { %v1842_v33 = vmax.f32 %v1839_v30, %v1841_v25 }
 0x4c9   :  { %v1843_v34 = vrot.slane %v1842_v33, 4 }
 0x4cb   :  { %v1844_v35 = vmax.f32 %v1842_v33, %v1843_v34 }
 0x4cd   :  { %v1845_v36 = vrot.slane %v1844_v35, 2 }
 0x4cf   :  { %v1846_v37 = vmax.f32 %v1844_v35, %v1845_v36 }
 0x4d1   :  { %v1847_v41 = vrot.slane %v1846_v37, 1 }
 0x4d3   :  { %v1848_v27 = vmax.f32 %v1846_v37, %v1847_v41 }
 0x4d5   :  { %2772 = vrot.lane.b32.xlu1 %v1848_v27, %s6266_s8 }
 0x4de   :  { %v5933_v26 = vpop.f32.mrb[8].mxu1 }
 0x4df   :  { %v6813_v5 = vadd.f32 %v5933_v26, %v6569_v57  ;;  %v2483_v7 = vpop.f32.mrb[9].mxu1 }
 0x4e0   :  { %v6816_v59 = vadd.f32 %v6569_v57, %v2483_v7 }
 0x4e1   :  { %v2497_v62 = vmax.f32 %v6813_v5, 0.0 }
 0x4e2   :  { %v2496_v18 = vmax.f32 %v6816_v59, 0.0 }
 0x4e3   :  { %v2501_v44 = vrot.slane %v2497_v62, 7 }
 0x4e4   :  { %v2500_v51 = vrot.slane %v2496_v18, 7 }
 0x4e6   :  { %v2502_v24 = vsel %vm726_vm5, %v2500_v51, %v2501_v44  ;;  %v2505_v52 = vsel %vm726_vm5, 0.0, %v2500_v51 }
 0x4e7   :  { %v2507_v55 = vsel %vm2506_vm9, %v2502_v24, 0.0  ;;  %v2510_v56 = vrot.slane %v2505_v52, 1  ;;  %v2671_v6 = vrot.slane %v2505_v52, 2 }
 0x4e8   :  { %v2511_v58 = vrot.slane %v2507_v55, 1  ;;  %v2672_v63 = vrot.slane %v2507_v55, 2 }
 0x4ea   :  { %v2512_v4 = vsel %vm209_vm1, %v2510_v56, %v2511_v58  ;;  %v2673_v9 = vsel %vm372_vm3, %v2671_v6, %v2672_v63 }
 0x4eb   :  { %5936 = vmatprep.mubr.msk.f32.mxu1 %vm213_vm2, %v2512_v4 }
 0x4ec   :  { %5937 = vmatmul.mubr.msk.f32.vlgmr.msra.gmra.mrb[10].mxu1 %vm213_vm2, %v2511_v58 }
 0x4ed   :  { %5940 = vmatpush3.msra.mxu1 %v6558_v54  ;;  %5941 = vmatprep.mubr.msk.f32.mxu1 %vm213_vm2, %v2505_v52 }
 0x4ee   :  { %5944 = vmatprep.subr.mxu1 %v6591_v8 }
 0x4f4   :  { %5942 = vmatmul.mubr.msk.f32.vlgmr.msra.gmra.mrb[10].mxu1 %vm213_vm2, %v2507_v55 }
 0x4f5   :  { %5945 = vmatpush3.msra.mxu1 %v6591_v8  ;;  %5946 = vmatprep.mubr.msk.f32.mxu1 %vm213_vm2, %v2673_v9 }
 0x4f6   :  { %5964 = vmatprep.subr.mxu1 %v6453_v28 }
 0x4fc   :  { %5947 = vmatmul.mubr.msk.f32.vlgmr.msra.gmra.mrb[10].mxu1 %vm213_vm2, %v2672_v63 }
 0x4fd   :  { %5965 = vmatpush3.msra.mxu1 %v6453_v28  ;;  %5966 = vmatprep.mubr.msk.f32.mxu1 %vm213_vm2, %v3037_v32 }
 0x4fe   :  { %5969 = vmatprep.subr.mxu1 %v6460_v29 }
 0x500   :  { %5967 = vmatmul.mubr.msk.f32.vlgmr.msra.gmra.mrb[12].mxu1 %vm213_vm2, %v3036_v1 }
 0x501   :  { %5970 = vmatpush3.msra.mxu1 %v6460_v29  ;;  %5971 = vmatprep.mubr.msk.f32.mxu1 %vm213_vm2, %v6790_v0 }
 0x502   :  { %5974 = vmatprep.subr.mxu1 %v6484_v45 }
 0x508   :  { %5972 = vmatmul.mubr.msk.f32.vlgmr.msra.gmra.mrb[12].mxu1 %vm213_vm2, %v6788_v60  ;;  %v3783_v60 = vrot.slane %v6675_v42, 3 }
 0x509   :  { %5975 = vmatpush3.msra.mxu1 %v6484_v45  ;;  %5976 = vmatprep.mubr.msk.f32.mxu1 %vm213_vm2, %v3198_v61 }
 0x50a   :  { %5994 = vmatprep.subr.mxu1 %v6493_v46 }
 0x510   :  { %5977 = vmatmul.mubr.msk.f32.vlgmr.msra.gmra.mrb[12].mxu1 %vm213_vm2, %v3197_v2 }
 0x511   :  { %5995 = vmatpush3.msra.mxu1 %v6493_v46  ;;  %5996 = vmatprep.mubr.msk.f32.mxu1 %vm213_vm2, %v6693_v16  ;;  %v3782_v46 = vrot.slane %v6679_v43, 3 }
 0x512   :  { %5999 = vmatprep.subr.mxu1 %v6502_v47 }
 0x514   :  { %5997 = vmatmul.mubr.msk.f32.vlgmr.msra.gmra.mrb[14].mxu1 %vm213_vm2, %v6689_v20 }
 0x515   :  { %6000 = vmatpush3.msra.mxu1 %v6502_v47  ;;  %6001 = vmatprep.mubr.msk.f32.mxu1 %vm213_vm2, %v6679_v43  ;;  %v3784_v47 = vsel %vm733_vm4, %v3782_v46, %v3783_v60 }
 0x516   :  { %6004 = vmatprep.subr.mxu1 %v6512_v48 }
 0x51c   :  { %6002 = vmatmul.mubr.msk.f32.vlgmr.msra.gmra.mrb[14].mxu1 %vm213_vm2, %v6675_v42 }
 0x51d   :  { %6005 = vmatpush3.msra.mxu1 %v6512_v48  ;;  %6006 = vmatprep.mubr.msk.f32.mxu1 %vm213_vm2, %v6712_v14  ;;  %v4696_v48 = vrot.slane %v6679_v43, 4 }
 0x51e   :  { %6009 = vmatprep.subr.mxu1 %v6523_v49 }
 0x524   :  { %6007 = vmatmul.mubr.msk.f32.vlgmr.msra.gmra.mrb[14].mxu1 %vm213_vm2, %v6708_v50 }
 0x525   :  { %6010 = vmatpush3.msra.mxu1 %v6523_v49  ;;  %6011 = vmatprep.mubr.msk.f32.mxu1 %vm213_vm2, %v3784_v47  ;;  %v4697_v49 = vrot.slane %v6675_v42, 4 }
 0x526   :  { %6044 = vmatprep.subr.mxu1 %v6622_v38 }
 0x52c   :  { %6012 = vmatmul.mubr.msk.f32.vlgmr.msra.gmra.mrb[14].mxu1 %vm213_vm2, %v3783_v60 }
 0x52d   :  { %6046 = vmatprep.mubr.msk.f32.mxu1 %vm213_vm2, %v6693_v16  ;;  %6045 = vmatpush3.msra.mxu1 %v6622_v38  ;;  %v4698_v38 = vsel %vm1584_vm6, %v4696_v48, %v4697_v49 }
 0x52e   :  { %6049 = vmatprep.subr.mxu1 %v6631_v39 }
 0x530   :  { %6047 = vmatmul.mubr.msk.f32.vlgmr.msra.gmra.mrb[16].mxu1 %vm213_vm2, %v6689_v20 }
 0x531   :  { %6051 = vmatprep.mubr.msk.f32.mxu1 %vm213_vm2, %v6679_v43  ;;  %6050 = vmatpush3.msra.mxu1 %v6631_v39 }
 0x532   :  { %6054 = vmatprep.subr.mxu1 %v6641_v40 }
 0x538   :  { %6052 = vmatmul.mubr.msk.f32.vlgmr.msra.gmra.mrb[16].mxu1 %vm213_vm2, %v6675_v42 }
 0x539   :  { %6056 = vmatprep.mubr.msk.f32.mxu1 %vm213_vm2, %v6712_v14  ;;  %6055 = vmatpush3.msra.mxu1 %v6641_v40 }
 0x53a   :  { %6059 = vmatprep.subr.mxu1 %v6652_v23 }
 0x540   :  { %6057 = vmatmul.mubr.msk.f32.vlgmr.msra.gmra.mrb[16].mxu1 %vm213_vm2, %v6708_v50 }
 0x541   :  { %6061 = vmatprep.mubr.msk.f32.mxu1 %vm213_vm2, %v3784_v47  ;;  %6060 = vmatpush3.msra.mxu1 %v6652_v23 }
 0x542   :  { %6064 = vmatprep.subr.mxu1 %v6663_v21 }
 0x548   :  { %6062 = vmatmul.mubr.msk.f32.vlgmr.msra.gmra.mrb[16].mxu1 %vm213_vm2, %v3783_v60 }
 0x549   :  { %6066 = vmatprep.mubr.msk.f32.mxu1 %vm213_vm2, %v4698_v38  ;;  %6065 = vmatpush3.msra.mxu1 %v6663_v21 }
 0x54a   :  { %6084 = vmatprep.subr.mxu1 %v6549_v53 }
 0x550   :  { %6067 = vmatmul.mubr.msk.f32.vlgmr.msra.gmra.mrb[16].mxu1 %vm213_vm2, %v4697_v49 }
 0x551   :  { %6085 = vmatpush3.msra.mxu1 %v6549_v53 }
 0x552   :  { %6089 = vmatprep.subr.mxu1 %v6558_v54 }
 0x5cf   :  { %v5948_v39 = vpop.f32.mrb[10].mxu1 }
 0x5d0   :  { %v2756_v40 = vadd.f32 %v5948_v39, %v6727_v15  ;;  %v2744_v23 = vpop.f32.mrb[11].mxu1 }
 0x5d1   :  { %v2755_v42 = vadd.f32 %v6727_v15, %v2744_v23 }
 0x5d2   :  { %v2758_v43 = vmax.f32 %v2756_v40, 0.0 }
 0x5d3   :  { %v2757_v20 = vmax.f32 %v2755_v42, 0.0 }
 0x5d4   :  { %v2760_v21 = vadd.f32 %v2758_v43, %v2497_v62 }
 0x5d5   :  { %v2759_v16 = vadd.f32 %v2757_v20, %v2496_v18 }
 0x5d6   :  { %v2763_v50 = vsel %vm2762_vm10, %v2760_v21, -inf }
 0x5d7   :  { %v2761_v14 = vsel %vm213_vm2, %v2759_v16, -inf }
 0x5d8   :  { %v2764_v0 = vmax.f32 %v2761_v14, %v2763_v50 }
 0x5da   :  { %v2765_v1 = vrot.slane %v2764_v0, 4 }
 0x5dc   :  { %v2766_v2 = vmax.f32 %v2764_v0, %v2765_v1 }
 0x5de   :  { %v2767_v32 = vrot.slane %v2766_v2, 2 }
 0x5e0   :  { %v2768_v61 = vmax.f32 %v2766_v2, %v2767_v32 }
 0x5e2   :  { %v2769_v10 = vrot.slane %v2768_v61, 1 }
 0x5e3   :  { %v5978_v11 = vpop.f32.mrb[12].mxu1 }
 0x5e4   :  { %v6920_v13 = vadd.f32 %v5978_v11, %v6569_v57  ;;  %v3269_v17 = vpop.f32.mrb[13].mxu1  ;;  %v2770_v19 = vmax.f32 %v2768_v61, %v2769_v10 }
 0x5e5   :  { %v6923_v22 = vadd.f32 %v6569_v57, %v3269_v17 }
 0x5e6   :  { %v3283_v25 = vmax.f32 %v6920_v13, 0.0  ;;  %2776 = vrot.lane.b32.xlu1 %v2770_v19, %s6267_s2 }
 0x5e7   :  { %v3282_v30 = vmax.f32 %v6923_v22, 0.0 }
 0x5e8   :  { %v3287_v33 = vrot.slane %v3283_v25, 7 }
 0x5e9   :  { %v3286_v34 = vrot.slane %v3282_v30, 7 }
 0x5eb   :  { %v3288_v35 = vsel %vm726_vm5, %v3286_v34, %v3287_v33  ;;  %v3291_v36 = vsel %vm726_vm5, 0.0, %v3286_v34 }
 0x5ec   :  { %v3292_v37 = vsel %vm733_vm4, %v3288_v35, 0.0  ;;  %v3295_v41 = vrot.slane %v3291_v36, 1  ;;  %v3456_v5 = vrot.slane %v3291_v36, 2 }
 0x5ed   :  { %v3296_v27 = vrot.slane %v3292_v37, 1  ;;  %v3457_v7 = vrot.slane %v3292_v37, 2 }
 0x5ef   :  { %v3297_v26 = vsel %vm209_vm1, %v3295_v41, %v3296_v27  ;;  %v3458_v59 = vsel %vm372_vm3, %v3456_v5, %v3457_v7 }
 0x5f0   :  { %5981 = vmatprep.mubr.msk.f32.mxu0 %vm213_vm2, %v3297_v26 }
 0x5f1   :  { %5982 = vmatmul.mubr.msk.f32.vlgmr.msra.gmra.mrb[12].mxu0 %vm213_vm2, %v3296_v27 }
 0x5f2   :  { %5986 = vmatprep.mubr.msk.f32.mxu0 %vm213_vm2, %v3291_v36  ;;  %5985 = vmatpush3.msra.mxu0 %v6558_v54 }
 0x5f3   :  { %5989 = vmatprep.subr.mxu0 %v6591_v8 }
 0x5f9   :  { %5987 = vmatmul.mubr.msk.f32.vlgmr.msra.gmra.mrb[12].mxu0 %vm213_vm2, %v3292_v37 }
 0x5fa   :  { %5991 = vmatprep.mubr.msk.f32.mxu0 %vm213_vm2, %v3458_v59  ;;  %5990 = vmatpush3.msra.mxu0 %v6591_v8 }
 0x5fb   :  { %6014 = vmatprep.subr.mxu0 %v6453_v28 }
 0x5ff   :  { %v6013_v62 = vpop.f32.mrb[14].mxu1 }
 0x600   :  { %v3867_v18 = vadd.f32 %v6013_v62, %v6605_v12  ;;  %v3855_v44 = vpop.f32.mrb[15].mxu1 }
 0x601   :  { %v3866_v51 = vadd.f32 %v6605_v12, %v3855_v44  ;;  %5992 = vmatmul.mubr.msk.f32.vlgmr.msra.gmra.mrb[12].mxu0 %vm213_vm2, %v3457_v7 }
 0x602   :  { %v3869_v24 = vmax.f32 %v3867_v18, 0.0  ;;  %6015 = vmatpush3.msra.mxu0 %v6453_v28 }
 0x603   :  { %v3868_v52 = vmax.f32 %v3866_v51, 0.0  ;;  %6019 = vmatprep.subr.mxu0 %v6460_v29 }
 0x604   :  { %v3873_v55 = vrot.slane %v3869_v24, 1  ;;  %v4034_v56 = vrot.slane %v3869_v24, 2 }
 0x605   :  { %v3872_v58 = vrot.slane %v3868_v52, 1  ;;  %v4033_v4 = vrot.slane %v3868_v52, 2 }
 0x607   :  { %v3874_v6 = vsel %vm209_vm1, %v3872_v58, %v3873_v55  ;;  %v4035_v63 = vsel %vm372_vm3, %v4033_v4, %v4034_v56 }
 0x608   :  { %6016 = vmatprep.mubr.msk.f32.mxu0 %vm213_vm2, %v3874_v6 }
 0x609   :  { %6017 = vmatmul.mubr.msk.f32.vlgmr.msra.gmra.mrb[14].mxu0 %vm213_vm2, %v3873_v55 }
 0x60a   :  { %6020 = vmatpush3.msra.mxu0 %v6460_v29  ;;  %6021 = vmatprep.mubr.msk.f32.mxu0 %vm213_vm2, %v3868_v52 }
 0x60b   :  { %6024 = vmatprep.subr.mxu0 %v6484_v45 }
 0x611   :  { %6022 = vmatmul.mubr.msk.f32.vlgmr.msra.gmra.mrb[14].mxu0 %vm213_vm2, %v3869_v24 }
 0x612   :  { %6025 = vmatpush3.msra.mxu0 %v6484_v45  ;;  %6026 = vmatprep.mubr.msk.f32.mxu0 %vm213_vm2, %v4035_v63 }
 0x613   :  { %6029 = vmatprep.subr.mxu0 %v6549_v53 }
 0x619   :  { %6027 = vmatmul.mubr.msk.f32.vlgmr.msra.gmra.mrb[14].mxu0 %vm213_vm2, %v4034_v56 }
 0x61a   :  { %6030 = vmatpush3.msra.mxu0 %v6549_v53 }
 0x61b   :  { %6034 = vmatprep.subr.mxu0 %v6558_v54 }
 0x623   :  { %v6068_v12 = vpop.f32.mrb[16].mxu1 }
 0x624   :  { %v4781_v9 = vadd.f32 %v6068_v12, %v6771_v31  ;;  %v4769_v46 = vpop.f32.mrb[17].mxu1 }
 0x625   :  { %v4780_v60 = vadd.f32 %v6771_v31, %v4769_v46 }
 0x626   :  { %v4783_v47 = vmax.f32 %v4781_v9, 0.0 }
 0x627   :  { %v4782_v48 = vmax.f32 %v4780_v60, 0.0 }
 0x628   :  { %v4787_v49 = vrot.slane %v4783_v47, 1  ;;  %v4948_v38 = vrot.slane %v4783_v47, 2 }
 0x629   :  { %v4786_v39 = vrot.slane %v4782_v48, 1  ;;  %v4947_v40 = vrot.slane %v4782_v48, 2 }
 0x62b   :  { %v4788_v23 = vsel %vm209_vm1, %v4786_v39, %v4787_v49  ;;  %v4949_v42 = vsel %vm372_vm3, %v4947_v40, %v4948_v38 }
 0x6d4   :  { %v5993_v43 = vpop.f32.mrb[12].mxu0 }
 0x6d5   :  { %v3541_v53 = vadd.f32 %v5993_v43, %v6727_v15  ;;  %v3529_v20 = vpop.f32.mrb[13].mxu0 }
 0x6d6   :  { %v3540_v21 = vadd.f32 %v6727_v15, %v3529_v20  ;;  %v5323_v20 = vld [vmem:[%s7089_s13 + $0x8] sm:$0xff] }
 0x6d7   :  { %v3543_v16 = vmax.f32 %v3541_v53, 0.0 }
 0x6d8   :  { %v3542_v50 = vmax.f32 %v3540_v21, 0.0  ;;  %v6268_v21 = vmov 0.0|0.0  }
 0x6d9   :  { %v3545_v31 = vadd.f32 %v3543_v16, %v3283_v25 }
 0x6da   :  { %v3544_v14 = vadd.f32 %v3542_v50, %v3282_v30 }
 0x6db   :  { %v3547_v0 = vsel %vm995_vm7, %v3545_v31, -inf }
 0x6dc   :  { %v3546_v1 = vsel %vm213_vm2, %v3544_v14, -inf }
 0x6dd   :  { %v6977_v2 = vmax.f32 %v3546_v1, %v3547_v0 }
 0x6ec   :  { %v6028_v32 = vpop.f32.mrb[14].mxu0 }
 0x6ed   :  { %v4118_v61 = vadd.f32 %v6028_v32, %v6569_v57  ;;  %v4106_v10 = vpop.f32.mrb[15].mxu0 }
 0x6ee   :  { %v4117_v11 = vadd.f32 %v6569_v57, %v4106_v10 }
 0x6ef   :  { %v4120_v17 = vmax.f32 %v4118_v61, 0.0 }
 0x6f0   :  { %v4119_v19 = vmax.f32 %v4117_v11, 0.0 }
 0x6f1   :  { %v4124_v33 = vrot.slane %v4120_v17, 7 }
 0x6f2   :  { %v4123_v13 = vrot.slane %v4119_v19, 7 }
 0x6f4   :  { %v4125_v25 = vsel %vm726_vm5, %v4123_v13, %v4124_v33  ;;  %v4128_v22 = vsel %vm726_vm5, 0.0, %v4123_v13  ;;  %v5324_v33 = vld [vmem:[%s7089_s13 + $0x10] sm:$0xff]  ;;  %v6269_v13 = vmov 0.0  }
 0x6f5   :  { %v4129_v30 = vsel %vm1584_vm6, %v4125_v25, 0.0  ;;  %v4132_v34 = vrot.slane %v4128_v22, 1  ;;  %v4293_v37 = vrot.slane %v4128_v22, 2 }
 0x6f6   :  { %v4133_v35 = vrot.slane %v4129_v30, 1  ;;  %v4294_v41 = vrot.slane %v4129_v30, 2 }
 0x6f8   :  { %v4134_v36 = vsel %vm209_vm1, %v4132_v34, %v4133_v35  ;;  %v4295_v27 = vsel %vm372_vm3, %v4293_v37, %v4294_v41 }
 0x6f9   :  { %6031 = vmatprep.mubr.msk.f32.mxu0 %vm213_vm2, %v4134_v36  ;;  %v998_v36 = vrot.slane %v6737_v3, 4 }
 0x6fa   :  { %6032 = vmatmul.mubr.msk.f32.vlgmr.msra.gmra.mrb[16].mxu0 %vm213_vm2, %v4133_v35  ;;  %v3549_v35 = vrot.slane %v6977_v2, 4 }
 0x6fb   :  { %6035 = vmatpush3.msra.mxu0 %v6558_v54  ;;  %6036 = vmatprep.mubr.msk.f32.mxu0 %vm213_vm2, %v4128_v22 }
 0x6fc   :  { %6039 = vmatprep.subr.mxu0 %v6591_v8  ;;  %v3550_v37 = vmax.f32 %v6977_v2, %v3549_v35 }
 0x702   :  { %6037 = vmatmul.mubr.msk.f32.vlgmr.msra.gmra.mrb[16].mxu0 %vm213_vm2, %v4129_v30 }
 0x703   :  { %6040 = vmatpush3.msra.mxu0 %v6591_v8  ;;  %6041 = vmatprep.mubr.msk.f32.mxu0 %vm213_vm2, %v4295_v27  ;;  %v3551_v27 = vrot.slane %v3550_v37, 2 }
 0x704   :  { %6069 = vmatprep.subr.mxu0 %v6453_v28 }
 0x70a   :  { %6042 = vmatmul.mubr.msk.f32.vlgmr.msra.gmra.mrb[16].mxu0 %vm213_vm2, %v4294_v41  ;;  %v999_v41 = vmax.f32 %v6737_v3, %v998_v36 }
 0x70b   :  { %6070 = vmatpush3.msra.mxu0 %v6453_v28  ;;  %6071 = vmatprep.mubr.msk.f32.mxu0 %vm213_vm2, %v4788_v23 }
 0x70c   :  { %6074 = vmatprep.subr.mxu0 %v6460_v29 }
 0x70e   :  { %6072 = vmatmul.mubr.msk.f32.vlgmr.msra.gmra.mrb[18].mxu0 %vm213_vm2, %v4787_v49 }
 0x70f   :  { %6075 = vmatpush3.msra.mxu0 %v6460_v29  ;;  %6076 = vmatprep.mubr.msk.f32.mxu0 %vm213_vm2, %v4782_v48 }
 0x710   :  { %6079 = vmatprep.subr.mxu0 %v6484_v45 }
 0x716   :  { %6077 = vmatmul.mubr.msk.f32.vlgmr.msra.gmra.mrb[18].mxu0 %vm213_vm2, %v4783_v47 }
 0x717   :  { %6080 = vmatpush3.msra.mxu0 %v6484_v45  ;;  %6081 = vmatprep.mubr.msk.f32.mxu0 %vm213_vm2, %v4949_v42 }
 0x718   :  { %6124 = vmatprep.subr.bf16.mxu0 %v6268_v21 }
 0x71e   :  { %6082 = vmatmul.mubr.msk.f32.vlgmr.msra.gmra.mrb[18].mxu0 %vm213_vm2, %v4948_v38 }
 0x71f   :  { %6105 = vmatprep.mubr.msk.f32.mxu0 %vm6270_vm11, %v6269_v13 }
 0x7dd   :  { %v6043_v28 = vpop.f32.mrb[16].mxu0 }
 0x7de   :  { %v4378_v26 = vadd.f32 %v6043_v28, %v6727_v15  ;;  %v4366_v5 = vpop.f32.mrb[17].mxu0  ;;  %v1000_v28 = vrot.slane %v999_v41, 2 }
 0x7df   :  { %v4377_v7 = vadd.f32 %v6727_v15, %v4366_v5 }
 0x7e0   :  { %v4380_v59 = vmax.f32 %v4378_v26, 0.0  ;;  %v3552_v26 = vmax.f32 %v3550_v37, %v3551_v27  ;;  %v1001_v5 = vmax.f32 %v999_v41, %v1000_v28 }
 0x7e1   :  { %v4379_v29 = vmax.f32 %v4377_v7, 0.0 }
 0x7e2   :  { %v4382_v62 = vadd.f32 %v4380_v59, %v4120_v17  ;;  %v3553_v7 = vrot.slane %v3552_v26, 1  ;;  %v2773_v59 = vpop.permute.xlu1 %2772 }
 0x7e3   :  { %v4381_v18 = vadd.f32 %v4379_v29, %v4119_v19  ;;  %v1002_v29 = vrot.slane %v1001_v5, 1 }
 0x7e4   :  { %v4384_v44 = vsel %vm1840_vm8, %v4382_v62, -inf }
 0x7e5   :  { %v4383_v51 = vsel %vm213_vm2, %v4381_v18, -inf  ;;  %v3554_v18 = vmax.f32 %v3552_v26, %v3553_v7 }
 0x7e6   :  { %v4385_v24 = vmax.f32 %v4383_v51, %v4384_v44  ;;  %v1003_v44 = vmax.f32 %v1001_v5, %v1002_v29  ;;  %v2777_v51 = vpop.permute.xlu1 %2776 }
 0x7e8   :  { %v4386_v45 = vrot.slane %v4385_v24, 4  ;;  %v2779_v2 = vsel %vm213_vm2, %v1003_v44, %v2773_v59 }
 0x7e9   :  { %v2781_v3 = vsel %vm2780_vm12, %v2779_v2, %v2777_v51 }
 0x7ea   :  { %v4387_v52 = vmax.f32 %v4385_v24, %v4386_v45 }
 0x7ec   :  { %v4388_v55 = vrot.slane %v4387_v52, 2 }
 0x7ee   :  { %v4389_v56 = vmax.f32 %v4387_v52, %v4388_v55 }
 0x7f0   :  { %v4390_v58 = vrot.slane %v4389_v56, 1 }
 0x7f1   :  { %v6083_v4 = vpop.f32.mrb[18].mxu0 }
 0x7f2   :  { %v5032_v6 = vadd.f32 %v6083_v4, %v6569_v57  ;;  %v5020_v63 = vpop.f32.mrb[19].mxu0  ;;  %v4391_v12 = vmax.f32 %v4389_v56, %v4390_v58 }
 0x7f3   :  { %v5031_v9 = vadd.f32 %v6569_v57, %v5020_v63 }
 0x7f4   :  { %v5034_v46 = vmax.f32 %v5032_v6, 0.0  ;;  %5307 = vrot.lane.b32.xlu0 %v4391_v12, %s6266_s8 }
 0x7f5   :  { %v5033_v60 = vmax.f32 %v5031_v9, 0.0 }
 0x7f6   :  { %v5038_v47 = vrot.slane %v5034_v46, 7 }
 0x7f7   :  { %v5037_v48 = vrot.slane %v5033_v60, 7 }
 0x7f9   :  { %v5039_v49 = vsel %vm726_vm5, %v5037_v48, %v5038_v47  ;;  %v5042_v38 = vsel %vm726_vm5, 0.0, %v5037_v48 }
 0x7fa   :  { %v5043_v39 = vsel %vm2506_vm9, %v5039_v49, 0.0  ;;  %v5046_v40 = vrot.slane %v5042_v38, 1  ;;  %v5207_v57 = vrot.slane %v5042_v38, 2 }
 0x7fb   :  { %v5047_v23 = vrot.slane %v5043_v39, 1  ;;  %v5208_v43 = vrot.slane %v5043_v39, 2 }
 0x7fd   :  { %v5048_v42 = vsel %vm209_vm1, %v5046_v40, %v5047_v23  ;;  %v5209_v53 = vsel %vm372_vm3, %v5207_v57, %v5208_v43 }
 0x7fe   :  { %6086 = vmatprep.mubr.msk.f32.mxu1 %vm213_vm2, %v5048_v42 }
 0x7ff   :  { %6087 = vmatmul.mubr.msk.f32.vlgmr.msra.gmra.mrb[18].mxu1 %vm213_vm2, %v5047_v23 }
 0x800   :  { %6090 = vmatpush3.msra.mxu1 %v6558_v54  ;;  %6091 = vmatprep.mubr.msk.f32.mxu1 %vm213_vm2, %v5042_v38  ;;  %v5322_v54 = vld [vmem:[%s7089_s13] sm:$0xff]  ;;  %s6271_s13 = smov [#allocation4]  }
 0x801   :  { %6094 = vmatprep.subr.mxu1 %v6591_v8  ;;  %v6125_v16 = vpack.c.bf16 %v5323_v20, %v5322_v54  ;;  %s5424_s22 = sshll.u32 %s6271_s13, 4  ;;  %s5425_s22 = int_to_ptr.vmem [resolvable:$true] %s5424_s22 }
 0x802   :  { %s6218_s10 = scalar_lea.vmem %s5425_s22, 32  ;;  %p6223_p1 = scmp.lt.s32.totalorder %s5425_s22, %s5425_s22 }
 0x803   :  { %6126 = vmatpush3.bf16.msra.mxu0 %v6125_v16  ;;  %p6219_p0 = scmp.ne.s32.totalorder %s5425_s22, %s6218_s10  ;;  %p6224_p2 = scmp.lt.s32.totalorder %s6218_s10, %s6218_s10 }
 0x804   :  { %6103 = vmatprep.subr.mxu0 %v6269_v13 }
 0x805   :  { %p6225_p3 = por %p6224_p2, %p6223_p1 }
 0x807   :  { %6092 = vmatmul.mubr.msk.f32.vlgmr.msra.gmra.mrb[18].mxu1 %vm213_vm2, %v5043_v39  ;;  %6104 = vmatpush3.msra.mxu0 %v5324_v33  ;;  %p6226_p4 = pnand %p6225_p3, %p6219_p0 }
 0x808   :  { %6095 = vmatpush3.msra.mxu1 %v6591_v8  ;;  %6096 = vmatprep.mubr.msk.f32.mxu1 %vm213_vm2, %v5209_v53 }
 0x80f   :  { %6097 = vmatmul.mubr.msk.f32.vlgmr.msra.gmra.mrb[18].mxu1 %vm213_vm2, %v5208_v43 }
 0x866   :  { %v5308_v62 = vpop.permute.xlu0 %5307 }
 0x867   :  { %v5314_v24 = vsel %vm213_vm2, %v3554_v18, %v5308_v62 }
 0x8e2   :  { %v6098_v50 = vpop.f32.mrb[18].mxu1 }
 0x8e3   :  { %v5292_v31 = vadd.f32 %v6098_v50, %v6727_v15  ;;  %v5280_v8 = vpop.f32.mrb[19].mxu1 }
 0x8e4   :  { %v5291_v14 = vadd.f32 %v6727_v15, %v5280_v8 }
 0x8e5   :  { %v5294_v0 = vmax.f32 %v5292_v31, 0.0 }
 0x8e6   :  { %v5293_v1 = vmax.f32 %v5291_v14, 0.0 }
 0x8e7   :  { %v5296_v32 = vadd.f32 %v5294_v0, %v5034_v46 }
 0x8e8   :  { %v5295_v61 = vadd.f32 %v5293_v1, %v5033_v60 }
 0x8e9   :  { %v5298_v10 = vsel %vm2762_vm10, %v5296_v32, -inf }
 0x8ea   :  { %v5297_v11 = vsel %vm213_vm2, %v5295_v61, -inf }
 0x8eb   :  { %v5299_v17 = vmax.f32 %v5297_v11, %v5298_v10 }
 0x8ed   :  { %v5300_v19 = vrot.slane %v5299_v17, 4 }
 0x8ef   :  { %v5301_v25 = vmax.f32 %v5299_v17, %v5300_v19 }
 0x8f1   :  { %v5302_v15 = vrot.slane %v5301_v25, 2 }
 0x8f3   :  { %v5303_v22 = vmax.f32 %v5301_v25, %v5302_v15 }
 0x8f5   :  { %v5304_v30 = vrot.slane %v5303_v22, 1 }
 0x8f7   :  { %v5305_v34 = vmax.f32 %v5303_v22, %v5304_v30 }
 0x8f9   :  { %5311 = vrot.lane.b32.xlu0 %v5305_v34, %s6267_s2 }
 0x96b   :  { %v5312_v45 = vpop.permute.xlu0 %5311 }
 0x96c   :  { %v5315_v52 = vsel %vm2780_vm12, %v5314_v24, %v5312_v45 }
 0x96d   :  { %v5317_v55 = vrot.slane %v5315_v52, 7 }
 0x96f   :  { %v5319_v56 = vsel %vm726_vm5, %v2781_v3, %v5317_v55 }
 0x970   :  { %6106 = vmatmul.mubr.msk.f32.vlgmr.msra.gmra.mrb[20].mxu0 %vm5332_vm13, %v5319_v56  ;;  %5321 = vst.msk [vmem:[#allocation4] sm:$0x3] %vm5320_vm14, %v5319_v56 }
 0x971   :  { %6229 = shalt.err (!%p6226_p4)
}
 0x972   :  { %s6230_s24 = scalar_lea.hbm %s7092_s16, 32 }
 0x973   :  { %p6231_p5 = scmp.ne.s32.totalorder %s7092_s16, %s6230_s24  ;;  %p6234_p6 = scmp.lt.u32.totalorder %s6230_s24, %s7092_s16 }
 0x975   :  { %p6236_p7 = pnand %p6234_p6, %p6231_p5 }
 0x977   :  { %6239 = shalt.err (!%p6236_p7)
}
 0x978   :  { %5427 = dma.vmem_to_hbm [thread:$0]  %s5425_s22, 32, %s7092_s16, [#allocation5]   ;;  %v5579_v58 = vld [vmem:[%s7090_s14] ss:$0 sm:$0xff]  ;;  %vm5406_vm15 = vcmask 9216  }
 0x979   :  { %s6272_s9 = smov [#allocation2]  }
 0x97a   :  { %s5414_s29 = sshll.u32 %s6272_s9, 4  ;;  %s5415_s29 = int_to_ptr.vmem [resolvable:$true] %s5414_s29 }
 0x97b   :  { %s6240_s5 = scalar_lea.vmem %s5415_s29, 32  ;;  %p6245_p9 = scmp.lt.s32.totalorder %s5415_s29, %s5415_s29 }
 0x97c   :  { %p6241_p8 = scmp.ne.s32.totalorder %s5415_s29, %s6240_s5  ;;  %p6246_p10 = scmp.lt.s32.totalorder %s6240_s5, %s6240_s5 }
 0x97e   :  { %p6247_p11 = por %p6246_p10, %p6245_p9 }
 0x980   :  { %p6248_p12 = pnand %p6247_p11, %p6241_p8 }
 0xa43   :  { %v5402_v4 = vpop.f32.mrb[20].mxu0 }
 0xa44   :  { %v5403_v6 = vadd.f32 %v5579_v58, %v5402_v4  ;;  %v6107_v63 = vpop.f32.mrb[21].mxu0 }
 0xa46   :  { %5407 = vst.msk [vmem:[#allocation2] sm:$0x3] %vm5406_vm15, %v5403_v6 }
 0xa47   :  { %6251 = shalt.err (!%p6248_p12)
}
 0xa48   :  { %s6252_s12 = scalar_lea.hbm %s7091_s15, 32 }
 0xa49   :  { %p6253_p13 = scmp.ne.s32.totalorder %s7091_s15, %s6252_s12  ;;  %p6256_p0 = scmp.lt.u32.totalorder %s6252_s12, %s7091_s15 }
 0xa4b   :  { %p6258_p1 = pnand %p6256_p0, %p6253_p13 }
 0xa4d   :  { %6261 = shalt.err (!%p6258_p1)
}
 0xa4e   :  { %5417 = dma.vmem_to_hbm [thread:$0]  %s5415_s29, 32, %s7091_s15, [#allocation3]  }
 0xa4f   :  { %6262 = dma.done.wait [#allocation3], 32  }
 0xa50   :  { %6263 = vsyncadd [#allocation3], 4294967264 }
 0xa51   :  { %6264 = dma.done.wait [#allocation5], 32  }
 0xa52   :  { %6265 = vsyncadd [#allocation5], 4294967264 }
 0xa53   :  { %5434 = vsyncpa [#allocation3], 1 }
 0xa54   :  { %5435 = vsyncpa [#allocation5], 1 }

</bundles_post_ra>
